<compile_context>
chip_gen: v7x
topology: tpu7x:2x2x1
jax: 0.10.0
libtpu: 0.0.40
codegen_flags: <defaults>
</compile_context>

<pallas_src>
import jax
import jax.numpy as jnp
from jax import lax
from jax.experimental import pallas as pl
from jax.experimental.pallas import tpu as pltpu


_VSPEC = pl.BlockSpec(memory_space=pltpu.MemorySpace.VMEM)


# ----------------------------------------------------------------------------
# Fused Pallas kernel: stacked BiLSTM (length-masked) + Linear + softmax
# ----------------------------------------------------------------------------

def _make_fused_kernel(T, BP, H, n_layers):
    """Fused kernel for static (T, padded batch BP, per-dir hidden H, n_layers).

    Row layout is time-major flattened over the padded batch: row t*BP + b <-> (t, b).

    Inputs  : xa0 (N, D)  = embedded input in time order
              xb0 (N, D)  = embedded input time-reversed
              m_comb (N, 2H) per-step validity [mask[t] | mask[T-1-t]]
              per layer: wia, wib (D_l or 2H, 8H), whh (2H, 8H), b (1, 8H)
              head: wha, whb (2H, LP), bh (1, LP)
    Outputs : y_raw (N, 2H) = last layer's [fwd@t | bwd@(T-1-t)], outs (N, LP), p (N, LP)
    Scratch : gx (N, 8H) hoisted gate projection, xbs (N, 2H) reversed dual buffer

    Gate columns (8H = 128 lanes for H=16): [i_f i_b | f_f f_b | g_f g_b | o_f o_b].
    State layout: [h_f | h_b] (BP, 2H), whh block-diagonal.
    """
    H2, H8 = 2 * H, 8 * H

    def kernel(*refs):
        xa0_ref, xb0_ref, mcomb_ref = refs[0], refs[1], refs[2]
        lw = refs[3:3 + 4 * n_layers]
        wha_ref = refs[3 + 4 * n_layers]
        whb_ref = refs[4 + 4 * n_layers]
        bh_ref = refs[5 + 4 * n_layers]
        ya_ref = refs[6 + 4 * n_layers]      # output: last layer [fwd@t | bwd@(T-1-t)]
        outs_ref = refs[7 + 4 * n_layers]    # output: logits, label dim padded to 128 lanes
        p_ref = refs[8 + 4 * n_layers]       # output: softmax
        gx_ref = refs[9 + 4 * n_layers]      # scratch: hoisted input projection
        xbs_ref = refs[10 + 4 * n_layers]    # scratch: time-reversed dual buffer

        # Static lane mask for the g-gate (tanh-via-sigmoid) columns, computed once.
        lane8 = lax.broadcasted_iota(jnp.int32, (1, H8), 1)
        g8 = (lane8 >= 4 * H) & (lane8 < 6 * H)

        for l in range(n_layers):
            wia = lw[4 * l][...]
            wib = lw[4 * l + 1][...]
            whh = lw[4 * l + 2][...]
            bias = lw[4 * l + 3][...]
            if l == 0:
                xa, xb = xa0_ref[...], xb0_ref[...]
            else:
                xa, xb = ya_ref[...], xbs_ref[...]

            # Hoisted input projection (bias folded in). The dual weights already route
            # time-t features to fwd gate columns and time-(T-1-t) features to bwd gate
            # columns, so there is NO per-step select inside the recurrence.
            gx_ref[...] = (jnp.dot(xa, wia, preferred_element_type=jnp.float32)
                           + jnp.dot(xb, wib, preferred_element_type=jnp.float32)
                           + bias)

            h = jnp.zeros((BP, H2), jnp.float32)
            c = jnp.zeros((BP, H2), jnp.float32)

            # Fused fwd/bwd recurrence, fully unrolled (T static and small).
            # TODO(synk): switch to lax.fori_loop(..., unroll=k) when T grows past toy size.
            for t in range(T):
                s, e = t * BP, (t + 1) * BP
                rs, re = (T - 1 - t) * BP, (T - t) * BP
                gates = gx_ref[s:e, :] + jnp.dot(h, whh,
                                                 preferred_element_type=jnp.float32)
                # Single EUP sigmoid over the full 128-lane tile; g-columns were
                # pre-scaled by 2 so tanh(a) = 2*sigmoid(2a) - 1.
                sg = jax.nn.sigmoid(gates)
                acts = jnp.where(g8, 2.0 * sg - 1.0, sg)
                i_g = acts[:, 0:H2]
                f_g = acts[:, H2:2 * H2]
                g_g = acts[:, 2 * H2:3 * H2]
                o_g = acts[:, 3 * H2:4 * H2]
                c_new = f_g * c + i_g * g_g
                h_new = o_g * jnp.tanh(c_new)
                pred = mcomb_ref[s:e, :] > 0.0
                h = jnp.where(pred, h_new, h)
                c = jnp.where(pred, c_new, c)
                y = jnp.where(pred, h_new, 0.0)          # [fwd@t | bwd@(T-1-t)], exact 0 pads
                # Build the next layer's (and the head's) dual input in place:
                #   ya[t]  = [f_t | b_{T-1-t}]     (also the raw lstm output of the layer)
                #   xbs[t] = [f_{T-1-t} | b_t]
                ya_ref[s:e, :] = y
                xbs_ref[rs:re, :] = y

        # hidden2tag Linear + softmax, fused. Dual-expanded head weights consume
        # (ya, xbs) directly, so no re-ordering pass is needed before the matmul.
        outs = (jnp.dot(ya_ref[...], wha_ref[...], preferred_element_type=jnp.float32)
                + jnp.dot(xbs_ref[...], whb_ref[...], preferred_element_type=jnp.float32)
                + bh_ref[...])
        outs_ref[...] = outs
        mx = jnp.max(outs, axis=-1, keepdims=True)
        ex = jnp.exp(outs - mx)
        p_ref[...] = ex / jnp.sum(ex, axis=-1, keepdims=True)   # exact softmax

    return kernel


# ----------------------------------------------------------------------------
# Parameter construction (PyTorch layout -> fused kernel layout)
# ----------------------------------------------------------------------------

def _interleave_gate_cols(wf, wb, H):
    """(.., 4H) fwd & bwd tensors with gate blocks [i,f,g,o] -> (.., 8H) interleaved
    [i_f i_b | f_f f_b | g_f g_b | o_f o_b]."""
    parts = []
    for g in range(4):
        parts.append(wf[..., g * H:(g + 1) * H])
        parts.append(wb[..., g * H:(g + 1) * H])
    return jnp.concatenate(parts, axis=-1)


def _fuse_bilstm_layer(pt, H, first_layer):
    """pt: PyTorch-layout tensors wih_f/wih_b (4H, D), whh_f/whh_b (4H, H),
    bih_*/bhh_* (4H,). Returns dual-expanded {wia, wib, whh (2H,8H), b (1,8H)}
    with g-gate columns pre-scaled by 2 (tanh via a single sigmoid)."""
    H2, H4, H8 = 2 * H, 4 * H, 8 * H
    wih = _interleave_gate_cols(pt["wih_f"].T, pt["wih_b"].T, H)                 # (D, 8H)
    zH = jnp.zeros((H, H4), jnp.float32)
    whh = jnp.concatenate([
        _interleave_gate_cols(pt["whh_f"].T, zH, H),   # h_f rows feed fwd gate cols only
        _interleave_gate_cols(zH, pt["whh_b"].T, H),   # h_b rows feed bwd gate cols only
    ], axis=0)                                          # (2H, 8H), block-diagonal
    b = _interleave_gate_cols((pt["bih_f"] + pt["bhh_f"])[None, :],
                              (pt["bih_b"] + pt["bhh_b"])[None, :], H)           # (1, 8H)

    lane = jnp.arange(H8)
    # g-gate pre-scale: tanh(a) = 2*sigmoid(2a) - 1  ->  one EUP op per step instead of two.
    gscale = jnp.where((lane >= 4 * H) & (lane < 6 * H), 2.0, 1.0).astype(jnp.float32)
    wih, whh, b = wih * gscale, whh * gscale, b * gscale

    fmask = ((lane % H2) < H).astype(jnp.float32)      # forward-direction gate columns
    bmask = 1.0 - fmask
    if first_layer:
        wia = wih * fmask           # time-t input   -> fwd gate columns
        wib = wih * bmask           # time-(T-1-t)   -> bwd gate columns
    else:
        # Layer input (hidden_dim = 2H) arrives as the previous layer's dual buffers:
        #   xa[t] = [f_t | b_{T-1-t}],  xb[t] = [f_{T-1-t} | b_t]
        assert wih.shape[0] == H2
        wia = jnp.concatenate([wih[0:H] * fmask, wih[H:H2] * bmask], axis=0)
        wib = jnp.concatenate([wih[0:H] * bmask, wih[H:H2] * fmask], axis=0)
    return dict(wia=wia, wib=wib, whh=whh, b=b)


def init_params(key, vocab, emb_dim, hidden_dim, n_labels, n_layers, bilstm=True):
    assert bilstm
    H = hidden_dim // 2                      # per-direction hidden size
    keys = jax.random.split(key, 3 + 8 * n_layers)
    ki = iter(keys)

    params = {"H": H, "n_labels": n_labels}
    params["embedding"] = jax.random.normal(next(ki), (vocab, emb_dim), jnp.float32) * 0.1

    lstms, lstms_pt = [], []
    in_dim = emb_dim
    for l in range(n_layers):
        k = 1.0 / float(H) ** 0.5

        def u(shape):
            return jax.random.uniform(next(ki), shape, jnp.float32, -k, k)

        pt = dict(
            wih_f=u((4 * H, in_dim)), whh_f=u((4 * H, H)),
            bih_f=u((4 * H,)), bhh_f=u((4 * H,)),
            wih_b=u((4 * H, in_dim)), whh_b=u((4 * H, H)),
            bih_b=u((4 * H,)), bhh_b=u((4 * H,)),
        )
        lstms_pt.append(pt)
        lstms.append(_fuse_bilstm_layer(pt, H, first_layer=(l == 0)))
        in_dim = hidden_dim
    params["lstms"] = lstms
    params["lstms_pt"] = lstms_pt            # kept for the pure-JAX reference check

    kl = 1.0 / float(hidden_dim) ** 0.5
    w = jax.random.uniform(next(ki), (n_labels, hidden_dim), jnp.float32, -kl, kl)
    bb = jax.random.uniform(next(ki), (n_labels,), jnp.float32, -kl, kl)
    params["h2t_w_pt"] = w
    params["h2t_b_pt"] = bb

    # Lane-dense head: pad label dim to a multiple of 128 lanes; pad logits get -1e30 bias
    # so the in-kernel 128-lane softmax matches the L-wide softmax exactly.
    LP = 128 * ((n_labels + 127) // 128)
    Wt = w.T                                  # (2H, L)
    wha = jnp.zeros((2 * H, LP), jnp.float32).at[0:H, :n_labels].set(Wt[0:H])
    whb = jnp.zeros((2 * H, LP), jnp.float32).at[H:2 * H, :n_labels].set(Wt[H:2 * H])
    bh = jnp.full((1, LP), -1e30, jnp.float32).at[0, :n_labels].set(bb)
    params["h2t_wha"] = wha
    params["h2t_whb"] = whb
    params["h2t_bh"] = bh
    params["LP"] = LP
    return params


# ----------------------------------------------------------------------------
# JAX glue (embedding lookup, padding, masks, boundary transposes, forward)
# ----------------------------------------------------------------------------

def forward_word(params, word_inputs):
    # WordRep: word-embedding lookup (see TODO at top of file).
    return jnp.take(params["embedding"], word_inputs, axis=0)       # (B, T, emb_dim)


def forward_rest(params, word_represent, word_seq_lengths,
                 in_dropout=0.0, fc_dropout=0.0):
    # TODO(synk): p>0 dropout (F.dropout2d, channel = time dim) would need in-kernel
    # pltpu.prng_* masks; dropout probabilities are 0.0 in this configuration.
    assert in_dropout == 0.0 and fc_dropout == 0.0
    B, T, D = word_represent.shape
    H = params["H"]
    L = params["n_labels"]
    LP = params["LP"]
    n_layers = len(params["lstms"])

    # Pad batch to the 8-row sublane granule so every per-step tile is (8,*)-aligned.
    BP = ((B + 7) // 8) * 8
    N = T * BP

    # Time-major, batch-padded (row t*BP + b <-> (t, b)); transposes only at the boundary.
    x = jnp.transpose(word_represent, (1, 0, 2))                    # (T, B, D)
    x = jnp.pad(x, ((0, 0), (0, BP - B), (0, 0)))                   # (T, BP, D)
    xa0 = x.reshape(N, D)                                           # time order
    xb0 = x[::-1].reshape(N, D)                                     # time reversed

    # Combined per-step validity mask: fwd half uses mask[t], bwd half uses mask[T-1-t].
    lens = jnp.pad(word_seq_lengths, (0, BP - B))                   # padded rows -> len 0
    mask = (jnp.arange(T)[:, None] < lens[None, :]).astype(jnp.float32)    # (T, BP)
    m_comb = jnp.concatenate([
        jnp.broadcast_to(mask[:, :, None], (T, BP, H)),
        jnp.broadcast_to(mask[::-1][:, :, None], (T, BP, H)),
    ], axis=-1).reshape(N, 2 * H)

    layer_args = []
    for lp in params["lstms"]:
        layer_args += [lp["wia"], lp["wib"], lp["whh"], lp["b"]]

    kernel = _make_fused_kernel(T, BP, H, n_layers)
    n_in = 3 + 4 * n_layers + 3
    y_raw, outs_pad, p_pad = pl.pallas_call(
        kernel,
        out_shape=(jax.ShapeDtypeStruct((N, 2 * H), jnp.float32),
                   jax.ShapeDtypeStruct((N, LP), jnp.float32),
                   jax.ShapeDtypeStruct((N, LP), jnp.float32)),
        in_specs=[_VSPEC] * n_in,
        out_specs=(_VSPEC, _VSPEC, _VSPEC),
        scratch_shapes=[
            pltpu.VMEM((N, 8 * H), jnp.float32),   # hoisted gate projection
            pltpu.VMEM((N, 2 * H), jnp.float32),   # time-reversed dual buffer
        ],
    )(xa0, xb0, m_comb, *layer_args,
      params["h2t_wha"], params["h2t_whb"], params["h2t_bh"])

    # Boundary fix-ups folded into the reshape/transpose XLA performs anyway:
    # y_raw[t] = [fwd@t | bwd@(T-1-t)]  ->  lstm_out[t] = [fwd@t | bwd@t].
    y = y_raw.reshape(T, BP, 2 * H)[:, :B]                          # (T, B, 2H)
    lstm_out = jnp.concatenate([y[:, :, :H], y[::-1][:, :, H:]], axis=-1)
    lstm_out = lstm_out.transpose(1, 0, 2)                          # (B, T, hidden_dim)
    outs = outs_pad.reshape(T, BP, LP)[:, :B, :L].transpose(1, 0, 2)    # (B, T, L)
    p = p_pad.reshape(T, BP, LP)[:, :B, :L].transpose(1, 0, 2)          # (B, T, L)
    return p, lstm_out, outs, word_represent


def mc_model_forward(params, word_inputs, word_seq_lengths,
                     char_inputs=None, char_seq_lengths=None, char_seq_recover=None):
    word_represent = forward_word(params, word_inputs)
    return forward_rest(params, word_represent, word_seq_lengths)


# ----------------------------------------------------------------------------
# Pure-JAX reference (straightforward per-direction LSTM) for a correctness check
# ----------------------------------------------------------------------------

def _reference_forward(params, word_represent, word_seq_lengths):
    B, T, _ = word_represent.shape
    H = params["H"]
    x = word_represent
    mask = (jnp.arange(T)[None, :] < word_seq_lengths[:, None]).astype(jnp.float32)  # (B,T)
    for lp in params["lstms_pt"]:
        dirs = []
        for d in ("f", "b"):
            wih, whh = lp["wih_" + d], lp["whh_" + d]
            bias = lp["bih_" + d] + lp["bhh_" + d]
            h = jnp.zeros((B, H), jnp.float32)
            c = jnp.zeros((B, H), jnp.float32)
            ys = [None] * T
            order = range(T) if d == "f" else range(T - 1, -1, -1)
            for t in order:
                g = x[:, t, :] @ wih.T + h @ whh.T + bias
                i = jax.nn.sigmoid(g[:, 0:H])
                f = jax.nn.sigmoid(g[:, H:2 * H])
                gg = jnp.tanh(g[:, 2 * H:3 * H])
                o = jax.nn.sigmoid(g[:, 3 * H:4 * H])
                c_new = f * c + i * gg
                h_new = o * jnp.tanh(c_new)
                m = mask[:, t:t + 1]
                h = jnp.where(m > 0, h_new, h)
                c = jnp.where(m > 0, c_new, c)
                ys[t] = h_new * m
            dirs.append(jnp.stack(ys, axis=1))                      # (B, T, H)
        x = jnp.concatenate(dirs, axis=-1)                          # (B, T, 2H)
    lstm_out = x
    outs = lstm_out @ params["h2t_w_pt"].T + params["h2t_b_pt"]
    p = jax.nn.softmax(outs, axis=-1)
    return p, lstm_out, outs


# ----------------------------------------------------------------------------
# main
# ----------------------------------------------------------------------------

if __name__ == "__main__":
    B, T = 2, 8
    vocab = 50
    emb_dim = 32            # WordRep.total_size
    hidden_dim = 32         # data.hidden_dim (bilstm -> 16 per direction)
    n_layers = 2            # data.model1_layer
    n_labels = 16           # data.label_alphabet_size

    root = jax.random.PRNGKey(0)
    k_param, k_data = jax.random.split(root)
    params = init_params(k_param, vocab, emb_dim, hidden_dim, n_labels, n_layers)

    word_inputs = jax.random.randint(k_data, (B, T), 0, vocab, dtype=jnp.int32)
    word_seq_lengths = jnp.array([8, 5], dtype=jnp.int32)   # sorted descending (packed)
    char_inputs = char_seq_lengths = char_seq_recover = None   # use_char=False

    p, lstm_out, outs, word_represent = mc_model_forward(
        params, word_inputs, word_seq_lengths,
        char_inputs, char_seq_lengths, char_seq_recover)

    jax.block_until_ready((p, lstm_out, outs, word_represent))

    assert p.shape == (B, T, n_labels)
    assert lstm_out.shape == (B, T, hidden_dim)
    assert outs.shape == (B, T, n_labels)
    assert word_represent.shape == (B, T, emb_dim)
    # exact softmax normalizer -> rows sum to 1
    assert jnp.allclose(jnp.sum(p, -1), 1.0, atol=1e-3)
    # padded positions of lstm_out are exactly zero (pad_packed_sequence semantics)
    assert jnp.allclose(lstm_out[1, 5:], 0.0)

    # Pure-JAX reference check (loose tolerance: matmul-precision differences only).
    p_ref, lstm_ref, outs_ref = _reference_forward(params, word_represent, word_seq_lengths)
    assert float(jnp.max(jnp.abs(lstm_out - lstm_ref))) < 5e-2
    assert float(jnp.max(jnp.abs(outs - outs_ref))) < 5e-2
    assert float(jnp.max(jnp.abs(p - p_ref))) < 5e-2

    print("KERNEL_OK")
</pallas_src>

<mosaic_0001>
module attributes {stable_mosaic.version = 11 : i64} {
  func.func @kernel(%arg0: memref<64x32xf32, #tpu.memory_space<vmem>>, %arg1: memref<64x32xf32, #tpu.memory_space<vmem>>, %arg2: memref<64x32xf32, #tpu.memory_space<vmem>>, %arg3: memref<32x128xf32, #tpu.memory_space<vmem>>, %arg4: memref<32x128xf32, #tpu.memory_space<vmem>>, %arg5: memref<32x128xf32, #tpu.memory_space<vmem>>, %arg6: memref<1x128xf32, #tpu.memory_space<vmem>>, %arg7: memref<32x128xf32, #tpu.memory_space<vmem>>, %arg8: memref<32x128xf32, #tpu.memory_space<vmem>>, %arg9: memref<32x128xf32, #tpu.memory_space<vmem>>, %arg10: memref<1x128xf32, #tpu.memory_space<vmem>>, %arg11: memref<32x128xf32, #tpu.memory_space<vmem>>, %arg12: memref<32x128xf32, #tpu.memory_space<vmem>>, %arg13: memref<1x128xf32, #tpu.memory_space<vmem>>, %arg14: memref<64x32xf32, #tpu.memory_space<vmem>>, %arg15: memref<64x128xf32, #tpu.memory_space<vmem>>, %arg16: memref<64x128xf32, #tpu.memory_space<vmem>>, %arg17: memref<64x128xf32, #tpu.memory_space<vmem>>, %arg18: memref<64x32xf32, #tpu.memory_space<vmem>>) attributes {dimension_semantics = [], scalar_prefetch = 0 : i64, scratch_operands = 2 : i64, tpu.core_type = #tpu.core_type<tc>} {
    %0 = tpu.iota {dimensions = array<i32: 1>} : vector<1x128xi32>
    %c64_i32 = arith.constant 64 : i32
    %1 = vector.broadcast %c64_i32 : i32 to vector<1x128xi32>
    %2 = arith.cmpi sge, %0, %1 : vector<1x128xi32>
    %c96_i32 = arith.constant 96 : i32
    %3 = vector.broadcast %c96_i32 : i32 to vector<1x128xi32>
    %4 = arith.cmpi slt, %0, %3 : vector<1x128xi32>
    %5 = arith.andi %2, %4 : vector<1x128xi1>
    %c0 = arith.constant 0 : index
    %c0_0 = arith.constant 0 : index
    %6 = vector.load %arg3[%c0, %c0_0] : memref<32x128xf32, #tpu.memory_space<vmem>>, vector<32x128xf32>
    %c0_1 = arith.constant 0 : index
    %c0_2 = arith.constant 0 : index
    %7 = vector.load %arg4[%c0_1, %c0_2] : memref<32x128xf32, #tpu.memory_space<vmem>>, vector<32x128xf32>
    %c0_3 = arith.constant 0 : index
    %c0_4 = arith.constant 0 : index
    %8 = vector.load %arg5[%c0_3, %c0_4] : memref<32x128xf32, #tpu.memory_space<vmem>>, vector<32x128xf32>
    %c0_5 = arith.constant 0 : index
    %c0_6 = arith.constant 0 : index
    %9 = vector.load %arg6[%c0_5, %c0_6] : memref<1x128xf32, #tpu.memory_space<vmem>>, vector<1x128xf32>
    %c0_7 = arith.constant 0 : index
    %c0_8 = arith.constant 0 : index
    %10 = vector.load %arg0[%c0_7, %c0_8] : memref<64x32xf32, #tpu.memory_space<vmem>>, vector<64x32xf32>
    %c0_9 = arith.constant 0 : index
    %c0_10 = arith.constant 0 : index
    %11 = vector.load %arg1[%c0_9, %c0_10] : memref<64x32xf32, #tpu.memory_space<vmem>>, vector<64x32xf32>
    %cst = arith.constant dense<0.000000e+00> : vector<64x128xf32>
    %12 = tpu.matmul %10, %6, %cst {dimension_numbers = #tpu.dot_dimension_numbers<[1], [0], [0], [1], [0, 0, 1, 1], [], []>} : vector<64x32xf32>, vector<32x128xf32>, vector<64x128xf32> -> vector<64x128xf32>
    %cst_11 = arith.constant dense<0.000000e+00> : vector<64x128xf32>
    %13 = tpu.matmul %11, %7, %cst_11 {dimension_numbers = #tpu.dot_dimension_numbers<[1], [0], [0], [1], [0, 0, 1, 1], [], []>} : vector<64x32xf32>, vector<32x128xf32>, vector<64x128xf32> -> vector<64x128xf32>
    %14 = arith.addf %12, %13 : vector<64x128xf32>
    %15 = vector.broadcast %9 : vector<1x128xf32> to vector<64x128xf32>
    %16 = arith.addf %14, %15 : vector<64x128xf32>
    %c0_12 = arith.constant 0 : index
    %c0_13 = arith.constant 0 : index
    %17 = vector.load %arg17[%c0_12, %c0_13] : memref<64x128xf32, #tpu.memory_space<vmem>>, vector<64x128xf32>
    tpu.vector_store %arg17[%c0_12, %c0_13], %16 {strides = array<i32>} : memref<64x128xf32, #tpu.memory_space<vmem>>, vector<64x128xf32>,
    %cst_14 = arith.constant 0.000000e+00 : f32
    %18 = vector.broadcast %cst_14 : f32 to vector<8x32xf32>
    %cst_15 = arith.constant 0.000000e+00 : f32
    %19 = vector.broadcast %cst_15 : f32 to vector<8x32xf32>
    %c0_16 = arith.constant 0 : index
    %c0_17 = arith.constant 0 : index
    %20 = vector.load %arg17[%c0_16, %c0_17] : memref<64x128xf32, #tpu.memory_space<vmem>>, vector<8x128xf32>
    %cst_18 = arith.constant dense<0.000000e+00> : vector<8x128xf32>
    %21 = tpu.matmul %18, %8, %cst_18 {dimension_numbers = #tpu.dot_dimension_numbers<[1], [0], [0], [1], [0, 0, 1, 1], [], []>} : vector<8x32xf32>, vector<32x128xf32>, vector<8x128xf32> -> vector<8x128xf32>
    %22 = arith.addf %20, %21 : vector<8x128xf32>
    %23 = arith.negf %22 : vector<8x128xf32>
    %24 = math.exp %23 : vector<8x128xf32>
    %cst_19 = arith.constant 1.000000e+00 : f32
    %25 = vector.broadcast %cst_19 : f32 to vector<8x128xf32>
    %26 = arith.addf %25, %24 : vector<8x128xf32>
    %27 = arith.divf %25, %26 : vector<8x128xf32>
    %cst_20 = arith.constant 2.000000e+00 : f32
    %28 = vector.broadcast %cst_20 : f32 to vector<8x128xf32>
    %29 = arith.mulf %28, %27 : vector<8x128xf32>
    %cst_21 = arith.constant 1.000000e+00 : f32
    %30 = vector.broadcast %cst_21 : f32 to vector<8x128xf32>
    %31 = arith.subf %29, %30 : vector<8x128xf32>
    %32 = vector.shape_cast %5 : vector<1x128xi1> to vector<1x128xi1>
    %33 = vector.broadcast %32 : vector<1x128xi1> to vector<8x128xi1>
    %34 = arith.select %33, %31, %27 : vector<8x128xi1>, vector<8x128xf32>
    %35 = vector.extract_strided_slice %34 {offsets = [0, 0], sizes = [8, 32], strides = [1, 1]} : vector<8x128xf32> to vector<8x32xf32>
    %36 = vector.extract_strided_slice %34 {offsets = [0, 32], sizes = [8, 32], strides = [1, 1]} : vector<8x128xf32> to vector<8x32xf32>
    %37 = vector.extract_strided_slice %34 {offsets = [0, 64], sizes = [8, 32], strides = [1, 1]} : vector<8x128xf32> to vector<8x32xf32>
    %38 = vector.extract_strided_slice %34 {offsets = [0, 96], sizes = [8, 32], strides = [1, 1]} : vector<8x128xf32> to vector<8x32xf32>
    %39 = arith.mulf %36, %19 : vector<8x32xf32>
    %40 = arith.mulf %35, %37 : vector<8x32xf32>
    %41 = arith.addf %39, %40 : vector<8x32xf32>
    %42 = math.tanh %41 : vector<8x32xf32>
    %43 = arith.mulf %38, %42 : vector<8x32xf32>
    %c0_22 = arith.constant 0 : index
    %c0_23 = arith.constant 0 : index
    %44 = vector.load %arg2[%c0_22, %c0_23] : memref<64x32xf32, #tpu.memory_space<vmem>>, vector<8x32xf32>
    %cst_24 = arith.constant 0.000000e+00 : f32
    %45 = vector.broadcast %cst_24 : f32 to vector<8x32xf32>
    %46 = arith.cmpf ogt, %44, %45 : vector<8x32xf32>
    %47 = arith.select %46, %43, %18 : vector<8x32xi1>, vector<8x32xf32>
    %48 = arith.select %46, %41, %19 : vector<8x32xi1>, vector<8x32xf32>
    %cst_25 = arith.constant 0.000000e+00 : f32
    %49 = vector.broadcast %cst_25 : f32 to vector<8x32xf32>
    %50 = arith.select %46, %43, %49 : vector<8x32xi1>, vector<8x32xf32>
    %c0_26 = arith.constant 0 : index
    %c0_27 = arith.constant 0 : index
    %51 = vector.load %arg14[%c0_26, %c0_27] : memref<64x32xf32, #tpu.memory_space<vmem>>, vector<8x32xf32>
    tpu.vector_store %arg14[%c0_26, %c0_27], %50 {strides = array<i32>} : memref<64x32xf32, #tpu.memory_space<vmem>>, vector<8x32xf32>,
    %c56 = arith.constant 56 : index
    %c0_28 = arith.constant 0 : index
    %52 = vector.load %arg18[%c56, %c0_28] : memref<64x32xf32, #tpu.memory_space<vmem>>, vector<8x32xf32>
    tpu.vector_store %arg18[%c56, %c0_28], %50 {strides = array<i32>} : memref<64x32xf32, #tpu.memory_space<vmem>>, vector<8x32xf32>,
    %c8 = arith.constant 8 : index
    %c0_29 = arith.constant 0 : index
    %53 = vector.load %arg17[%c8, %c0_29] : memref<64x128xf32, #tpu.memory_space<vmem>>, vector<8x128xf32>
    %cst_30 = arith.constant dense<0.000000e+00> : vector<8x128xf32>
    %54 = tpu.matmul %47, %8, %cst_30 {dimension_numbers = #tpu.dot_dimension_numbers<[1], [0], [0], [1], [0, 0, 1, 1], [], []>} : vector<8x32xf32>, vector<32x128xf32>, vector<8x128xf32> -> vector<8x128xf32>
    %55 = arith.addf %53, %54 : vector<8x128xf32>
    %56 = arith.negf %55 : vector<8x128xf32>
    %57 = math.exp %56 : vector<8x128xf32>
    %cst_31 = arith.constant 1.000000e+00 : f32
    %58 = vector.broadcast %cst_31 : f32 to vector<8x128xf32>
    %59 = arith.addf %58, %57 : vector<8x128xf32>
    %60 = arith.divf %58, %59 : vector<8x128xf32>
    %cst_32 = arith.constant 2.000000e+00 : f32
    %61 = vector.broadcast %cst_32 : f32 to vector<8x128xf32>
    %62 = arith.mulf %61, %60 : vector<8x128xf32>
    %cst_33 = arith.constant 1.000000e+00 : f32
    %63 = vector.broadcast %cst_33 : f32 to vector<8x128xf32>
    %64 = arith.subf %62, %63 : vector<8x128xf32>
    %65 = vector.shape_cast %5 : vector<1x128xi1> to vector<1x128xi1>
    %66 = vector.broadcast %65 : vector<1x128xi1> to vector<8x128xi1>
    %67 = arith.select %66, %64, %60 : vector<8x128xi1>, vector<8x128xf32>
    %68 = vector.extract_strided_slice %67 {offsets = [0, 0], sizes = [8, 32], strides = [1, 1]} : vector<8x128xf32> to vector<8x32xf32>
    %69 = vector.extract_strided_slice %67 {offsets = [0, 32], sizes = [8, 32], strides = [1, 1]} : vector<8x128xf32> to vector<8x32xf32>
    %70 = vector.extract_strided_slice %67 {offsets = [0, 64], sizes = [8, 32], strides = [1, 1]} : vector<8x128xf32> to vector<8x32xf32>
    %71 = vector.extract_strided_slice %67 {offsets = [0, 96], sizes = [8, 32], strides = [1, 1]} : vector<8x128xf32> to vector<8x32xf32>
    %72 = arith.mulf %69, %48 : vector<8x32xf32>
    %73 = arith.mulf %68, %70 : vector<8x32xf32>
    %74 = arith.addf %72, %73 : vector<8x32xf32>
    %75 = math.tanh %74 : vector<8x32xf32>
    %76 = arith.mulf %71, %75 : vector<8x32xf32>
    %c8_34 = arith.constant 8 : index
    %c0_35 = arith.constant 0 : index
    %77 = vector.load %arg2[%c8_34, %c0_35] : memref<64x32xf32, #tpu.memory_space<vmem>>, vector<8x32xf32>
    %cst_36 = arith.constant 0.000000e+00 : f32
    %78 = vector.broadcast %cst_36 : f32 to vector<8x32xf32>
    %79 = arith.cmpf ogt, %77, %78 : vector<8x32xf32>
    %80 = arith.select %79, %76, %47 : vector<8x32xi1>, vector<8x32xf32>
    %81 = arith.select %79, %74, %48 : vector<8x32xi1>, vector<8x32xf32>
    %cst_37 = arith.constant 0.000000e+00 : f32
    %82 = vector.broadcast %cst_37 : f32 to vector<8x32xf32>
    %83 = arith.select %79, %76, %82 : vector<8x32xi1>, vector<8x32xf32>
    %c8_38 = arith.constant 8 : index
    %c0_39 = arith.constant 0 : index
    %84 = vector.load %arg14[%c8_38, %c0_39] : memref<64x32xf32, #tpu.memory_space<vmem>>, vector<8x32xf32>
    tpu.vector_store %arg14[%c8_38, %c0_39], %83 {strides = array<i32>} : memref<64x32xf32, #tpu.memory_space<vmem>>, vector<8x32xf32>,
    %c48 = arith.constant 48 : index
    %c0_40 = arith.constant 0 : index
    %85 = vector.load %arg18[%c48, %c0_40] : memref<64x32xf32, #tpu.memory_space<vmem>>, vector<8x32xf32>
    tpu.vector_store %arg18[%c48, %c0_40], %83 {strides = array<i32>} : memref<64x32xf32, #tpu.memory_space<vmem>>, vector<8x32xf32>,
    %c16 = arith.constant 16 : index
    %c0_41 = arith.constant 0 : index
    %86 = vector.load %arg17[%c16, %c0_41] : memref<64x128xf32, #tpu.memory_space<vmem>>, vector<8x128xf32>
    %cst_42 = arith.constant dense<0.000000e+00> : vector<8x128xf32>
    %87 = tpu.matmul %80, %8, %cst_42 {dimension_numbers = #tpu.dot_dimension_numbers<[1], [0], [0], [1], [0, 0, 1, 1], [], []>} : vector<8x32xf32>, vector<32x128xf32>, vector<8x128xf32> -> vector<8x128xf32>
    %88 = arith.addf %86, %87 : vector<8x128xf32>
    %89 = arith.negf %88 : vector<8x128xf32>
    %90 = math.exp %89 : vector<8x128xf32>
    %cst_43 = arith.constant 1.000000e+00 : f32
    %91 = vector.broadcast %cst_43 : f32 to vector<8x128xf32>
    %92 = arith.addf %91, %90 : vector<8x128xf32>
    %93 = arith.divf %91, %92 : vector<8x128xf32>
    %cst_44 = arith.constant 2.000000e+00 : f32
    %94 = vector.broadcast %cst_44 : f32 to vector<8x128xf32>
    %95 = arith.mulf %94, %93 : vector<8x128xf32>
    %cst_45 = arith.constant 1.000000e+00 : f32
    %96 = vector.broadcast %cst_45 : f32 to vector<8x128xf32>
    %97 = arith.subf %95, %96 : vector<8x128xf32>
    %98 = vector.shape_cast %5 : vector<1x128xi1> to vector<1x128xi1>
    %99 = vector.broadcast %98 : vector<1x128xi1> to vector<8x128xi1>
    %100 = arith.select %99, %97, %93 : vector<8x128xi1>, vector<8x128xf32>
    %101 = vector.extract_strided_slice %100 {offsets = [0, 0], sizes = [8, 32], strides = [1, 1]} : vector<8x128xf32> to vector<8x32xf32>
    %102 = vector.extract_strided_slice %100 {offsets = [0, 32], sizes = [8, 32], strides = [1, 1]} : vector<8x128xf32> to vector<8x32xf32>
    %103 = vector.extract_strided_slice %100 {offsets = [0, 64], sizes = [8, 32], strides = [1, 1]} : vector<8x128xf32> to vector<8x32xf32>
    %104 = vector.extract_strided_slice %100 {offsets = [0, 96], sizes = [8, 32], strides = [1, 1]} : vector<8x128xf32> to vector<8x32xf32>
    %105 = arith.mulf %102, %81 : vector<8x32xf32>
    %106 = arith.mulf %101, %103 : vector<8x32xf32>
    %107 = arith.addf %105, %106 : vector<8x32xf32>
    %108 = math.tanh %107 : vector<8x32xf32>
    %109 = arith.mulf %104, %108 : vector<8x32xf32>
    %c16_46 = arith.constant 16 : index
    %c0_47 = arith.constant 0 : index
    %110 = vector.load %arg2[%c16_46, %c0_47] : memref<64x32xf32, #tpu.memory_space<vmem>>, vector<8x32xf32>
    %cst_48 = arith.constant 0.000000e+00 : f32
    %111 = vector.broadcast %cst_48 : f32 to vector<8x32xf32>
    %112 = arith.cmpf ogt, %110, %111 : vector<8x32xf32>
    %113 = arith.select %112, %109, %80 : vector<8x32xi1>, vector<8x32xf32>
    %114 = arith.select %112, %107, %81 : vector<8x32xi1>, vector<8x32xf32>
    %cst_49 = arith.constant 0.000000e+00 : f32
    %115 = vector.broadcast %cst_49 : f32 to vector<8x32xf32>
    %116 = arith.select %112, %109, %115 : vector<8x32xi1>, vector<8x32xf32>
    %c16_50 = arith.constant 16 : index
    %c0_51 = arith.constant 0 : index
    %117 = vector.load %arg14[%c16_50, %c0_51] : memref<64x32xf32, #tpu.memory_space<vmem>>, vector<8x32xf32>
    tpu.vector_store %arg14[%c16_50, %c0_51], %116 {strides = array<i32>} : memref<64x32xf32, #tpu.memory_space<vmem>>, vector<8x32xf32>,
    %c40 = arith.constant 40 : index
    %c0_52 = arith.constant 0 : index
    %118 = vector.load %arg18[%c40, %c0_52] : memref<64x32xf32, #tpu.memory_space<vmem>>, vector<8x32xf32>
    tpu.vector_store %arg18[%c40, %c0_52], %116 {strides = array<i32>} : memref<64x32xf32, #tpu.memory_space<vmem>>, vector<8x32xf32>,
    %c24 = arith.constant 24 : index
    %c0_53 = arith.constant 0 : index
    %119 = vector.load %arg17[%c24, %c0_53] : memref<64x128xf32, #tpu.memory_space<vmem>>, vector<8x128xf32>
    %cst_54 = arith.constant dense<0.000000e+00> : vector<8x128xf32>
    %120 = tpu.matmul %113, %8, %cst_54 {dimension_numbers = #tpu.dot_dimension_numbers<[1], [0], [0], [1], [0, 0, 1, 1], [], []>} : vector<8x32xf32>, vector<32x128xf32>, vector<8x128xf32> -> vector<8x128xf32>
    %121 = arith.addf %119, %120 : vector<8x128xf32>
    %122 = arith.negf %121 : vector<8x128xf32>
    %123 = math.exp %122 : vector<8x128xf32>
    %cst_55 = arith.constant 1.000000e+00 : f32
    %124 = vector.broadcast %cst_55 : f32 to vector<8x128xf32>
    %125 = arith.addf %124, %123 : vector<8x128xf32>
    %126 = arith.divf %124, %125 : vector<8x128xf32>
    %cst_56 = arith.constant 2.000000e+00 : f32
    %127 = vector.broadcast %cst_56 : f32 to vector<8x128xf32>
    %128 = arith.mulf %127, %126 : vector<8x128xf32>
    %cst_57 = arith.constant 1.000000e+00 : f32
    %129 = vector.broadcast %cst_57 : f32 to vector<8x128xf32>
    %130 = arith.subf %128, %129 : vector<8x128xf32>
    %131 = vector.shape_cast %5 : vector<1x128xi1> to vector<1x128xi1>
    %132 = vector.broadcast %131 : vector<1x128xi1> to vector<8x128xi1>
    %133 = arith.select %132, %130, %126 : vector<8x128xi1>, vector<8x128xf32>
    %134 = vector.extract_strided_slice %133 {offsets = [0, 0], sizes = [8, 32], strides = [1, 1]} : vector<8x128xf32> to vector<8x32xf32>
    %135 = vector.extract_strided_slice %133 {offsets = [0, 32], sizes = [8, 32], strides = [1, 1]} : vector<8x128xf32> to vector<8x32xf32>
    %136 = vector.extract_strided_slice %133 {offsets = [0, 64], sizes = [8, 32], strides = [1, 1]} : vector<8x128xf32> to vector<8x32xf32>
    %137 = vector.extract_strided_slice %133 {offsets = [0, 96], sizes = [8, 32], strides = [1, 1]} : vector<8x128xf32> to vector<8x32xf32>
    %138 = arith.mulf %135, %114 : vector<8x32xf32>
    %139 = arith.mulf %134, %136 : vector<8x32xf32>
    %140 = arith.addf %138, %139 : vector<8x32xf32>
    %141 = math.tanh %140 : vector<8x32xf32>
    %142 = arith.mulf %137, %141 : vector<8x32xf32>
    %c24_58 = arith.constant 24 : index
    %c0_59 = arith.constant 0 : index
    %143 = vector.load %arg2[%c24_58, %c0_59] : memref<64x32xf32, #tpu.memory_space<vmem>>, vector<8x32xf32>
    %cst_60 = arith.constant 0.000000e+00 : f32
    %144 = vector.broadcast %cst_60 : f32 to vector<8x32xf32>
    %145 = arith.cmpf ogt, %143, %144 : vector<8x32xf32>
    %146 = arith.select %145, %142, %113 : vector<8x32xi1>, vector<8x32xf32>
    %147 = arith.select %145, %140, %114 : vector<8x32xi1>, vector<8x32xf32>
    %cst_61 = arith.constant 0.000000e+00 : f32
    %148 = vector.broadcast %cst_61 : f32 to vector<8x32xf32>
    %149 = arith.select %145, %142, %148 : vector<8x32xi1>, vector<8x32xf32>
    %c24_62 = arith.constant 24 : index
    %c0_63 = arith.constant 0 : index
    %150 = vector.load %arg14[%c24_62, %c0_63] : memref<64x32xf32, #tpu.memory_space<vmem>>, vector<8x32xf32>
    tpu.vector_store %arg14[%c24_62, %c0_63], %149 {strides = array<i32>} : memref<64x32xf32, #tpu.memory_space<vmem>>, vector<8x32xf32>,
    %c32 = arith.constant 32 : index
    %c0_64 = arith.constant 0 : index
    %151 = vector.load %arg18[%c32, %c0_64] : memref<64x32xf32, #tpu.memory_space<vmem>>, vector<8x32xf32>
    tpu.vector_store %arg18[%c32, %c0_64], %149 {strides = array<i32>} : memref<64x32xf32, #tpu.memory_space<vmem>>, vector<8x32xf32>,
    %c32_65 = arith.constant 32 : index
    %c0_66 = arith.constant 0 : index
    %152 = vector.load %arg17[%c32_65, %c0_66] : memref<64x128xf32, #tpu.memory_space<vmem>>, vector<8x128xf32>
    %cst_67 = arith.constant dense<0.000000e+00> : vector<8x128xf32>
    %153 = tpu.matmul %146, %8, %cst_67 {dimension_numbers = #tpu.dot_dimension_numbers<[1], [0], [0], [1], [0, 0, 1, 1], [], []>} : vector<8x32xf32>, vector<32x128xf32>, vector<8x128xf32> -> vector<8x128xf32>
    %154 = arith.addf %152, %153 : vector<8x128xf32>
    %155 = arith.negf %154 : vector<8x128xf32>
    %156 = math.exp %155 : vector<8x128xf32>
    %cst_68 = arith.constant 1.000000e+00 : f32
    %157 = vector.broadcast %cst_68 : f32 to vector<8x128xf32>
    %158 = arith.addf %157, %156 : vector<8x128xf32>
    %159 = arith.divf %157, %158 : vector<8x128xf32>
    %cst_69 = arith.constant 2.000000e+00 : f32
    %160 = vector.broadcast %cst_69 : f32 to vector<8x128xf32>
    %161 = arith.mulf %160, %159 : vector<8x128xf32>
    %cst_70 = arith.constant 1.000000e+00 : f32
    %162 = vector.broadcast %cst_70 : f32 to vector<8x128xf32>
    %163 = arith.subf %161, %162 : vector<8x128xf32>
    %164 = vector.shape_cast %5 : vector<1x128xi1> to vector<1x128xi1>
    %165 = vector.broadcast %164 : vector<1x128xi1> to vector<8x128xi1>
    %166 = arith.select %165, %163, %159 : vector<8x128xi1>, vector<8x128xf32>
    %167 = vector.extract_strided_slice %166 {offsets = [0, 0], sizes = [8, 32], strides = [1, 1]} : vector<8x128xf32> to vector<8x32xf32>
    %168 = vector.extract_strided_slice %166 {offsets = [0, 32], sizes = [8, 32], strides = [1, 1]} : vector<8x128xf32> to vector<8x32xf32>
    %169 = vector.extract_strided_slice %166 {offsets = [0, 64], sizes = [8, 32], strides = [1, 1]} : vector<8x128xf32> to vector<8x32xf32>
    %170 = vector.extract_strided_slice %166 {offsets = [0, 96], sizes = [8, 32], strides = [1, 1]} : vector<8x128xf32> to vector<8x32xf32>
    %171 = arith.mulf %168, %147 : vector<8x32xf32>
    %172 = arith.mulf %167, %169 : vector<8x32xf32>
    %173 = arith.addf %171, %172 : vector<8x32xf32>
    %174 = math.tanh %173 : vector<8x32xf32>
    %175 = arith.mulf %170, %174 : vector<8x32xf32>
    %c32_71 = arith.constant 32 : index
    %c0_72 = arith.constant 0 : index
    %176 = vector.load %arg2[%c32_71, %c0_72] : memref<64x32xf32, #tpu.memory_space<vmem>>, vector<8x32xf32>
    %cst_73 = arith.constant 0.000000e+00 : f32
    %177 = vector.broadcast %cst_73 : f32 to vector<8x32xf32>
    %178 = arith.cmpf ogt, %176, %177 : vector<8x32xf32>
    %179 = arith.select %178, %175, %146 : vector<8x32xi1>, vector<8x32xf32>
    %180 = arith.select %178, %173, %147 : vector<8x32xi1>, vector<8x32xf32>
    %cst_74 = arith.constant 0.000000e+00 : f32
    %181 = vector.broadcast %cst_74 : f32 to vector<8x32xf32>
    %182 = arith.select %178, %175, %181 : vector<8x32xi1>, vector<8x32xf32>
    %c32_75 = arith.constant 32 : index
    %c0_76 = arith.constant 0 : index
    %183 = vector.load %arg14[%c32_75, %c0_76] : memref<64x32xf32, #tpu.memory_space<vmem>>, vector<8x32xf32>
    tpu.vector_store %arg14[%c32_75, %c0_76], %182 {strides = array<i32>} : memref<64x32xf32, #tpu.memory_space<vmem>>, vector<8x32xf32>,
    %c24_77 = arith.constant 24 : index
    %c0_78 = arith.constant 0 : index
    %184 = vector.load %arg18[%c24_77, %c0_78] : memref<64x32xf32, #tpu.memory_space<vmem>>, vector<8x32xf32>
    tpu.vector_store %arg18[%c24_77, %c0_78], %182 {strides = array<i32>} : memref<64x32xf32, #tpu.memory_space<vmem>>, vector<8x32xf32>,
    %c40_79 = arith.constant 40 : index
    %c0_80 = arith.constant 0 : index
    %185 = vector.load %arg17[%c40_79, %c0_80] : memref<64x128xf32, #tpu.memory_space<vmem>>, vector<8x128xf32>
    %cst_81 = arith.constant dense<0.000000e+00> : vector<8x128xf32>
    %186 = tpu.matmul %179, %8, %cst_81 {dimension_numbers = #tpu.dot_dimension_numbers<[1], [0], [0], [1], [0, 0, 1, 1], [], []>} : vector<8x32xf32>, vector<32x128xf32>, vector<8x128xf32> -> vector<8x128xf32>
    %187 = arith.addf %185, %186 : vector<8x128xf32>
    %188 = arith.negf %187 : vector<8x128xf32>
    %189 = math.exp %188 : vector<8x128xf32>
    %cst_82 = arith.constant 1.000000e+00 : f32
    %190 = vector.broadcast %cst_82 : f32 to vector<8x128xf32>
    %191 = arith.addf %190, %189 : vector<8x128xf32>
    %192 = arith.divf %190, %191 : vector<8x128xf32>
    %cst_83 = arith.constant 2.000000e+00 : f32
    %193 = vector.broadcast %cst_83 : f32 to vector<8x128xf32>
    %194 = arith.mulf %193, %192 : vector<8x128xf32>
    %cst_84 = arith.constant 1.000000e+00 : f32
    %195 = vector.broadcast %cst_84 : f32 to vector<8x128xf32>
    %196 = arith.subf %194, %195 : vector<8x128xf32>
    %197 = vector.shape_cast %5 : vector<1x128xi1> to vector<1x128xi1>
    %198 = vector.broadcast %197 : vector<1x128xi1> to vector<8x128xi1>
    %199 = arith.select %198, %196, %192 : vector<8x128xi1>, vector<8x128xf32>
    %200 = vector.extract_strided_slice %199 {offsets = [0, 0], sizes = [8, 32], strides = [1, 1]} : vector<8x128xf32> to vector<8x32xf32>
    %201 = vector.extract_strided_slice %199 {offsets = [0, 32], sizes = [8, 32], strides = [1, 1]} : vector<8x128xf32> to vector<8x32xf32>
    %202 = vector.extract_strided_slice %199 {offsets = [0, 64], sizes = [8, 32], strides = [1, 1]} : vector<8x128xf32> to vector<8x32xf32>
    %203 = vector.extract_strided_slice %199 {offsets = [0, 96], sizes = [8, 32], strides = [1, 1]} : vector<8x128xf32> to vector<8x32xf32>
    %204 = arith.mulf %201, %180 : vector<8x32xf32>
    %205 = arith.mulf %200, %202 : vector<8x32xf32>
    %206 = arith.addf %204, %205 : vector<8x32xf32>
    %207 = math.tanh %206 : vector<8x32xf32>
    %208 = arith.mulf %203, %207 : vector<8x32xf32>
    %c40_85 = arith.constant 40 : index
    %c0_86 = arith.constant 0 : index
    %209 = vector.load %arg2[%c40_85, %c0_86] : memref<64x32xf32, #tpu.memory_space<vmem>>, vector<8x32xf32>
    %cst_87 = arith.constant 0.000000e+00 : f32
    %210 = vector.broadcast %cst_87 : f32 to vector<8x32xf32>
    %211 = arith.cmpf ogt, %209, %210 : vector<8x32xf32>
    %212 = arith.select %211, %208, %179 : vector<8x32xi1>, vector<8x32xf32>
    %213 = arith.select %211, %206, %180 : vector<8x32xi1>, vector<8x32xf32>
    %cst_88 = arith.constant 0.000000e+00 : f32
    %214 = vector.broadcast %cst_88 : f32 to vector<8x32xf32>
    %215 = arith.select %211, %208, %214 : vector<8x32xi1>, vector<8x32xf32>
    %c40_89 = arith.constant 40 : index
    %c0_90 = arith.constant 0 : index
    %216 = vector.load %arg14[%c40_89, %c0_90] : memref<64x32xf32, #tpu.memory_space<vmem>>, vector<8x32xf32>
    tpu.vector_store %arg14[%c40_89, %c0_90], %215 {strides = array<i32>} : memref<64x32xf32, #tpu.memory_space<vmem>>, vector<8x32xf32>,
    %c16_91 = arith.constant 16 : index
    %c0_92 = arith.constant 0 : index
    %217 = vector.load %arg18[%c16_91, %c0_92] : memref<64x32xf32, #tpu.memory_space<vmem>>, vector<8x32xf32>
    tpu.vector_store %arg18[%c16_91, %c0_92], %215 {strides = array<i32>} : memref<64x32xf32, #tpu.memory_space<vmem>>, vector<8x32xf32>,
    %c48_93 = arith.constant 48 : index
    %c0_94 = arith.constant 0 : index
    %218 = vector.load %arg17[%c48_93, %c0_94] : memref<64x128xf32, #tpu.memory_space<vmem>>, vector<8x128xf32>
    %cst_95 = arith.constant dense<0.000000e+00> : vector<8x128xf32>
    %219 = tpu.matmul %212, %8, %cst_95 {dimension_numbers = #tpu.dot_dimension_numbers<[1], [0], [0], [1], [0, 0, 1, 1], [], []>} : vector<8x32xf32>, vector<32x128xf32>, vector<8x128xf32> -> vector<8x128xf32>
    %220 = arith.addf %218, %219 : vector<8x128xf32>
    %221 = arith.negf %220 : vector<8x128xf32>
    %222 = math.exp %221 : vector<8x128xf32>
    %cst_96 = arith.constant 1.000000e+00 : f32
    %223 = vector.broadcast %cst_96 : f32 to vector<8x128xf32>
    %224 = arith.addf %223, %222 : vector<8x128xf32>
    %225 = arith.divf %223, %224 : vector<8x128xf32>
    %cst_97 = arith.constant 2.000000e+00 : f32
    %226 = vector.broadcast %cst_97 : f32 to vector<8x128xf32>
    %227 = arith.mulf %226, %225 : vector<8x128xf32>
    %cst_98 = arith.constant 1.000000e+00 : f32
    %228 = vector.broadcast %cst_98 : f32 to vector<8x128xf32>
    %229 = arith.subf %227, %228 : vector<8x128xf32>
    %230 = vector.shape_cast %5 : vector<1x128xi1> to vector<1x128xi1>
    %231 = vector.broadcast %230 : vector<1x128xi1> to vector<8x128xi1>
    %232 = arith.select %231, %229, %225 : vector<8x128xi1>, vector<8x128xf32>
    %233 = vector.extract_strided_slice %232 {offsets = [0, 0], sizes = [8, 32], strides = [1, 1]} : vector<8x128xf32> to vector<8x32xf32>
    %234 = vector.extract_strided_slice %232 {offsets = [0, 32], sizes = [8, 32], strides = [1, 1]} : vector<8x128xf32> to vector<8x32xf32>
    %235 = vector.extract_strided_slice %232 {offsets = [0, 64], sizes = [8, 32], strides = [1, 1]} : vector<8x128xf32> to vector<8x32xf32>
    %236 = vector.extract_strided_slice %232 {offsets = [0, 96], sizes = [8, 32], strides = [1, 1]} : vector<8x128xf32> to vector<8x32xf32>
    %237 = arith.mulf %234, %213 : vector<8x32xf32>
    %238 = arith.mulf %233, %235 : vector<8x32xf32>
    %239 = arith.addf %237, %238 : vector<8x32xf32>
    %240 = math.tanh %239 : vector<8x32xf32>
    %241 = arith.mulf %236, %240 : vector<8x32xf32>
    %c48_99 = arith.constant 48 : index
    %c0_100 = arith.constant 0 : index
    %242 = vector.load %arg2[%c48_99, %c0_100] : memref<64x32xf32, #tpu.memory_space<vmem>>, vector<8x32xf32>
    %cst_101 = arith.constant 0.000000e+00 : f32
    %243 = vector.broadcast %cst_101 : f32 to vector<8x32xf32>
    %244 = arith.cmpf ogt, %242, %243 : vector<8x32xf32>
    %245 = arith.select %244, %241, %212 : vector<8x32xi1>, vector<8x32xf32>
    %246 = arith.select %244, %239, %213 : vector<8x32xi1>, vector<8x32xf32>
    %cst_102 = arith.constant 0.000000e+00 : f32
    %247 = vector.broadcast %cst_102 : f32 to vector<8x32xf32>
    %248 = arith.select %244, %241, %247 : vector<8x32xi1>, vector<8x32xf32>
    %c48_103 = arith.constant 48 : index
    %c0_104 = arith.constant 0 : index
    %249 = vector.load %arg14[%c48_103, %c0_104] : memref<64x32xf32, #tpu.memory_space<vmem>>, vector<8x32xf32>
    tpu.vector_store %arg14[%c48_103, %c0_104], %248 {strides = array<i32>} : memref<64x32xf32, #tpu.memory_space<vmem>>, vector<8x32xf32>,
    %c8_105 = arith.constant 8 : index
    %c0_106 = arith.constant 0 : index
    %250 = vector.load %arg18[%c8_105, %c0_106] : memref<64x32xf32, #tpu.memory_space<vmem>>, vector<8x32xf32>
    tpu.vector_store %arg18[%c8_105, %c0_106], %248 {strides = array<i32>} : memref<64x32xf32, #tpu.memory_space<vmem>>, vector<8x32xf32>,
    %c56_107 = arith.constant 56 : index
    %c0_108 = arith.constant 0 : index
    %251 = vector.load %arg17[%c56_107, %c0_108] : memref<64x128xf32, #tpu.memory_space<vmem>>, vector<8x128xf32>
    %cst_109 = arith.constant dense<0.000000e+00> : vector<8x128xf32>
    %252 = tpu.matmul %245, %8, %cst_109 {dimension_numbers = #tpu.dot_dimension_numbers<[1], [0], [0], [1], [0, 0, 1, 1], [], []>} : vector<8x32xf32>, vector<32x128xf32>, vector<8x128xf32> -> vector<8x128xf32>
    %253 = arith.addf %251, %252 : vector<8x128xf32>
    %254 = arith.negf %253 : vector<8x128xf32>
    %255 = math.exp %254 : vector<8x128xf32>
    %cst_110 = arith.constant 1.000000e+00 : f32
    %256 = vector.broadcast %cst_110 : f32 to vector<8x128xf32>
    %257 = arith.addf %256, %255 : vector<8x128xf32>
    %258 = arith.divf %256, %257 : vector<8x128xf32>
    %cst_111 = arith.constant 2.000000e+00 : f32
    %259 = vector.broadcast %cst_111 : f32 to vector<8x128xf32>
    %260 = arith.mulf %259, %258 : vector<8x128xf32>
    %cst_112 = arith.constant 1.000000e+00 : f32
    %261 = vector.broadcast %cst_112 : f32 to vector<8x128xf32>
    %262 = arith.subf %260, %261 : vector<8x128xf32>
    %263 = vector.shape_cast %5 : vector<1x128xi1> to vector<1x128xi1>
    %264 = vector.broadcast %263 : vector<1x128xi1> to vector<8x128xi1>
    %265 = arith.select %264, %262, %258 : vector<8x128xi1>, vector<8x128xf32>
    %266 = vector.extract_strided_slice %265 {offsets = [0, 0], sizes = [8, 32], strides = [1, 1]} : vector<8x128xf32> to vector<8x32xf32>
    %267 = vector.extract_strided_slice %265 {offsets = [0, 32], sizes = [8, 32], strides = [1, 1]} : vector<8x128xf32> to vector<8x32xf32>
    %268 = vector.extract_strided_slice %265 {offsets = [0, 64], sizes = [8, 32], strides = [1, 1]} : vector<8x128xf32> to vector<8x32xf32>
    %269 = vector.extract_strided_slice %265 {offsets = [0, 96], sizes = [8, 32], strides = [1, 1]} : vector<8x128xf32> to vector<8x32xf32>
    %270 = arith.mulf %267, %246 : vector<8x32xf32>
    %271 = arith.mulf %266, %268 : vector<8x32xf32>
    %272 = arith.addf %270, %271 : vector<8x32xf32>
    %273 = math.tanh %272 : vector<8x32xf32>
    %274 = arith.mulf %269, %273 : vector<8x32xf32>
    %c56_113 = arith.constant 56 : index
    %c0_114 = arith.constant 0 : index
    %275 = vector.load %arg2[%c56_113, %c0_114] : memref<64x32xf32, #tpu.memory_space<vmem>>, vector<8x32xf32>
    %cst_115 = arith.constant 0.000000e+00 : f32
    %276 = vector.broadcast %cst_115 : f32 to vector<8x32xf32>
    %277 = arith.cmpf ogt, %275, %276 : vector<8x32xf32>
    %cst_116 = arith.constant 0.000000e+00 : f32
    %278 = vector.broadcast %cst_116 : f32 to vector<8x32xf32>
    %279 = arith.select %277, %274, %278 : vector<8x32xi1>, vector<8x32xf32>
    %c56_117 = arith.constant 56 : index
    %c0_118 = arith.constant 0 : index
    %280 = vector.load %arg14[%c56_117, %c0_118] : memref<64x32xf32, #tpu.memory_space<vmem>>, vector<8x32xf32>
    tpu.vector_store %arg14[%c56_117, %c0_118], %279 {strides = array<i32>} : memref<64x32xf32, #tpu.memory_space<vmem>>, vector<8x32xf32>,
    %c0_119 = arith.constant 0 : index
    %c0_120 = arith.constant 0 : index
    %281 = vector.load %arg18[%c0_119, %c0_120] : memref<64x32xf32, #tpu.memory_space<vmem>>, vector<8x32xf32>
    tpu.vector_store %arg18[%c0_119, %c0_120], %279 {strides = array<i32>} : memref<64x32xf32, #tpu.memory_space<vmem>>, vector<8x32xf32>,
    %c0_121 = arith.constant 0 : index
    %c0_122 = arith.constant 0 : index
    %282 = vector.load %arg7[%c0_121, %c0_122] : memref<32x128xf32, #tpu.memory_space<vmem>>, vector<32x128xf32>
    %c0_123 = arith.constant 0 : index
    %c0_124 = arith.constant 0 : index
    %283 = vector.load %arg8[%c0_123, %c0_124] : memref<32x128xf32, #tpu.memory_space<vmem>>, vector<32x128xf32>
    %c0_125 = arith.constant 0 : index
    %c0_126 = arith.constant 0 : index
    %284 = vector.load %arg9[%c0_125, %c0_126] : memref<32x128xf32, #tpu.memory_space<vmem>>, vector<32x128xf32>
    %c0_127 = arith.constant 0 : index
    %c0_128 = arith.constant 0 : index
    %285 = vector.load %arg10[%c0_127, %c0_128] : memref<1x128xf32, #tpu.memory_space<vmem>>, vector<1x128xf32>
    %c0_129 = arith.constant 0 : index
    %c0_130 = arith.constant 0 : index
    %286 = vector.load %arg14[%c0_129, %c0_130] : memref<64x32xf32, #tpu.memory_space<vmem>>, vector<64x32xf32>
    %c0_131 = arith.constant 0 : index
    %c0_132 = arith.constant 0 : index
    %287 = vector.load %arg18[%c0_131, %c0_132] : memref<64x32xf32, #tpu.memory_space<vmem>>, vector<64x32xf32>
    %cst_133 = arith.constant dense<0.000000e+00> : vector<64x128xf32>
    %288 = tpu.matmul %286, %282, %cst_133 {dimension_numbers = #tpu.dot_dimension_numbers<[1], [0], [0], [1], [0, 0, 1, 1], [], []>} : vector<64x32xf32>, vector<32x128xf32>, vector<64x128xf32> -> vector<64x128xf32>
    %cst_134 = arith.constant dense<0.000000e+00> : vector<64x128xf32>
    %289 = tpu.matmul %287, %283, %cst_134 {dimension_numbers = #tpu.dot_dimension_numbers<[1], [0], [0], [1], [0, 0, 1, 1], [], []>} : vector<64x32xf32>, vector<32x128xf32>, vector<64x128xf32> -> vector<64x128xf32>
    %290 = arith.addf %288, %289 : vector<64x128xf32>
    %291 = vector.broadcast %285 : vector<1x128xf32> to vector<64x128xf32>
    %292 = arith.addf %290, %291 : vector<64x128xf32>
    %c0_135 = arith.constant 0 : index
    %c0_136 = arith.constant 0 : index
    %293 = vector.load %arg17[%c0_135, %c0_136] : memref<64x128xf32, #tpu.memory_space<vmem>>, vector<64x128xf32>
    tpu.vector_store %arg17[%c0_135, %c0_136], %292 {strides = array<i32>} : memref<64x128xf32, #tpu.memory_space<vmem>>, vector<64x128xf32>,
    %cst_137 = arith.constant 0.000000e+00 : f32
    %294 = vector.broadcast %cst_137 : f32 to vector<8x32xf32>
    %cst_138 = arith.constant 0.000000e+00 : f32
    %295 = vector.broadcast %cst_138 : f32 to vector<8x32xf32>
    %c0_139 = arith.constant 0 : index
    %c0_140 = arith.constant 0 : index
    %296 = vector.load %arg17[%c0_139, %c0_140] : memref<64x128xf32, #tpu.memory_space<vmem>>, vector<8x128xf32>
    %cst_141 = arith.constant dense<0.000000e+00> : vector<8x128xf32>
    %297 = tpu.matmul %294, %284, %cst_141 {dimension_numbers = #tpu.dot_dimension_numbers<[1], [0], [0], [1], [0, 0, 1, 1], [], []>} : vector<8x32xf32>, vector<32x128xf32>, vector<8x128xf32> -> vector<8x128xf32>
    %298 = arith.addf %296, %297 : vector<8x128xf32>
    %299 = arith.negf %298 : vector<8x128xf32>
    %300 = math.exp %299 : vector<8x128xf32>
    %cst_142 = arith.constant 1.000000e+00 : f32
    %301 = vector.broadcast %cst_142 : f32 to vector<8x128xf32>
    %302 = arith.addf %301, %300 : vector<8x128xf32>
    %303 = arith.divf %301, %302 : vector<8x128xf32>
    %cst_143 = arith.constant 2.000000e+00 : f32
    %304 = vector.broadcast %cst_143 : f32 to vector<8x128xf32>
    %305 = arith.mulf %304, %303 : vector<8x128xf32>
    %cst_144 = arith.constant 1.000000e+00 : f32
    %306 = vector.broadcast %cst_144 : f32 to vector<8x128xf32>
    %307 = arith.subf %305, %306 : vector<8x128xf32>
    %308 = vector.shape_cast %5 : vector<1x128xi1> to vector<1x128xi1>
    %309 = vector.broadcast %308 : vector<1x128xi1> to vector<8x128xi1>
    %310 = arith.select %309, %307, %303 : vector<8x128xi1>, vector<8x128xf32>
    %311 = vector.extract_strided_slice %310 {offsets = [0, 0], sizes = [8, 32], strides = [1, 1]} : vector<8x128xf32> to vector<8x32xf32>
    %312 = vector.extract_strided_slice %310 {offsets = [0, 32], sizes = [8, 32], strides = [1, 1]} : vector<8x128xf32> to vector<8x32xf32>
    %313 = vector.extract_strided_slice %310 {offsets = [0, 64], sizes = [8, 32], strides = [1, 1]} : vector<8x128xf32> to vector<8x32xf32>
    %314 = vector.extract_strided_slice %310 {offsets = [0, 96], sizes = [8, 32], strides = [1, 1]} : vector<8x128xf32> to vector<8x32xf32>
    %315 = arith.mulf %312, %295 : vector<8x32xf32>
    %316 = arith.mulf %311, %313 : vector<8x32xf32>
    %317 = arith.addf %315, %316 : vector<8x32xf32>
    %318 = math.tanh %317 : vector<8x32xf32>
    %319 = arith.mulf %314, %318 : vector<8x32xf32>
    %c0_145 = arith.constant 0 : index
    %c0_146 = arith.constant 0 : index
    %320 = vector.load %arg2[%c0_145, %c0_146] : memref<64x32xf32, #tpu.memory_space<vmem>>, vector<8x32xf32>
    %cst_147 = arith.constant 0.000000e+00 : f32
    %321 = vector.broadcast %cst_147 : f32 to vector<8x32xf32>
    %322 = arith.cmpf ogt, %320, %321 : vector<8x32xf32>
    %323 = arith.select %322, %319, %294 : vector<8x32xi1>, vector<8x32xf32>
    %324 = arith.select %322, %317, %295 : vector<8x32xi1>, vector<8x32xf32>
    %cst_148 = arith.constant 0.000000e+00 : f32
    %325 = vector.broadcast %cst_148 : f32 to vector<8x32xf32>
    %326 = arith.select %322, %319, %325 : vector<8x32xi1>, vector<8x32xf32>
    %c0_149 = arith.constant 0 : index
    %c0_150 = arith.constant 0 : index
    %327 = vector.load %arg14[%c0_149, %c0_150] : memref<64x32xf32, #tpu.memory_space<vmem>>, vector<8x32xf32>
    tpu.vector_store %arg14[%c0_149, %c0_150], %326 {strides = array<i32>} : memref<64x32xf32, #tpu.memory_space<vmem>>, vector<8x32xf32>,
    %c56_151 = arith.constant 56 : index
    %c0_152 = arith.constant 0 : index
    %328 = vector.load %arg18[%c56_151, %c0_152] : memref<64x32xf32, #tpu.memory_space<vmem>>, vector<8x32xf32>
    tpu.vector_store %arg18[%c56_151, %c0_152], %326 {strides = array<i32>} : memref<64x32xf32, #tpu.memory_space<vmem>>, vector<8x32xf32>,
    %c8_153 = arith.constant 8 : index
    %c0_154 = arith.constant 0 : index
    %329 = vector.load %arg17[%c8_153, %c0_154] : memref<64x128xf32, #tpu.memory_space<vmem>>, vector<8x128xf32>
    %cst_155 = arith.constant dense<0.000000e+00> : vector<8x128xf32>
    %330 = tpu.matmul %323, %284, %cst_155 {dimension_numbers = #tpu.dot_dimension_numbers<[1], [0], [0], [1], [0, 0, 1, 1], [], []>} : vector<8x32xf32>, vector<32x128xf32>, vector<8x128xf32> -> vector<8x128xf32>
    %331 = arith.addf %329, %330 : vector<8x128xf32>
    %332 = arith.negf %331 : vector<8x128xf32>
    %333 = math.exp %332 : vector<8x128xf32>
    %cst_156 = arith.constant 1.000000e+00 : f32
    %334 = vector.broadcast %cst_156 : f32 to vector<8x128xf32>
    %335 = arith.addf %334, %333 : vector<8x128xf32>
    %336 = arith.divf %334, %335 : vector<8x128xf32>
    %cst_157 = arith.constant 2.000000e+00 : f32
    %337 = vector.broadcast %cst_157 : f32 to vector<8x128xf32>
    %338 = arith.mulf %337, %336 : vector<8x128xf32>
    %cst_158 = arith.constant 1.000000e+00 : f32
    %339 = vector.broadcast %cst_158 : f32 to vector<8x128xf32>
    %340 = arith.subf %338, %339 : vector<8x128xf32>
    %341 = vector.shape_cast %5 : vector<1x128xi1> to vector<1x128xi1>
    %342 = vector.broadcast %341 : vector<1x128xi1> to vector<8x128xi1>
    %343 = arith.select %342, %340, %336 : vector<8x128xi1>, vector<8x128xf32>
    %344 = vector.extract_strided_slice %343 {offsets = [0, 0], sizes = [8, 32], strides = [1, 1]} : vector<8x128xf32> to vector<8x32xf32>
    %345 = vector.extract_strided_slice %343 {offsets = [0, 32], sizes = [8, 32], strides = [1, 1]} : vector<8x128xf32> to vector<8x32xf32>
    %346 = vector.extract_strided_slice %343 {offsets = [0, 64], sizes = [8, 32], strides = [1, 1]} : vector<8x128xf32> to vector<8x32xf32>
    %347 = vector.extract_strided_slice %343 {offsets = [0, 96], sizes = [8, 32], strides = [1, 1]} : vector<8x128xf32> to vector<8x32xf32>
    %348 = arith.mulf %345, %324 : vector<8x32xf32>
    %349 = arith.mulf %344, %346 : vector<8x32xf32>
    %350 = arith.addf %348, %349 : vector<8x32xf32>
    %351 = math.tanh %350 : vector<8x32xf32>
    %352 = arith.mulf %347, %351 : vector<8x32xf32>
    %c8_159 = arith.constant 8 : index
    %c0_160 = arith.constant 0 : index
    %353 = vector.load %arg2[%c8_159, %c0_160] : memref<64x32xf32, #tpu.memory_space<vmem>>, vector<8x32xf32>
    %cst_161 = arith.constant 0.000000e+00 : f32
    %354 = vector.broadcast %cst_161 : f32 to vector<8x32xf32>
    %355 = arith.cmpf ogt, %353, %354 : vector<8x32xf32>
    %356 = arith.select %355, %352, %323 : vector<8x32xi1>, vector<8x32xf32>
    %357 = arith.select %355, %350, %324 : vector<8x32xi1>, vector<8x32xf32>
    %cst_162 = arith.constant 0.000000e+00 : f32
    %358 = vector.broadcast %cst_162 : f32 to vector<8x32xf32>
    %359 = arith.select %355, %352, %358 : vector<8x32xi1>, vector<8x32xf32>
    %c8_163 = arith.constant 8 : index
    %c0_164 = arith.constant 0 : index
    %360 = vector.load %arg14[%c8_163, %c0_164] : memref<64x32xf32, #tpu.memory_space<vmem>>, vector<8x32xf32>
    tpu.vector_store %arg14[%c8_163, %c0_164], %359 {strides = array<i32>} : memref<64x32xf32, #tpu.memory_space<vmem>>, vector<8x32xf32>,
    %c48_165 = arith.constant 48 : index
    %c0_166 = arith.constant 0 : index
    %361 = vector.load %arg18[%c48_165, %c0_166] : memref<64x32xf32, #tpu.memory_space<vmem>>, vector<8x32xf32>
    tpu.vector_store %arg18[%c48_165, %c0_166], %359 {strides = array<i32>} : memref<64x32xf32, #tpu.memory_space<vmem>>, vector<8x32xf32>,
    %c16_167 = arith.constant 16 : index
    %c0_168 = arith.constant 0 : index
    %362 = vector.load %arg17[%c16_167, %c0_168] : memref<64x128xf32, #tpu.memory_space<vmem>>, vector<8x128xf32>
    %cst_169 = arith.constant dense<0.000000e+00> : vector<8x128xf32>
    %363 = tpu.matmul %356, %284, %cst_169 {dimension_numbers = #tpu.dot_dimension_numbers<[1], [0], [0], [1], [0, 0, 1, 1], [], []>} : vector<8x32xf32>, vector<32x128xf32>, vector<8x128xf32> -> vector<8x128xf32>
    %364 = arith.addf %362, %363 : vector<8x128xf32>
    %365 = arith.negf %364 : vector<8x128xf32>
    %366 = math.exp %365 : vector<8x128xf32>
    %cst_170 = arith.constant 1.000000e+00 : f32
    %367 = vector.broadcast %cst_170 : f32 to vector<8x128xf32>
    %368 = arith.addf %367, %366 : vector<8x128xf32>
    %369 = arith.divf %367, %368 : vector<8x128xf32>
    %cst_171 = arith.constant 2.000000e+00 : f32
    %370 = vector.broadcast %cst_171 : f32 to vector<8x128xf32>
    %371 = arith.mulf %370, %369 : vector<8x128xf32>
    %cst_172 = arith.constant 1.000000e+00 : f32
    %372 = vector.broadcast %cst_172 : f32 to vector<8x128xf32>
    %373 = arith.subf %371, %372 : vector<8x128xf32>
    %374 = vector.shape_cast %5 : vector<1x128xi1> to vector<1x128xi1>
    %375 = vector.broadcast %374 : vector<1x128xi1> to vector<8x128xi1>
    %376 = arith.select %375, %373, %369 : vector<8x128xi1>, vector<8x128xf32>
    %377 = vector.extract_strided_slice %376 {offsets = [0, 0], sizes = [8, 32], strides = [1, 1]} : vector<8x128xf32> to vector<8x32xf32>
    %378 = vector.extract_strided_slice %376 {offsets = [0, 32], sizes = [8, 32], strides = [1, 1]} : vector<8x128xf32> to vector<8x32xf32>
    %379 = vector.extract_strided_slice %376 {offsets = [0, 64], sizes = [8, 32], strides = [1, 1]} : vector<8x128xf32> to vector<8x32xf32>
    %380 = vector.extract_strided_slice %376 {offsets = [0, 96], sizes = [8, 32], strides = [1, 1]} : vector<8x128xf32> to vector<8x32xf32>
    %381 = arith.mulf %378, %357 : vector<8x32xf32>
    %382 = arith.mulf %377, %379 : vector<8x32xf32>
    %383 = arith.addf %381, %382 : vector<8x32xf32>
    %384 = math.tanh %383 : vector<8x32xf32>
    %385 = arith.mulf %380, %384 : vector<8x32xf32>
    %c16_173 = arith.constant 16 : index
    %c0_174 = arith.constant 0 : index
    %386 = vector.load %arg2[%c16_173, %c0_174] : memref<64x32xf32, #tpu.memory_space<vmem>>, vector<8x32xf32>
    %cst_175 = arith.constant 0.000000e+00 : f32
    %387 = vector.broadcast %cst_175 : f32 to vector<8x32xf32>
    %388 = arith.cmpf ogt, %386, %387 : vector<8x32xf32>
    %389 = arith.select %388, %385, %356 : vector<8x32xi1>, vector<8x32xf32>
    %390 = arith.select %388, %383, %357 : vector<8x32xi1>, vector<8x32xf32>
    %cst_176 = arith.constant 0.000000e+00 : f32
    %391 = vector.broadcast %cst_176 : f32 to vector<8x32xf32>
    %392 = arith.select %388, %385, %391 : vector<8x32xi1>, vector<8x32xf32>
    %c16_177 = arith.constant 16 : index
    %c0_178 = arith.constant 0 : index
    %393 = vector.load %arg14[%c16_177, %c0_178] : memref<64x32xf32, #tpu.memory_space<vmem>>, vector<8x32xf32>
    tpu.vector_store %arg14[%c16_177, %c0_178], %392 {strides = array<i32>} : memref<64x32xf32, #tpu.memory_space<vmem>>, vector<8x32xf32>,
    %c40_179 = arith.constant 40 : index
    %c0_180 = arith.constant 0 : index
    %394 = vector.load %arg18[%c40_179, %c0_180] : memref<64x32xf32, #tpu.memory_space<vmem>>, vector<8x32xf32>
    tpu.vector_store %arg18[%c40_179, %c0_180], %392 {strides = array<i32>} : memref<64x32xf32, #tpu.memory_space<vmem>>, vector<8x32xf32>,
    %c24_181 = arith.constant 24 : index
    %c0_182 = arith.constant 0 : index
    %395 = vector.load %arg17[%c24_181, %c0_182] : memref<64x128xf32, #tpu.memory_space<vmem>>, vector<8x128xf32>
    %cst_183 = arith.constant dense<0.000000e+00> : vector<8x128xf32>
    %396 = tpu.matmul %389, %284, %cst_183 {dimension_numbers = #tpu.dot_dimension_numbers<[1], [0], [0], [1], [0, 0, 1, 1], [], []>} : vector<8x32xf32>, vector<32x128xf32>, vector<8x128xf32> -> vector<8x128xf32>
    %397 = arith.addf %395, %396 : vector<8x128xf32>
    %398 = arith.negf %397 : vector<8x128xf32>
    %399 = math.exp %398 : vector<8x128xf32>
    %cst_184 = arith.constant 1.000000e+00 : f32
    %400 = vector.broadcast %cst_184 : f32 to vector<8x128xf32>
    %401 = arith.addf %400, %399 : vector<8x128xf32>
    %402 = arith.divf %400, %401 : vector<8x128xf32>
    %cst_185 = arith.constant 2.000000e+00 : f32
    %403 = vector.broadcast %cst_185 : f32 to vector<8x128xf32>
    %404 = arith.mulf %403, %402 : vector<8x128xf32>
    %cst_186 = arith.constant 1.000000e+00 : f32
    %405 = vector.broadcast %cst_186 : f32 to vector<8x128xf32>
    %406 = arith.subf %404, %405 : vector<8x128xf32>
    %407 = vector.shape_cast %5 : vector<1x128xi1> to vector<1x128xi1>
    %408 = vector.broadcast %407 : vector<1x128xi1> to vector<8x128xi1>
    %409 = arith.select %408, %406, %402 : vector<8x128xi1>, vector<8x128xf32>
    %410 = vector.extract_strided_slice %409 {offsets = [0, 0], sizes = [8, 32], strides = [1, 1]} : vector<8x128xf32> to vector<8x32xf32>
    %411 = vector.extract_strided_slice %409 {offsets = [0, 32], sizes = [8, 32], strides = [1, 1]} : vector<8x128xf32> to vector<8x32xf32>
    %412 = vector.extract_strided_slice %409 {offsets = [0, 64], sizes = [8, 32], strides = [1, 1]} : vector<8x128xf32> to vector<8x32xf32>
    %413 = vector.extract_strided_slice %409 {offsets = [0, 96], sizes = [8, 32], strides = [1, 1]} : vector<8x128xf32> to vector<8x32xf32>
    %414 = arith.mulf %411, %390 : vector<8x32xf32>
    %415 = arith.mulf %410, %412 : vector<8x32xf32>
    %416 = arith.addf %414, %415 : vector<8x32xf32>
    %417 = math.tanh %416 : vector<8x32xf32>
    %418 = arith.mulf %413, %417 : vector<8x32xf32>
    %c24_187 = arith.constant 24 : index
    %c0_188 = arith.constant 0 : index
    %419 = vector.load %arg2[%c24_187, %c0_188] : memref<64x32xf32, #tpu.memory_space<vmem>>, vector<8x32xf32>
    %cst_189 = arith.constant 0.000000e+00 : f32
    %420 = vector.broadcast %cst_189 : f32 to vector<8x32xf32>
    %421 = arith.cmpf ogt, %419, %420 : vector<8x32xf32>
    %422 = arith.select %421, %418, %389 : vector<8x32xi1>, vector<8x32xf32>
    %423 = arith.select %421, %416, %390 : vector<8x32xi1>, vector<8x32xf32>
    %cst_190 = arith.constant 0.000000e+00 : f32
    %424 = vector.broadcast %cst_190 : f32 to vector<8x32xf32>
    %425 = arith.select %421, %418, %424 : vector<8x32xi1>, vector<8x32xf32>
    %c24_191 = arith.constant 24 : index
    %c0_192 = arith.constant 0 : index
    %426 = vector.load %arg14[%c24_191, %c0_192] : memref<64x32xf32, #tpu.memory_space<vmem>>, vector<8x32xf32>
    tpu.vector_store %arg14[%c24_191, %c0_192], %425 {strides = array<i32>} : memref<64x32xf32, #tpu.memory_space<vmem>>, vector<8x32xf32>,
    %c32_193 = arith.constant 32 : index
    %c0_194 = arith.constant 0 : index
    %427 = vector.load %arg18[%c32_193, %c0_194] : memref<64x32xf32, #tpu.memory_space<vmem>>, vector<8x32xf32>
    tpu.vector_store %arg18[%c32_193, %c0_194], %425 {strides = array<i32>} : memref<64x32xf32, #tpu.memory_space<vmem>>, vector<8x32xf32>,
    %c32_195 = arith.constant 32 : index
    %c0_196 = arith.constant 0 : index
    %428 = vector.load %arg17[%c32_195, %c0_196] : memref<64x128xf32, #tpu.memory_space<vmem>>, vector<8x128xf32>
    %cst_197 = arith.constant dense<0.000000e+00> : vector<8x128xf32>
    %429 = tpu.matmul %422, %284, %cst_197 {dimension_numbers = #tpu.dot_dimension_numbers<[1], [0], [0], [1], [0, 0, 1, 1], [], []>} : vector<8x32xf32>, vector<32x128xf32>, vector<8x128xf32> -> vector<8x128xf32>
    %430 = arith.addf %428, %429 : vector<8x128xf32>
    %431 = arith.negf %430 : vector<8x128xf32>
    %432 = math.exp %431 : vector<8x128xf32>
    %cst_198 = arith.constant 1.000000e+00 : f32
    %433 = vector.broadcast %cst_198 : f32 to vector<8x128xf32>
    %434 = arith.addf %433, %432 : vector<8x128xf32>
    %435 = arith.divf %433, %434 : vector<8x128xf32>
    %cst_199 = arith.constant 2.000000e+00 : f32
    %436 = vector.broadcast %cst_199 : f32 to vector<8x128xf32>
    %437 = arith.mulf %436, %435 : vector<8x128xf32>
    %cst_200 = arith.constant 1.000000e+00 : f32
    %438 = vector.broadcast %cst_200 : f32 to vector<8x128xf32>
    %439 = arith.subf %437, %438 : vector<8x128xf32>
    %440 = vector.shape_cast %5 : vector<1x128xi1> to vector<1x128xi1>
    %441 = vector.broadcast %440 : vector<1x128xi1> to vector<8x128xi1>
    %442 = arith.select %441, %439, %435 : vector<8x128xi1>, vector<8x128xf32>
    %443 = vector.extract_strided_slice %442 {offsets = [0, 0], sizes = [8, 32], strides = [1, 1]} : vector<8x128xf32> to vector<8x32xf32>
    %444 = vector.extract_strided_slice %442 {offsets = [0, 32], sizes = [8, 32], strides = [1, 1]} : vector<8x128xf32> to vector<8x32xf32>
    %445 = vector.extract_strided_slice %442 {offsets = [0, 64], sizes = [8, 32], strides = [1, 1]} : vector<8x128xf32> to vector<8x32xf32>
    %446 = vector.extract_strided_slice %442 {offsets = [0, 96], sizes = [8, 32], strides = [1, 1]} : vector<8x128xf32> to vector<8x32xf32>
    %447 = arith.mulf %444, %423 : vector<8x32xf32>
    %448 = arith.mulf %443, %445 : vector<8x32xf32>
    %449 = arith.addf %447, %448 : vector<8x32xf32>
    %450 = math.tanh %449 : vector<8x32xf32>
    %451 = arith.mulf %446, %450 : vector<8x32xf32>
    %c32_201 = arith.constant 32 : index
    %c0_202 = arith.constant 0 : index
    %452 = vector.load %arg2[%c32_201, %c0_202] : memref<64x32xf32, #tpu.memory_space<vmem>>, vector<8x32xf32>
    %cst_203 = arith.constant 0.000000e+00 : f32
    %453 = vector.broadcast %cst_203 : f32 to vector<8x32xf32>
    %454 = arith.cmpf ogt, %452, %453 : vector<8x32xf32>
    %455 = arith.select %454, %451, %422 : vector<8x32xi1>, vector<8x32xf32>
    %456 = arith.select %454, %449, %423 : vector<8x32xi1>, vector<8x32xf32>
    %cst_204 = arith.constant 0.000000e+00 : f32
    %457 = vector.broadcast %cst_204 : f32 to vector<8x32xf32>
    %458 = arith.select %454, %451, %457 : vector<8x32xi1>, vector<8x32xf32>
    %c32_205 = arith.constant 32 : index
    %c0_206 = arith.constant 0 : index
    %459 = vector.load %arg14[%c32_205, %c0_206] : memref<64x32xf32, #tpu.memory_space<vmem>>, vector<8x32xf32>
    tpu.vector_store %arg14[%c32_205, %c0_206], %458 {strides = array<i32>} : memref<64x32xf32, #tpu.memory_space<vmem>>, vector<8x32xf32>,
    %c24_207 = arith.constant 24 : index
    %c0_208 = arith.constant 0 : index
    %460 = vector.load %arg18[%c24_207, %c0_208] : memref<64x32xf32, #tpu.memory_space<vmem>>, vector<8x32xf32>
    tpu.vector_store %arg18[%c24_207, %c0_208], %458 {strides = array<i32>} : memref<64x32xf32, #tpu.memory_space<vmem>>, vector<8x32xf32>,
    %c40_209 = arith.constant 40 : index
    %c0_210 = arith.constant 0 : index
    %461 = vector.load %arg17[%c40_209, %c0_210] : memref<64x128xf32, #tpu.memory_space<vmem>>, vector<8x128xf32>
    %cst_211 = arith.constant dense<0.000000e+00> : vector<8x128xf32>
    %462 = tpu.matmul %455, %284, %cst_211 {dimension_numbers = #tpu.dot_dimension_numbers<[1], [0], [0], [1], [0, 0, 1, 1], [], []>} : vector<8x32xf32>, vector<32x128xf32>, vector<8x128xf32> -> vector<8x128xf32>
    %463 = arith.addf %461, %462 : vector<8x128xf32>
    %464 = arith.negf %463 : vector<8x128xf32>
    %465 = math.exp %464 : vector<8x128xf32>
    %cst_212 = arith.constant 1.000000e+00 : f32
    %466 = vector.broadcast %cst_212 : f32 to vector<8x128xf32>
    %467 = arith.addf %466, %465 : vector<8x128xf32>
    %468 = arith.divf %466, %467 : vector<8x128xf32>
    %cst_213 = arith.constant 2.000000e+00 : f32
    %469 = vector.broadcast %cst_213 : f32 to vector<8x128xf32>
    %470 = arith.mulf %469, %468 : vector<8x128xf32>
    %cst_214 = arith.constant 1.000000e+00 : f32
    %471 = vector.broadcast %cst_214 : f32 to vector<8x128xf32>
    %472 = arith.subf %470, %471 : vector<8x128xf32>
    %473 = vector.shape_cast %5 : vector<1x128xi1> to vector<1x128xi1>
    %474 = vector.broadcast %473 : vector<1x128xi1> to vector<8x128xi1>
    %475 = arith.select %474, %472, %468 : vector<8x128xi1>, vector<8x128xf32>
    %476 = vector.extract_strided_slice %475 {offsets = [0, 0], sizes = [8, 32], strides = [1, 1]} : vector<8x128xf32> to vector<8x32xf32>
    %477 = vector.extract_strided_slice %475 {offsets = [0, 32], sizes = [8, 32], strides = [1, 1]} : vector<8x128xf32> to vector<8x32xf32>
    %478 = vector.extract_strided_slice %475 {offsets = [0, 64], sizes = [8, 32], strides = [1, 1]} : vector<8x128xf32> to vector<8x32xf32>
    %479 = vector.extract_strided_slice %475 {offsets = [0, 96], sizes = [8, 32], strides = [1, 1]} : vector<8x128xf32> to vector<8x32xf32>
    %480 = arith.mulf %477, %456 : vector<8x32xf32>
    %481 = arith.mulf %476, %478 : vector<8x32xf32>
    %482 = arith.addf %480, %481 : vector<8x32xf32>
    %483 = math.tanh %482 : vector<8x32xf32>
    %484 = arith.mulf %479, %483 : vector<8x32xf32>
    %c40_215 = arith.constant 40 : index
    %c0_216 = arith.constant 0 : index
    %485 = vector.load %arg2[%c40_215, %c0_216] : memref<64x32xf32, #tpu.memory_space<vmem>>, vector<8x32xf32>
    %cst_217 = arith.constant 0.000000e+00 : f32
    %486 = vector.broadcast %cst_217 : f32 to vector<8x32xf32>
    %487 = arith.cmpf ogt, %485, %486 : vector<8x32xf32>
    %488 = arith.select %487, %484, %455 : vector<8x32xi1>, vector<8x32xf32>
    %489 = arith.select %487, %482, %456 : vector<8x32xi1>, vector<8x32xf32>
    %cst_218 = arith.constant 0.000000e+00 : f32
    %490 = vector.broadcast %cst_218 : f32 to vector<8x32xf32>
    %491 = arith.select %487, %484, %490 : vector<8x32xi1>, vector<8x32xf32>
    %c40_219 = arith.constant 40 : index
    %c0_220 = arith.constant 0 : index
    %492 = vector.load %arg14[%c40_219, %c0_220] : memref<64x32xf32, #tpu.memory_space<vmem>>, vector<8x32xf32>
    tpu.vector_store %arg14[%c40_219, %c0_220], %491 {strides = array<i32>} : memref<64x32xf32, #tpu.memory_space<vmem>>, vector<8x32xf32>,
    %c16_221 = arith.constant 16 : index
    %c0_222 = arith.constant 0 : index
    %493 = vector.load %arg18[%c16_221, %c0_222] : memref<64x32xf32, #tpu.memory_space<vmem>>, vector<8x32xf32>
    tpu.vector_store %arg18[%c16_221, %c0_222], %491 {strides = array<i32>} : memref<64x32xf32, #tpu.memory_space<vmem>>, vector<8x32xf32>,
    %c48_223 = arith.constant 48 : index
    %c0_224 = arith.constant 0 : index
    %494 = vector.load %arg17[%c48_223, %c0_224] : memref<64x128xf32, #tpu.memory_space<vmem>>, vector<8x128xf32>
    %cst_225 = arith.constant dense<0.000000e+00> : vector<8x128xf32>
    %495 = tpu.matmul %488, %284, %cst_225 {dimension_numbers = #tpu.dot_dimension_numbers<[1], [0], [0], [1], [0, 0, 1, 1], [], []>} : vector<8x32xf32>, vector<32x128xf32>, vector<8x128xf32> -> vector<8x128xf32>
    %496 = arith.addf %494, %495 : vector<8x128xf32>
    %497 = arith.negf %496 : vector<8x128xf32>
    %498 = math.exp %497 : vector<8x128xf32>
    %cst_226 = arith.constant 1.000000e+00 : f32
    %499 = vector.broadcast %cst_226 : f32 to vector<8x128xf32>
    %500 = arith.addf %499, %498 : vector<8x128xf32>
    %501 = arith.divf %499, %500 : vector<8x128xf32>
    %cst_227 = arith.constant 2.000000e+00 : f32
    %502 = vector.broadcast %cst_227 : f32 to vector<8x128xf32>
    %503 = arith.mulf %502, %501 : vector<8x128xf32>
    %cst_228 = arith.constant 1.000000e+00 : f32
    %504 = vector.broadcast %cst_228 : f32 to vector<8x128xf32>
    %505 = arith.subf %503, %504 : vector<8x128xf32>
    %506 = vector.shape_cast %5 : vector<1x128xi1> to vector<1x128xi1>
    %507 = vector.broadcast %506 : vector<1x128xi1> to vector<8x128xi1>
    %508 = arith.select %507, %505, %501 : vector<8x128xi1>, vector<8x128xf32>
    %509 = vector.extract_strided_slice %508 {offsets = [0, 0], sizes = [8, 32], strides = [1, 1]} : vector<8x128xf32> to vector<8x32xf32>
    %510 = vector.extract_strided_slice %508 {offsets = [0, 32], sizes = [8, 32], strides = [1, 1]} : vector<8x128xf32> to vector<8x32xf32>
    %511 = vector.extract_strided_slice %508 {offsets = [0, 64], sizes = [8, 32], strides = [1, 1]} : vector<8x128xf32> to vector<8x32xf32>
    %512 = vector.extract_strided_slice %508 {offsets = [0, 96], sizes = [8, 32], strides = [1, 1]} : vector<8x128xf32> to vector<8x32xf32>
    %513 = arith.mulf %510, %489 : vector<8x32xf32>
    %514 = arith.mulf %509, %511 : vector<8x32xf32>
    %515 = arith.addf %513, %514 : vector<8x32xf32>
    %516 = math.tanh %515 : vector<8x32xf32>
    %517 = arith.mulf %512, %516 : vector<8x32xf32>
    %c48_229 = arith.constant 48 : index
    %c0_230 = arith.constant 0 : index
    %518 = vector.load %arg2[%c48_229, %c0_230] : memref<64x32xf32, #tpu.memory_space<vmem>>, vector<8x32xf32>
    %cst_231 = arith.constant 0.000000e+00 : f32
    %519 = vector.broadcast %cst_231 : f32 to vector<8x32xf32>
    %520 = arith.cmpf ogt, %518, %519 : vector<8x32xf32>
    %521 = arith.select %520, %517, %488 : vector<8x32xi1>, vector<8x32xf32>
    %522 = arith.select %520, %515, %489 : vector<8x32xi1>, vector<8x32xf32>
    %cst_232 = arith.constant 0.000000e+00 : f32
    %523 = vector.broadcast %cst_232 : f32 to vector<8x32xf32>
    %524 = arith.select %520, %517, %523 : vector<8x32xi1>, vector<8x32xf32>
    %c48_233 = arith.constant 48 : index
    %c0_234 = arith.constant 0 : index
    %525 = vector.load %arg14[%c48_233, %c0_234] : memref<64x32xf32, #tpu.memory_space<vmem>>, vector<8x32xf32>
    tpu.vector_store %arg14[%c48_233, %c0_234], %524 {strides = array<i32>} : memref<64x32xf32, #tpu.memory_space<vmem>>, vector<8x32xf32>,
    %c8_235 = arith.constant 8 : index
    %c0_236 = arith.constant 0 : index
    %526 = vector.load %arg18[%c8_235, %c0_236] : memref<64x32xf32, #tpu.memory_space<vmem>>, vector<8x32xf32>
    tpu.vector_store %arg18[%c8_235, %c0_236], %524 {strides = array<i32>} : memref<64x32xf32, #tpu.memory_space<vmem>>, vector<8x32xf32>,
    %c56_237 = arith.constant 56 : index
    %c0_238 = arith.constant 0 : index
    %527 = vector.load %arg17[%c56_237, %c0_238] : memref<64x128xf32, #tpu.memory_space<vmem>>, vector<8x128xf32>
    %cst_239 = arith.constant dense<0.000000e+00> : vector<8x128xf32>
    %528 = tpu.matmul %521, %284, %cst_239 {dimension_numbers = #tpu.dot_dimension_numbers<[1], [0], [0], [1], [0, 0, 1, 1], [], []>} : vector<8x32xf32>, vector<32x128xf32>, vector<8x128xf32> -> vector<8x128xf32>
    %529 = arith.addf %527, %528 : vector<8x128xf32>
    %530 = arith.negf %529 : vector<8x128xf32>
    %531 = math.exp %530 : vector<8x128xf32>
    %cst_240 = arith.constant 1.000000e+00 : f32
    %532 = vector.broadcast %cst_240 : f32 to vector<8x128xf32>
    %533 = arith.addf %532, %531 : vector<8x128xf32>
    %534 = arith.divf %532, %533 : vector<8x128xf32>
    %cst_241 = arith.constant 2.000000e+00 : f32
    %535 = vector.broadcast %cst_241 : f32 to vector<8x128xf32>
    %536 = arith.mulf %535, %534 : vector<8x128xf32>
    %cst_242 = arith.constant 1.000000e+00 : f32
    %537 = vector.broadcast %cst_242 : f32 to vector<8x128xf32>
    %538 = arith.subf %536, %537 : vector<8x128xf32>
    %539 = vector.shape_cast %5 : vector<1x128xi1> to vector<1x128xi1>
    %540 = vector.broadcast %539 : vector<1x128xi1> to vector<8x128xi1>
    %541 = arith.select %540, %538, %534 : vector<8x128xi1>, vector<8x128xf32>
    %542 = vector.extract_strided_slice %541 {offsets = [0, 0], sizes = [8, 32], strides = [1, 1]} : vector<8x128xf32> to vector<8x32xf32>
    %543 = vector.extract_strided_slice %541 {offsets = [0, 32], sizes = [8, 32], strides = [1, 1]} : vector<8x128xf32> to vector<8x32xf32>
    %544 = vector.extract_strided_slice %541 {offsets = [0, 64], sizes = [8, 32], strides = [1, 1]} : vector<8x128xf32> to vector<8x32xf32>
    %545 = vector.extract_strided_slice %541 {offsets = [0, 96], sizes = [8, 32], strides = [1, 1]} : vector<8x128xf32> to vector<8x32xf32>
    %546 = arith.mulf %543, %522 : vector<8x32xf32>
    %547 = arith.mulf %542, %544 : vector<8x32xf32>
    %548 = arith.addf %546, %547 : vector<8x32xf32>
    %549 = math.tanh %548 : vector<8x32xf32>
    %550 = arith.mulf %545, %549 : vector<8x32xf32>
    %c56_243 = arith.constant 56 : index
    %c0_244 = arith.constant 0 : index
    %551 = vector.load %arg2[%c56_243, %c0_244] : memref<64x32xf32, #tpu.memory_space<vmem>>, vector<8x32xf32>
    %cst_245 = arith.constant 0.000000e+00 : f32
    %552 = vector.broadcast %cst_245 : f32 to vector<8x32xf32>
    %553 = arith.cmpf ogt, %551, %552 : vector<8x32xf32>
    %cst_246 = arith.constant 0.000000e+00 : f32
    %554 = vector.broadcast %cst_246 : f32 to vector<8x32xf32>
    %555 = arith.select %553, %550, %554 : vector<8x32xi1>, vector<8x32xf32>
    %c56_247 = arith.constant 56 : index
    %c0_248 = arith.constant 0 : index
    %556 = vector.load %arg14[%c56_247, %c0_248] : memref<64x32xf32, #tpu.memory_space<vmem>>, vector<8x32xf32>
    tpu.vector_store %arg14[%c56_247, %c0_248], %555 {strides = array<i32>} : memref<64x32xf32, #tpu.memory_space<vmem>>, vector<8x32xf32>,
    %c0_249 = arith.constant 0 : index
    %c0_250 = arith.constant 0 : index
    %557 = vector.load %arg18[%c0_249, %c0_250] : memref<64x32xf32, #tpu.memory_space<vmem>>, vector<8x32xf32>
    tpu.vector_store %arg18[%c0_249, %c0_250], %555 {strides = array<i32>} : memref<64x32xf32, #tpu.memory_space<vmem>>, vector<8x32xf32>,
    %c0_251 = arith.constant 0 : index
    %c0_252 = arith.constant 0 : index
    %558 = vector.load %arg14[%c0_251, %c0_252] : memref<64x32xf32, #tpu.memory_space<vmem>>, vector<64x32xf32>
    %c0_253 = arith.constant 0 : index
    %c0_254 = arith.constant 0 : index
    %559 = vector.load %arg11[%c0_253, %c0_254] : memref<32x128xf32, #tpu.memory_space<vmem>>, vector<32x128xf32>
    %cst_255 = arith.constant dense<0.000000e+00> : vector<64x128xf32>
    %560 = tpu.matmul %558, %559, %cst_255 {dimension_numbers = #tpu.dot_dimension_numbers<[1], [0], [0], [1], [0, 0, 1, 1], [], []>} : vector<64x32xf32>, vector<32x128xf32>, vector<64x128xf32> -> vector<64x128xf32>
    %c0_256 = arith.constant 0 : index
    %c0_257 = arith.constant 0 : index
    %561 = vector.load %arg18[%c0_256, %c0_257] : memref<64x32xf32, #tpu.memory_space<vmem>>, vector<64x32xf32>
    %c0_258 = arith.constant 0 : index
    %c0_259 = arith.constant 0 : index
    %562 = vector.load %arg12[%c0_258, %c0_259] : memref<32x128xf32, #tpu.memory_space<vmem>>, vector<32x128xf32>
    %cst_260 = arith.constant dense<0.000000e+00> : vector<64x128xf32>
    %563 = tpu.matmul %561, %562, %cst_260 {dimension_numbers = #tpu.dot_dimension_numbers<[1], [0], [0], [1], [0, 0, 1, 1], [], []>} : vector<64x32xf32>, vector<32x128xf32>, vector<64x128xf32> -> vector<64x128xf32>
    %564 = arith.addf %560, %563 : vector<64x128xf32>
    %c0_261 = arith.constant 0 : index
    %c0_262 = arith.constant 0 : index
    %565 = vector.load %arg13[%c0_261, %c0_262] : memref<1x128xf32, #tpu.memory_space<vmem>>, vector<1x128xf32>
    %566 = vector.broadcast %565 : vector<1x128xf32> to vector<64x128xf32>
    %567 = arith.addf %564, %566 : vector<64x128xf32>
    %c0_263 = arith.constant 0 : index
    %c0_264 = arith.constant 0 : index
    %568 = vector.load %arg15[%c0_263, %c0_264] : memref<64x128xf32, #tpu.memory_space<vmem>>, vector<64x128xf32>
    tpu.vector_store %arg15[%c0_263, %c0_264], %567 {strides = array<i32>} : memref<64x128xf32, #tpu.memory_space<vmem>>, vector<64x128xf32>,
    %cst_265 = arith.constant dense<0xFF800000> : vector<64xf32>
    %569 = vector.multi_reduction <maximumf>, %567, %cst_265 [1] : vector<64x128xf32> to vector<64xf32>
    %570 = vector.shape_cast %569 : vector<64xf32> to vector<64x1xf32>
    %571 = vector.broadcast %570 : vector<64x1xf32> to vector<64x128xf32>
    %572 = arith.subf %567, %571 : vector<64x128xf32>
    %573 = math.exp %572 : vector<64x128xf32>
    %cst_266 = arith.constant dense<0.000000e+00> : vector<64xf32>
    %574 = vector.multi_reduction <add>, %573, %cst_266 [1] : vector<64x128xf32> to vector<64xf32>
    %575 = vector.shape_cast %574 : vector<64xf32> to vector<64x1xf32>
    %576 = vector.broadcast %575 : vector<64x1xf32> to vector<64x128xf32>
    %577 = arith.divf %573, %576 : vector<64x128xf32>
    %c0_267 = arith.constant 0 : index
    %c0_268 = arith.constant 0 : index
    %578 = vector.load %arg16[%c0_267, %c0_268] : memref<64x128xf32, #tpu.memory_space<vmem>>, vector<64x128xf32>
    tpu.vector_store %arg16[%c0_267, %c0_268], %577 {strides = array<i32>} : memref<64x128xf32, #tpu.memory_space<vmem>>, vector<64x128xf32>,
    return
  }
}

</mosaic_0001>

<bundles_post_ra>
// kernel: tpu_custom_call.1
= control target key start
LH: loop header
LB: loop body
LE: loop exit
PB: predicated region body
PF: predicated region fallthrough
CT: control target
= control target key end

     0   :  { %s4766_s0 = inlined_call_operand.vmem [shape: f32[64,32], index: 0, kind: input, shape index: {}]   ;;  %s4767_s1 = inlined_call_operand.vmem [shape: f32[64,32], index: 1, kind: input, shape index: {}]   ;;  %s4768_s2 = inlined_call_operand.vmem [shape: f32[64,32], index: 2, kind: input, shape index: {}]   ;;  %s4769_s3 = inlined_call_operand.vmem [shape: f32[32,128], index: 3, kind: input, shape index: {}]   ;;  %s4770_s4 = inlined_call_operand.vmem [shape: f32[32,128], index: 4, kind: input, shape index: {}]   ;;  %s4771_s5 = inlined_call_operand.vmem [shape: f32[32,128], index: 5, kind: input, shape index: {}]   ;;  %s4772_s6 = inlined_call_operand.vmem [shape: f32[1,128], index: 6, kind: input, shape index: {}]   ;;  %s4773_s7 = inlined_call_operand.vmem [shape: f32[32,128], index: 7, kind: input, shape index: {}]   ;;  %s4774_s8 = inlined_call_operand.vmem [shape: f32[32,128], index: 8, kind: input, shape index: {}]   ;;  %s4775_s9 = inlined_call_operand.vmem [shape: f32[32,128], index: 9, kind: input, shape index: {}]   ;;  %s4776_s10 = inlined_call_operand.vmem [shape: f32[1,128], index: 10, kind: input, shape index: {}]   ;;  %s4777_s11 = inlined_call_operand.vmem [shape: f32[32,128], index: 11, kind: input, shape index: {}]   ;;  %s4778_s12 = inlined_call_operand.vmem [shape: f32[32,128], index: 12, kind: input, shape index: {}]   ;;  %s4779_s13 = inlined_call_operand.vmem [shape: f32[1,128], index: 13, kind: input, shape index: {}]   ;;  %s4780_s14 = inlined_call_operand.vmem [shape: f32[64,32], index: 14, kind: output, shape index: {0}]   ;;  %s4781_s15 = inlined_call_operand.hbm [shape: f32[64,128], index: 15, kind: output, shape index: {1}]   ;;  %s4782_s16 = inlined_call_operand.hbm [shape: f32[64,128], index: 16, kind: output, shape index: {2}]  }
   0x1   :  { %4784 = sst [smem:[#allocation10_spill]] %s4766_s0 }
   0x2   :  { %22 = vsyncpa [#allocation5], 0  ;;  %v61_v0 = vld [vmem:[%s4770_s4] sm:$0xff]  ;;  %v62_v1 = vld [vmem:[%s4770_s4 + $0x8] sm:$0xff]  ;;  %vm86_vm0 = vcmask 261120   ;;  %s4785_s25 = sld [smem:[#allocation10_spill]] }
   0x3   :  { %v57_v2 = vld [vmem:[%s4769_s3] sm:$0xff]  ;;  %v3539_v3 = vpack.c.bf16 %v62_v1, %v61_v0  ;;  %v58_v4 = vld [vmem:[%s4769_s3 + $0x8] sm:$0xff]  ;;  %v63_v5 = vld [vmem:[%s4770_s4 + $0x10] sm:$0xff]  ;;  %v3893_v19 = vmov 0.0|0.0  }
   0x4   :  { %v64_v6 = vld [vmem:[%s4770_s4 + $0x18] sm:$0xff]  ;;  %v3547_v7 = vpack.c.bf16 %v58_v4, %v57_v2  ;;  %v59_v9 = vld [vmem:[%s4769_s3 + $0x10] sm:$0xff]  ;;  %v78_v11 = vld [vmem:[%s4767_s1] sm:$0xff] }
   0x5   :  { %v3543_v8 = vpack.c.bf16 %v64_v6, %v63_v5  ;;  %v60_v10 = vld [vmem:[%s4769_s3 + $0x18] sm:$0xff]  ;;  %3540 = vmatprep.subr.bf16.mxu1 %v3539_v3  ;;  %3251 = vmatprep.mubr.msk.f32.mxu1 %vm86_vm0, %v78_v11  ;;  %v65_v14 = vld [vmem:[%s4771_s5] sm:$0xff]  ;;  %v66_v15 = vld [vmem:[%s4771_s5 + $0x8] sm:$0xff] }
   0x6   :  { %v3551_v12 = vpack.c.bf16 %v60_v10, %v59_v9  ;;  %3548 = vmatprep.subr.bf16.mxu0 %v3547_v7  ;;  %3542 = vmatpush3.bf16.msra.mxu1 %v3539_v3  ;;  %v79_v16 = vld [vmem:[%s4767_s1 + $0x8] sm:$0xff]  ;;  %v4029_v17 = vpack.c.bf16 %v66_v15, %v65_v14  ;;  %v80_v20 = vld [vmem:[%s4767_s1 + $0x10] sm:$0xff] }
   0x7   :  { %3550 = vmatpush3.bf16.msra.mxu0 %v3547_v7  ;;  %3544 = vmatprep.subr.bf16.mxu1 %v3543_v8 }
   0x8   :  { %v70_v13 = vld [vmem:[%s4785_s25] sm:$0xff]  ;;  %3552 = vmatprep.subr.bf16.mxu0 %v3551_v12  ;;  %v71_v18 = vld [vmem:[%s4785_s25 + $0x8] sm:$0xff] }
   0x9   :  { %3271 = vmatprep.mubr.msk.f32.mxu0 %vm86_vm0, %v70_v13 }
   0xa   :  { %3546 = vmatpush3.bf16.msra.mxu1 %v3543_v8 }
   0xb   :  { %3554 = vmatpush3.bf16.msra.mxu0 %v3551_v12  ;;  %3555 = vmatprep.subr.bf16.mxu1 %v3893_v19 }
   0xc   :  { %23 = vsyncpa [#allocation7], 0  ;;  %v72_v21 = vld [vmem:[%s4785_s25 + $0x10] sm:$0xff]  ;;  %v68_v23 = vld [vmem:[%s4771_s5 + $0x18] sm:$0xff]  ;;  %3579 = vmatprep.subr.bf16.mxu0 %v3893_v19  ;;  %vm3894_vm1 = vmmov 0   ;;  %v3895_v35 = vmov 0.0   ;;  %v52_v11 = vlaneseq }
   0xd   :  { %v67_v22 = vld [vmem:[%s4771_s5 + $0x10] sm:$0xff]  ;;  %3252 = vmatmul.mubr.msk.f32.vlgmr.msra.gmra.mrb[0].mxu1 %vm86_vm0, %v79_v16  ;;  %v81_v24 = vld [vmem:[%s4767_s1 + $0x18] sm:$0xff]  ;;  %v82_v26 = vld [vmem:[%s4767_s1 + $0x20] sm:$0xff]  ;;  %s3897_s28 = smov 32   ;;  %s3898_s5 = smov 96  }
   0xe   :  { %3272 = vmatmul.mubr.msk.f32.vlgmr.msra.gmra.mrb[0].mxu0 %vm86_vm0, %v71_v18  ;;  %3557 = vmatpush3.bf16.msra.mxu1 %v4029_v17  ;;  %v73_v25 = vld [vmem:[%s4785_s25 + $0x18] sm:$0xff]  ;;  %v4062_v27 = vpack.c.bf16 %v68_v23, %v67_v22  ;;  %v74_v28 = vld [vmem:[%s4785_s25 + $0x20] sm:$0xff]  ;;  %v83_v29 = vld [vmem:[%s4767_s1 + $0x28] sm:$0xff]  ;;  %v53_v12 = vand.u32 127, %v52_v11 }
   0xf   :  { %3254 = vmatprep.mubr.msk.f32.mxu1 %vm86_vm0, %v80_v20  ;;  %3274 = vmatprep.mubr.msk.f32.mxu0 %vm86_vm0, %v72_v21  ;;  %v75_v30 = vld [vmem:[%s4785_s25 + $0x28] sm:$0xff]  ;;  %v84_v31 = vld [vmem:[%s4767_s1 + $0x30] sm:$0xff]  ;;  %v85_v33 = vld [vmem:[%s4767_s1 + $0x38] sm:$0xff] }
  0x10   :  { %3558 = vmatprep.subr.bf16.mxu1 %v3893_v19  ;;  %3581 = vmatpush3.bf16.msra.mxu0 %v4029_v17  ;;  %v76_v32 = vld [vmem:[%s4785_s25 + $0x30] sm:$0xff]  ;;  %v77_v34 = vld [vmem:[%s4785_s25 + $0x38] sm:$0xff]  ;;  %v3010_v39 = vld [vmem:[%s4772_s6] ss:$0 sm:$0xff]  ;;  %vm54_vm2 = vcmp.ge.s32.totalorder %v53_v12, 64  ;;  %vm55_vm3 = vcmp.lt.s32.totalorder %v53_v12, 96 }
  0x11   :  { %3255 = vmatmul.mubr.msk.f32.gmra.mrb[2].mxu1 %vm86_vm0, %v81_v24  ;;  %3582 = vmatprep.subr.bf16.mxu0 %v3893_v19  ;;  %vm4130_vm4 = vmand %vm54_vm2, %vm55_vm3  ;;  %s3896_s6 = smov 64   ;;  %v2594_v15 = vld [vmem:[%s4778_s12 + $0x8] sm:$0xff] }
  0x12   :  { %3275 = vmatmul.mubr.msk.f32.gmra.mrb[2].mxu0 %vm86_vm0, %v73_v25  ;;  %3257 = vmatprep.mubr.msk.f32.mxu1 %vm86_vm0, %v82_v26  ;;  %v4143_v26 = vld [vmem:[%s4768_s2] sm:$0xff] }
  0x13   :  { %3277 = vmatprep.mubr.msk.f32.mxu0 %vm86_vm0, %v74_v28  ;;  %3560 = vmatpush3.bf16.msra.mxu1 %v4062_v27  ;;  %vm471_vm5 = vcmp.gt.f32.partialorder %v4143_v26, 0.0 }
  0x14   :  { %3561 = vmatprep.subr.bf16.mxu1 %v3893_v19  ;;  %3584 = vmatpush3.bf16.msra.mxu0 %v4062_v27 }
  0x15   :  { %3258 = vmatmul.mubr.msk.f32.gmra.mrb[4].mxu1 %vm86_vm0, %v83_v29  ;;  %3591 = vmatprep.subr.bf16.mxu0 %v3893_v19 }
  0x16   :  { %3278 = vmatmul.mubr.msk.f32.gmra.mrb[4].mxu0 %vm86_vm0, %v75_v30  ;;  %3260 = vmatprep.mubr.msk.f32.mxu1 %vm86_vm0, %v84_v31 }
  0x17   :  { %3280 = vmatprep.mubr.msk.f32.mxu0 %vm86_vm0, %v76_v32 }
  0x19   :  { %3261 = vmatmul.mubr.msk.f32.gmra.mrb[6].mxu1 %vm86_vm0, %v85_v33 }
  0x1a   :  { %3281 = vmatmul.mubr.msk.f32.gmra.mrb[6].mxu0 %vm86_vm0, %v77_v34  ;;  %3291 = vmatprep.mubr.msk.f32.mxu1 %vm3894_vm1, %v3895_v35 }
  0x1b   :  { %3335 = vmatprep.mubr.msk.f32.mxu0 %vm3894_vm1, %v3895_v35 }
  0x1d   :  { %3292 = vmatmul.mubr.f32.vlgmr.msra.gmra.mrb[8].mxu1 %v3895_v35 }
  0x1e   :  { %3563 = vmatpush3.bf16.msra.mxu1 %v4029_v17  ;;  %3302 = vmatprep.mubr.msk.f32.mxu1 %vm3894_vm1, %v3895_v35 }
  0x1f   :  { %3564 = vmatprep.subr.bf16.mxu1 %v3893_v19 }
  0x22   :  { %3566 = vmatpush3.bf16.msra.mxu1 %v4062_v27 }
  0x23   :  { %3567 = vmatprep.subr.bf16.mxu1 %v3893_v19 }
  0xe0   :  { %v3253_v36 = vpop.f32.mrb[0].mxu1 }
  0xe1   :  { %v3273_v37 = vpop.f32.mrb[0].mxu0  ;;  %v177_v38 = vpop.f32.mrb[1].mxu1 }
  0xe2   :  { %v312_v40 = vadd.f32 %v3273_v37, %v3253_v36  ;;  %v306_v41 = vpop.f32.mrb[1].mxu0 }
  0xe3   :  { %v307_v42 = vadd.f32 %v306_v41, %v177_v38 }
  0xe4   :  { %v3256_v43 = vpop.f32.mrb[2].mxu1  ;;  %v4116_v44 = vadd.f32 %v3010_v39, %v312_v40 }
  0xe5   :  { %v3276_v45 = vpop.f32.mrb[2].mxu0  ;;  %v187_v46 = vpop.f32.mrb[3].mxu1  ;;  %v351_v2 = vadd.f32 %v3010_v39, %v307_v42 }
  0xe6   :  { %v322_v47 = vadd.f32 %v3276_v45, %v3256_v43  ;;  %v316_v48 = vpop.f32.mrb[3].mxu0 }
  0xe7   :  { %v317_v49 = vadd.f32 %v316_v48, %v187_v46 }
  0xe8   :  { %v3259_v50 = vpop.f32.mrb[4].mxu1  ;;  %v4118_v51 = vadd.f32 %v3010_v39, %v322_v47 }
  0xe9   :  { %v3279_v52 = vpop.f32.mrb[4].mxu0  ;;  %v197_v53 = vpop.f32.mrb[5].mxu1  ;;  %v4120_v54 = vadd.f32 %v3010_v39, %v317_v49 }
  0xea   :  { %v332_v55 = vadd.f32 %v3279_v52, %v3259_v50  ;;  %v326_v56 = vpop.f32.mrb[5].mxu0 }
  0xeb   :  { %v327_v57 = vadd.f32 %v326_v56, %v197_v53  ;;  %v4174_v53 = vld [vmem:[%s4768_s2 + $0x8] sm:$0xff] }
  0xec   :  { %v3262_v58 = vpop.f32.mrb[6].mxu1  ;;  %v4122_v59 = vadd.f32 %v3010_v39, %v332_v55  ;;  %vm590_vm6 = vcmp.gt.f32.partialorder %v4174_v53, 0.0 }
  0xed   :  { %v3282_v60 = vpop.f32.mrb[6].mxu0  ;;  %v207_v61 = vpop.f32.mrb[7].mxu1  ;;  %v4124_v62 = vadd.f32 %v3010_v39, %v327_v57 }
  0xee   :  { %v342_v63 = vadd.f32 %v3282_v60, %v3262_v58  ;;  %v336_v0 = vpop.f32.mrb[7].mxu0 }
  0xef   :  { %v337_v1 = vadd.f32 %v336_v0, %v207_v61 }
  0xf0   :  { %v437_v3 = vpop.f32.mrb[8].mxu1  ;;  %v4126_v4 = vadd.f32 %v3010_v39, %v342_v63 }
  0xf1   :  { %v441_v5 = vadd.f32 %v437_v3, %v351_v2  ;;  %v3293_v6 = vpop.f32.mrb[9].mxu1  ;;  %v4128_v7 = vadd.f32 %v3010_v39, %v337_v1 }
  0xf3   :  { %v3011_v8 = vmul.f32 -1.442695, %v441_v5 }
  0xf5   :  { %3717 = vpow2.f32 %v3011_v8 }
  0xff   :  { %v3718_v9 = vpop.eup %3717 }
 0x100   :  { %v445_v10 = vadd.f32 1.0, %v3718_v9 }
 0x102   :  { %3719 = vrcp.f32 %v445_v10 }
 0x10c   :  { %v3720_v13 = vpop.eup %3719 }
 0x10d   :  { %v448_v14 = vmul.f32 2.0, %v3720_v13 }
 0x10f   :  { %v3012_v16 = vadd.f32 -1.0, %v448_v14 }
 0x111   :  { %v452_v18 = vsel %vm4130_vm4, %v3012_v16, %v3720_v13 }
 0x112   :  { %455 = vrot.lane.b32.xlu0 %v452_v18, %s3896_s6  ;;  %v453_v22 = vmul.f32 0.0, %v452_v18 }
 0x184   :  { %v456_v20 = vpop.permute.xlu0 %455 }
 0x185   :  { %v458_v21 = vmul.f32 %v456_v20, %v452_v18 }
 0x187   :  { %460 = vrot.lane.b32.xlu0 %v458_v21, %s3897_s28  ;;  %v4207_v21 = vld [vmem:[%s4768_s2 + $0x10] sm:$0xff] }
 0x188   :  { %vm710_vm7 = vcmp.gt.f32.partialorder %v4207_v21, 0.0 }
 0x1f9   :  { %v461_v23 = vpop.permute.xlu0 %460 }
 0x1fa   :  { %v463_v24 = vadd.f32 %v461_v23, %v453_v22 }
 0x1fc   :  { %3721 = vtanh.f32 %v463_v24  ;;  %478 = vrot.lane.b32.xlu0 %v463_v24, %s3898_s5 }
 0x206   :  { %v3722_v25 = vpop.eup %3721 }
 0x207   :  { %466 = vrot.lane.b32.xlu1 %v3722_v25, %s3896_s6 }
 0x26e   :  { %v479_v28 = vpop.permute.xlu0 %478 }
 0x26f   :  { %v481_v29 = vsel %vm471_vm5, %v479_v28, 0.0 }
 0x270   :  { %569 = vrot.lane.b32.xlu0 %v481_v29, %s3897_s28 }
 0x279   :  { %v467_v30 = vpop.permute.xlu1 %466 }
 0x27a   :  { %v469_v31 = vmul.f32 %v467_v30, %v452_v18 }
 0x27c   :  { %473 = vrot.lane.b32.xlu1 %v469_v31, %s3897_s28 }
 0x2e2   :  { %v570_v48 = vpop.permute.xlu0 %569 }
 0x2ee   :  { %v474_v32 = vpop.permute.xlu1 %473 }
 0x2ef   :  { %v476_v33 = vsel %vm471_vm5, %v474_v32, 0.0 }
 0x2f0   :  { %482 = vst.msk [vmem:[%s4780_s14] sm:$0xff] %vm86_vm0, %v476_v33  ;;  %483 = vst.msk [vmem:[#allocation3 + $0x38] sm:$0xff] %vm86_vm0, %v476_v33  ;;  %3303 = vmatmul.mubr.msk.f32.vlgmr.msra.gmra.mrb[10].mxu1 %vm86_vm0, %v476_v33 }
 0x2f1   :  { %3569 = vmatpush3.bf16.msra.mxu1 %v4029_v17  ;;  %3313 = vmatprep.mubr.msk.f32.mxu1 %vm3894_vm1, %v3895_v35 }
 0x2f2   :  { %3570 = vmatprep.subr.bf16.mxu1 %v3893_v19 }
 0x2f5   :  { %3572 = vmatpush3.bf16.msra.mxu1 %v4062_v27 }
 0x2f6   :  { %3573 = vmatprep.subr.bf16.mxu1 %v3893_v19 }
 0x3c3   :  { %v554_v34 = vpop.f32.mrb[10].mxu1 }
 0x3c4   :  { %v558_v36 = vadd.f32 %v554_v34, %v4116_v44  ;;  %v3304_v37 = vpop.f32.mrb[11].mxu1 }
 0x3c6   :  { %v3014_v38 = vmul.f32 -1.442695, %v558_v36 }
 0x3c8   :  { %3723 = vpow2.f32 %v3014_v38 }
 0x3d2   :  { %v3724_v39 = vpop.eup %3723 }
 0x3d3   :  { %v562_v40 = vadd.f32 1.0, %v3724_v39 }
 0x3d5   :  { %3725 = vrcp.f32 %v562_v40 }
 0x3df   :  { %v3726_v41 = vpop.eup %3725 }
 0x3e0   :  { %v565_v42 = vmul.f32 2.0, %v3726_v41 }
 0x3e2   :  { %v3015_v43 = vadd.f32 -1.0, %v565_v42 }
 0x3e4   :  { %v567_v45 = vsel %vm4130_vm4, %v3015_v43, %v3726_v41 }
 0x3e5   :  { %574 = vrot.lane.b32.xlu1 %v567_v45, %s3896_s6  ;;  %v572_v44 = vmul.f32 %v570_v48, %v567_v45 }
 0x457   :  { %v575_v46 = vpop.permute.xlu1 %574 }
 0x458   :  { %v577_v47 = vmul.f32 %v575_v46, %v567_v45 }
 0x45a   :  { %579 = vrot.lane.b32.xlu1 %v577_v47, %s3897_s28 }
 0x4cc   :  { %v580_v49 = vpop.permute.xlu1 %579 }
 0x4cd   :  { %v582_v50 = vadd.f32 %v580_v49, %v572_v44  ;;  %v4240_v44 = vld [vmem:[%s4768_s2 + $0x18] sm:$0xff] }
 0x4ce   :  { %vm830_vm8 = vcmp.gt.f32.partialorder %v4240_v44, 0.0 }
 0x4cf   :  { %3727 = vtanh.f32 %v582_v50 }
 0x4d9   :  { %v3728_v52 = vpop.eup %3727 }
 0x4da   :  { %585 = vrot.lane.b32.xlu0 %v3728_v52, %s3896_s6 }
 0x4de   :  { %597 = vrot.lane.b32.xlu0 %v582_v50, %s3898_s5 }
 0x54c   :  { %v586_v55 = vpop.permute.xlu0 %585 }
 0x54d   :  { %v588_v56 = vmul.f32 %v586_v55, %v567_v45 }
 0x54f   :  { %592 = vrot.lane.b32.xlu1 %v588_v56, %s3897_s28 }
 0x550   :  { %v598_v57 = vpop.permute.xlu0 %597 }
 0x551   :  { %v600_v58 = vsel %vm590_vm6, %v598_v57, %v481_v29 }
 0x552   :  { %689 = vrot.lane.b32.xlu0 %v600_v58, %s3897_s28 }
 0x5c1   :  { %v593_v60 = vpop.permute.xlu1 %592 }
 0x5c2   :  { %v595_v61 = vsel %vm590_vm6, %v593_v60, %v476_v33  ;;  %v601_v63 = vsel %vm590_vm6, %v593_v60, 0.0 }
 0x5c3   :  { %602 = vst.msk [vmem:[%s4780_s14 + $0x8] sm:$0xff] %vm86_vm0, %v601_v63  ;;  %603 = vst.msk [vmem:[#allocation3 + $0x30] sm:$0xff] %vm86_vm0, %v601_v63  ;;  %3314 = vmatmul.mubr.msk.f32.vlgmr.msra.gmra.mrb[12].mxu1 %vm86_vm0, %v595_v61 }
 0x5c4   :  { %3575 = vmatpush3.bf16.msra.mxu1 %v4029_v17  ;;  %3324 = vmatprep.mubr.msk.f32.mxu1 %vm3894_vm1, %v3895_v35  ;;  %v690_v14 = vpop.permute.xlu0 %689 }
 0x5c5   :  { %3576 = vmatprep.subr.bf16.mxu1 %v3893_v19 }
 0x5c8   :  { %3578 = vmatpush3.bf16.msra.mxu1 %v4062_v27 }
 0x5c9   :  { %3585 = vmatprep.subr.bf16.mxu1 %v3893_v19 }
 0x696   :  { %v674_v0 = vpop.f32.mrb[12].mxu1 }
 0x697   :  { %v678_v1 = vadd.f32 %v674_v0, %v4120_v54  ;;  %v3315_v2 = vpop.f32.mrb[13].mxu1 }
 0x699   :  { %v3017_v3 = vmul.f32 -1.442695, %v678_v1 }
 0x69b   :  { %3729 = vpow2.f32 %v3017_v3 }
 0x6a5   :  { %v3730_v5 = vpop.eup %3729 }
 0x6a6   :  { %v682_v6 = vadd.f32 1.0, %v3730_v5 }
 0x6a8   :  { %3731 = vrcp.f32 %v682_v6 }
 0x6b2   :  { %v3732_v8 = vpop.eup %3731 }
 0x6b3   :  { %v685_v9 = vmul.f32 2.0, %v3732_v8 }
 0x6b5   :  { %v3018_v10 = vadd.f32 -1.0, %v685_v9 }
 0x6b7   :  { %v687_v11 = vsel %vm4130_vm4, %v3018_v10, %v3732_v8 }
 0x6b8   :  { %694 = vrot.lane.b32.xlu1 %v687_v11, %s3896_s6  ;;  %v692_v54 = vmul.f32 %v690_v14, %v687_v11 }
 0x72a   :  { %v695_v12 = vpop.permute.xlu1 %694 }
 0x72b   :  { %v697_v13 = vmul.f32 %v695_v12, %v687_v11 }
 0x72d   :  { %699 = vrot.lane.b32.xlu1 %v697_v13, %s3897_s28 }
 0x79f   :  { %v700_v16 = vpop.permute.xlu1 %699 }
 0x7a0   :  { %v702_v18 = vadd.f32 %v700_v16, %v692_v54  ;;  %v4272_v54 = vld [vmem:[%s4768_s2 + $0x20] sm:$0xff] }
 0x7a1   :  { %vm950_vm9 = vcmp.gt.f32.partialorder %v4272_v54, 0.0 }
 0x7a2   :  { %3733 = vtanh.f32 %v702_v18 }
 0x7ac   :  { %v3734_v20 = vpop.eup %3733 }
 0x7ad   :  { %705 = vrot.lane.b32.xlu0 %v3734_v20, %s3896_s6 }
 0x7b1   :  { %717 = vrot.lane.b32.xlu0 %v702_v18, %s3898_s5 }
 0x81f   :  { %v706_v22 = vpop.permute.xlu0 %705 }
 0x820   :  { %v708_v23 = vmul.f32 %v706_v22, %v687_v11 }
 0x822   :  { %712 = vrot.lane.b32.xlu1 %v708_v23, %s3897_s28 }
 0x823   :  { %v718_v24 = vpop.permute.xlu0 %717 }
 0x824   :  { %v720_v25 = vsel %vm710_vm7, %v718_v24, %v600_v58 }
 0x825   :  { %809 = vrot.lane.b32.xlu0 %v720_v25, %s3897_s28 }
 0x894   :  { %v713_v28 = vpop.permute.xlu1 %712 }
 0x895   :  { %v715_v29 = vsel %vm710_vm7, %v713_v28, %v595_v61  ;;  %v721_v30 = vsel %vm710_vm7, %v713_v28, 0.0 }
 0x896   :  { %722 = vst.msk [vmem:[%s4780_s14 + $0x10] sm:$0xff] %vm86_vm0, %v721_v30  ;;  %723 = vst.msk [vmem:[#allocation3 + $0x28] sm:$0xff] %vm86_vm0, %v721_v30  ;;  %3325 = vmatmul.mubr.msk.f32.vlgmr.msra.gmra.mrb[14].mxu1 %vm86_vm0, %v715_v29 }
 0x897   :  { %3587 = vmatpush3.bf16.msra.mxu1 %v4029_v17  ;;  %3346 = vmatprep.mubr.msk.f32.mxu1 %vm3894_vm1, %v3895_v35  ;;  %v810_v45 = vpop.permute.xlu0 %809 }
 0x898   :  { %3588 = vmatprep.subr.bf16.mxu1 %v3893_v19 }
 0x89b   :  { %3590 = vmatpush3.bf16.msra.mxu1 %v4062_v27 }
 0x89c   :  { %3597 = vmatprep.subr.bf16.mxu1 %v3893_v19 }
 0x969   :  { %v794_v31 = vpop.f32.mrb[14].mxu1 }
 0x96a   :  { %v798_v32 = vadd.f32 %v794_v31, %v4118_v51  ;;  %v3326_v33 = vpop.f32.mrb[15].mxu1 }
 0x96c   :  { %v3020_v34 = vmul.f32 -1.442695, %v798_v32 }
 0x96e   :  { %3735 = vpow2.f32 %v3020_v34 }
 0x978   :  { %v3736_v36 = vpop.eup %3735 }
 0x979   :  { %v802_v37 = vadd.f32 1.0, %v3736_v36 }
 0x97b   :  { %3737 = vrcp.f32 %v802_v37 }
 0x985   :  { %v3738_v38 = vpop.eup %3737 }
 0x986   :  { %v805_v39 = vmul.f32 2.0, %v3738_v38 }
 0x988   :  { %v3021_v40 = vadd.f32 -1.0, %v805_v39 }
 0x98a   :  { %v807_v41 = vsel %vm4130_vm4, %v3021_v40, %v3738_v38 }
 0x98b   :  { %814 = vrot.lane.b32.xlu1 %v807_v41, %s3896_s6  ;;  %v812_v51 = vmul.f32 %v810_v45, %v807_v41 }
 0x9fd   :  { %v815_v42 = vpop.permute.xlu1 %814 }
 0x9fe   :  { %v817_v43 = vmul.f32 %v815_v42, %v807_v41 }
 0xa00   :  { %819 = vrot.lane.b32.xlu1 %v817_v43, %s3897_s28  ;;  %v4305_v43 = vld [vmem:[%s4768_s2 + $0x28] sm:$0xff] }
 0xa01   :  { %vm1070_vm10 = vcmp.gt.f32.partialorder %v4305_v43, 0.0 }
 0xa72   :  { %v820_v46 = vpop.permute.xlu1 %819 }
 0xa73   :  { %v822_v47 = vadd.f32 %v820_v46, %v812_v51 }
 0xa75   :  { %3739 = vtanh.f32 %v822_v47 }
 0xa7f   :  { %v3740_v48 = vpop.eup %3739 }
 0xa80   :  { %825 = vrot.lane.b32.xlu0 %v3740_v48, %s3896_s6 }
 0xa84   :  { %837 = vrot.lane.b32.xlu0 %v822_v47, %s3898_s5 }
 0xaf2   :  { %v826_v49 = vpop.permute.xlu0 %825 }
 0xaf3   :  { %v828_v50 = vmul.f32 %v826_v49, %v807_v41 }
 0xaf5   :  { %832 = vrot.lane.b32.xlu1 %v828_v50, %s3897_s28 }
 0xaf6   :  { %v838_v52 = vpop.permute.xlu0 %837 }
 0xaf7   :  { %v840_v55 = vsel %vm830_vm8, %v838_v52, %v720_v25 }
 0xaf8   :  { %929 = vrot.lane.b32.xlu0 %v840_v55, %s3897_s28 }
 0xb67   :  { %v833_v56 = vpop.permute.xlu1 %832 }
 0xb68   :  { %v835_v57 = vsel %vm830_vm8, %v833_v56, %v715_v29  ;;  %v841_v58 = vsel %vm830_vm8, %v833_v56, 0.0 }
 0xb69   :  { %842 = vst.msk [vmem:[%s4780_s14 + $0x18] sm:$0xff] %vm86_vm0, %v841_v58  ;;  %843 = vst.msk [vmem:[#allocation3 + $0x20] sm:$0xff] %vm86_vm0, %v841_v58  ;;  %3336 = vmatmul.mubr.msk.f32.vlgmr.msra.gmra.mrb[8].mxu0 %vm86_vm0, %v835_v57 }
 0xb6a   :  { %3593 = vmatpush3.bf16.msra.mxu0 %v4029_v17  ;;  %3357 = vmatprep.mubr.msk.f32.mxu0 %vm3894_vm1, %v3895_v35  ;;  %v930_v11 = vpop.permute.xlu0 %929 }
 0xb6b   :  { %3594 = vmatprep.subr.bf16.mxu0 %v3893_v19 }
 0xb6e   :  { %3596 = vmatpush3.bf16.msra.mxu0 %v4062_v27 }
 0xc3c   :  { %v914_v60 = vpop.f32.mrb[8].mxu0 }
 0xc3d   :  { %v918_v61 = vadd.f32 %v914_v60, %v4124_v62  ;;  %v3337_v63 = vpop.f32.mrb[9].mxu0 }
 0xc3f   :  { %v3023_v0 = vmul.f32 -1.442695, %v918_v61 }
 0xc41   :  { %3741 = vpow2.f32 %v3023_v0 }
 0xc4b   :  { %v3742_v1 = vpop.eup %3741 }
 0xc4c   :  { %v922_v2 = vadd.f32 1.0, %v3742_v1 }
 0xc4e   :  { %3743 = vrcp.f32 %v922_v2 }
 0xc58   :  { %v3744_v3 = vpop.eup %3743 }
 0xc59   :  { %v925_v5 = vmul.f32 2.0, %v3744_v3 }
 0xc5b   :  { %v3024_v6 = vadd.f32 -1.0, %v925_v5 }
 0xc5d   :  { %v927_v8 = vsel %vm4130_vm4, %v3024_v6, %v3744_v3 }
 0xc5e   :  { %934 = vrot.lane.b32.xlu1 %v927_v8, %s3896_s6  ;;  %v932_v62 = vmul.f32 %v930_v11, %v927_v8 }
 0xcd0   :  { %v935_v9 = vpop.permute.xlu1 %934 }
 0xcd1   :  { %v937_v10 = vmul.f32 %v935_v9, %v927_v8 }
 0xcd3   :  { %939 = vrot.lane.b32.xlu1 %v937_v10, %s3897_s28  ;;  %v4332_v10 = vld [vmem:[%s4768_s2 + $0x30] sm:$0xff] }
 0xcd4   :  { %vm1190_vm11 = vcmp.gt.f32.partialorder %v4332_v10, 0.0 }
 0xd45   :  { %v940_v12 = vpop.permute.xlu1 %939 }
 0xd46   :  { %v942_v13 = vadd.f32 %v940_v12, %v932_v62 }
 0xd48   :  { %3745 = vtanh.f32 %v942_v13 }
 0xd52   :  { %v3746_v14 = vpop.eup %3745 }
 0xd53   :  { %945 = vrot.lane.b32.xlu0 %v3746_v14, %s3896_s6 }
 0xd57   :  { %957 = vrot.lane.b32.xlu0 %v942_v13, %s3898_s5 }
 0xdc5   :  { %v946_v16 = vpop.permute.xlu0 %945 }
 0xdc6   :  { %v948_v18 = vmul.f32 %v946_v16, %v927_v8 }
 0xdc8   :  { %952 = vrot.lane.b32.xlu1 %v948_v18, %s3897_s28 }
 0xdc9   :  { %v958_v20 = vpop.permute.xlu0 %957 }
 0xdca   :  { %v960_v22 = vsel %vm950_vm9, %v958_v20, %v840_v55 }
 0xdcb   :  { %1049 = vrot.lane.b32.xlu0 %v960_v22, %s3897_s28 }
 0xe3a   :  { %v953_v23 = vpop.permute.xlu1 %952 }
 0xe3b   :  { %v955_v24 = vsel %vm950_vm9, %v953_v23, %v835_v57  ;;  %v961_v25 = vsel %vm950_vm9, %v953_v23, 0.0 }
 0xe3c   :  { %962 = vst.msk [vmem:[%s4780_s14 + $0x20] sm:$0xff] %vm86_vm0, %v961_v25  ;;  %963 = vst.msk [vmem:[#allocation3 + $0x18] sm:$0xff] %vm86_vm0, %v961_v25  ;;  %3347 = vmatmul.mubr.msk.f32.vlgmr.msra.gmra.mrb[16].mxu1 %vm86_vm0, %v955_v24 }
 0xe3d   :  { %3599 = vmatpush3.bf16.msra.mxu1 %v4029_v17  ;;  %3368 = vmatprep.mubr.msk.f32.mxu1 %vm3894_vm1, %v3895_v35  ;;  %v1050_v39 = vpop.permute.xlu0 %1049 }
 0xe3e   :  { %3600 = vmatprep.subr.bf16.mxu1 %v3893_v19 }
 0xe41   :  { %3602 = vmatpush3.bf16.msra.mxu1 %v4062_v27 }
 0xe42   :  { %3619 = vmatprep.subr.bf16.mxu1 %v3893_v19 }
 0xf0f   :  { %v1034_v28 = vpop.f32.mrb[16].mxu1 }
 0xf10   :  { %v1038_v29 = vadd.f32 %v1034_v28, %v4122_v59  ;;  %v3348_v30 = vpop.f32.mrb[17].mxu1 }
 0xf12   :  { %v3026_v31 = vmul.f32 -1.442695, %v1038_v29 }
 0xf14   :  { %3747 = vpow2.f32 %v3026_v31 }
 0xf1e   :  { %v3748_v32 = vpop.eup %3747 }
 0xf1f   :  { %v1042_v33 = vadd.f32 1.0, %v3748_v32 }
 0xf21   :  { %3749 = vrcp.f32 %v1042_v33 }
 0xf2b   :  { %v3750_v34 = vpop.eup %3749 }
 0xf2c   :  { %v1045_v17 = vmul.f32 2.0, %v3750_v34 }
 0xf2e   :  { %v3027_v36 = vadd.f32 -1.0, %v1045_v17 }
 0xf30   :  { %v1047_v37 = vsel %vm4130_vm4, %v3027_v36, %v3750_v34 }
 0xf31   :  { %1054 = vrot.lane.b32.xlu1 %v1047_v37, %s3896_s6  ;;  %v1052_v59 = vmul.f32 %v1050_v39, %v1047_v37  ;;  %v1323_v39 = vld [vmem:[%s4774_s8 + $0x8] sm:$0xff] }
 0xfa3   :  { %v1055_v27 = vpop.permute.xlu1 %1054 }
 0xfa4   :  { %v1057_v38 = vmul.f32 %v1055_v27, %v1047_v37 }
 0xfa6   :  { %1059 = vrot.lane.b32.xlu1 %v1057_v38, %s3897_s28  ;;  %v1322_v38 = vld [vmem:[%s4774_s8] sm:$0xff] }
0x1018   :  { %v1060_v40 = vpop.permute.xlu1 %1059 }
0x1019   :  { %v1062_v41 = vadd.f32 %v1060_v40, %v1052_v59  ;;  %v3603_v59 = vpack.c.bf16 %v1323_v39, %v1322_v38  ;;  %v1324_v40 = vld [vmem:[%s4774_s8 + $0x10] sm:$0xff] }
0x101b   :  { %3751 = vtanh.f32 %v1062_v41  ;;  %3604 = vmatprep.subr.bf16.mxu0 %v3603_v59 }
0x1025   :  { %v3752_v42 = vpop.eup %3751 }
0x1026   :  { %1065 = vrot.lane.b32.xlu0 %v3752_v42, %s3896_s6 }
0x102a   :  { %1077 = vrot.lane.b32.xlu0 %v1062_v41, %s3898_s5  ;;  %v1325_v41 = vld [vmem:[%s4774_s8 + $0x18] sm:$0xff] }
0x102b   :  { %v3607_v42 = vpack.c.bf16 %v1325_v41, %v1324_v40 }
0x1098   :  { %v1066_v45 = vpop.permute.xlu0 %1065 }
0x1099   :  { %v1068_v51 = vmul.f32 %v1066_v45, %v1047_v37 }
0x109b   :  { %1072 = vrot.lane.b32.xlu1 %v1068_v51, %s3897_s28  ;;  %v1318_v51 = vld [vmem:[%s4773_s7] sm:$0xff] }
0x109c   :  { %v1078_v46 = vpop.permute.xlu0 %1077 }
0x109d   :  { %v1080_v47 = vsel %vm1070_vm10, %v1078_v46, %v960_v22  ;;  %v1319_v46 = vld [vmem:[%s4773_s7 + $0x8] sm:$0xff] }
0x109e   :  { %1169 = vrot.lane.b32.xlu0 %v1080_v47, %s3897_s28 }
0x110d   :  { %v1073_v48 = vpop.permute.xlu1 %1072 }
0x110e   :  { %v1075_v49 = vsel %vm1070_vm10, %v1073_v48, %v955_v24  ;;  %v1081_v50 = vsel %vm1070_vm10, %v1073_v48, 0.0  ;;  %v3611_v48 = vpack.c.bf16 %v1319_v46, %v1318_v51 }
0x110f   :  { %1082 = vst.msk [vmem:[%s4780_s14 + $0x28] sm:$0xff] %vm86_vm0, %v1081_v50  ;;  %1083 = vst.msk [vmem:[#allocation3 + $0x10] sm:$0xff] %vm86_vm0, %v1081_v50  ;;  %3358 = vmatmul.mubr.msk.f32.vlgmr.msra.gmra.mrb[10].mxu0 %vm86_vm0, %v1075_v49  ;;  %v1327_v50 = vld [vmem:[%s4775_s9 + $0x8] sm:$0xff] }
0x1110   :  { %v1170_v5 = vpop.permute.xlu0 %1169  ;;  %3606 = vmatpush3.bf16.msra.mxu0 %v3603_v59 }
0x1111   :  { %3608 = vmatprep.subr.bf16.mxu0 %v3607_v42 }
0x1114   :  { %3610 = vmatpush3.bf16.msra.mxu0 %v3607_v42 }
0x1115   :  { %3612 = vmatprep.subr.bf16.mxu0 %v3611_v48 }
0x11e2   :  { %v1154_v52 = vpop.f32.mrb[10].mxu0 }
0x11e3   :  { %v1158_v55 = vadd.f32 %v1154_v52, %v4128_v7  ;;  %v3359_v56 = vpop.f32.mrb[11].mxu0 }
0x11e4   :  { %v1329_v56 = vld [vmem:[%s4775_s9 + $0x18] sm:$0xff] }
0x11e5   :  { %v3029_v57 = vmul.f32 -1.442695, %v1158_v55  ;;  %v1328_v55 = vld [vmem:[%s4775_s9 + $0x10] sm:$0xff] }
0x11e7   :  { %3753 = vpow2.f32 %v3029_v57  ;;  %v4392_v57 = vpack.c.bf16 %v1329_v56, %v1328_v55 }
0x11f1   :  { %v3754_v58 = vpop.eup %3753 }
0x11f2   :  { %v1162_v60 = vadd.f32 1.0, %v3754_v58  ;;  %v4406_v58 = vld [vmem:[%s4768_s2 + $0x38] sm:$0xff] }
0x11f3   :  { %vm1310_vm12 = vcmp.gt.f32.partialorder %v4406_v58, 0.0 }
0x11f4   :  { %3755 = vrcp.f32 %v1162_v60 }
0x11fe   :  { %v3756_v61 = vpop.eup %3755 }
0x11ff   :  { %v1165_v63 = vmul.f32 2.0, %v3756_v61 }
0x1201   :  { %v3030_v0 = vadd.f32 -1.0, %v1165_v63  ;;  %v1320_v63 = vld [vmem:[%s4773_s7 + $0x10] sm:$0xff] }
0x1203   :  { %v1167_v1 = vsel %vm4130_vm4, %v3030_v0, %v3756_v61  ;;  %v1321_v0 = vld [vmem:[%s4773_s7 + $0x18] sm:$0xff] }
0x1204   :  { %1174 = vrot.lane.b32.xlu1 %v1167_v1, %s3896_s6  ;;  %v1172_v7 = vmul.f32 %v1170_v5, %v1167_v1  ;;  %v1341_v5 = vld [vmem:[#allocation3 + $0x10] sm:$0xff] }
0x1276   :  { %v1175_v2 = vpop.permute.xlu1 %1174 }
0x1277   :  { %v1177_v3 = vmul.f32 %v1175_v2, %v1167_v1  ;;  %v3615_v2 = vpack.c.bf16 %v1321_v0, %v1320_v63 }
0x1279   :  { %1179 = vrot.lane.b32.xlu1 %v1177_v3, %s3897_s28 }
0x12eb   :  { %v1180_v6 = vpop.permute.xlu1 %1179 }
0x12ec   :  { %v1182_v8 = vadd.f32 %v1180_v6, %v1172_v7  ;;  %v1342_v7 = vld [vmem:[#allocation3 + $0x18] sm:$0xff]  ;;  %v1343_v6 = vld [vmem:[#allocation3 + $0x20] sm:$0xff] }
0x12ee   :  { %3757 = vtanh.f32 %v1182_v8 }
0x12f8   :  { %v3758_v9 = vpop.eup %3757 }
0x12f9   :  { %1185 = vrot.lane.b32.xlu0 %v3758_v9, %s3896_s6  ;;  %v1345_v9 = vld [vmem:[#allocation3 + $0x30] sm:$0xff] }
0x12fd   :  { %1197 = vrot.lane.b32.xlu0 %v1182_v8, %s3898_s5  ;;  %v1344_v8 = vld [vmem:[#allocation3 + $0x28] sm:$0xff] }
0x136b   :  { %v1186_v11 = vpop.permute.xlu0 %1185 }
0x136c   :  { %v1188_v62 = vmul.f32 %v1186_v11, %v1167_v1  ;;  %v1346_v11 = vld [vmem:[#allocation3 + $0x38] sm:$0xff] }
0x136e   :  { %1192 = vrot.lane.b32.xlu1 %v1188_v62, %s3897_s28  ;;  %v1331_v62 = vld [vmem:[%s4780_s14] sm:$0xff] }
0x136f   :  { %v1198_v12 = vpop.permute.xlu0 %1197 }
0x1370   :  { %v1200_v13 = vsel %vm1190_vm11, %v1198_v12, %v1080_v47  ;;  %v1332_v12 = vld [vmem:[%s4780_s14 + $0x8] sm:$0xff] }
0x1371   :  { %1289 = vrot.lane.b32.xlu0 %v1200_v13, %s3897_s28  ;;  %v1333_v13 = vld [vmem:[%s4780_s14 + $0x10] sm:$0xff] }
0x13e0   :  { %v1193_v14 = vpop.permute.xlu1 %1192 }
0x13e1   :  { %v1195_v16 = vsel %vm1190_vm11, %v1193_v14, %v1075_v49  ;;  %v1201_v18 = vsel %vm1190_vm11, %v1193_v14, 0.0  ;;  %v1326_v49 = vld [vmem:[%s4775_s9] sm:$0xff]  ;;  %v1334_v14 = vld [vmem:[%s4780_s14 + $0x18] sm:$0xff] }
0x13e2   :  { %1202 = vst.msk [vmem:[%s4780_s14 + $0x30] sm:$0xff] %vm86_vm0, %v1201_v18  ;;  %1203 = vst.msk [vmem:[#allocation3 + $0x8] sm:$0xff] %vm86_vm0, %v1201_v18  ;;  %3369 = vmatmul.mubr.msk.f32.vlgmr.msra.gmra.mrb[18].mxu1 %vm86_vm0, %v1195_v16  ;;  %v4382_v52 = vpack.c.bf16 %v1327_v50, %v1326_v49  ;;  %v1335_v16 = vld [vmem:[%s4780_s14 + $0x20] sm:$0xff]  ;;  %v1336_v18 = vld [vmem:[%s4780_s14 + $0x28] sm:$0xff] }
0x13e3   :  { %3419 = vmatprep.mubr.msk.f32.mxu1 %vm3894_vm1, %v3895_v35  ;;  %v1290_v17 = vpop.permute.xlu0 %1289 }
0x13e4   :  { %3621 = vmatpush3.bf16.msra.mxu1 %v4382_v52 }
0x13e5   :  { %3622 = vmatprep.subr.bf16.mxu1 %v3893_v19 }
0x13e8   :  { %3624 = vmatpush3.bf16.msra.mxu1 %v4392_v57 }
0x13e9   :  { %3625 = vmatprep.subr.bf16.mxu1 %v3893_v19  ;;  %v1340_v3 = vld [vmem:[#allocation3 + $0x8] sm:$0xff] }
0x13eb   :  { %3420 = vmatmul.mubr.f32.vlgmr.msra.gmra.mrb[20].mxu1 %v3895_v35 }
0x13ec   :  { %3627 = vmatpush3.bf16.msra.mxu1 %v4382_v52  ;;  %3430 = vmatprep.mubr.msk.f32.mxu1 %vm3894_vm1, %v3895_v35 }
0x13ed   :  { %3628 = vmatprep.subr.bf16.mxu1 %v3893_v19 }
0x13f0   :  { %3630 = vmatpush3.bf16.msra.mxu1 %v4392_v57 }
0x13f1   :  { %3631 = vmatprep.subr.bf16.mxu1 %v3893_v19 }
0x14b5   :  { %v1274_v20 = vpop.f32.mrb[18].mxu1 }
0x14b6   :  { %v1278_v22 = vadd.f32 %v1274_v20, %v4126_v4  ;;  %v3370_v23 = vpop.f32.mrb[19].mxu1  ;;  %v1337_v20 = vld [vmem:[%s4780_s14 + $0x30] sm:$0xff] }
0x14b8   :  { %v3032_v24 = vmul.f32 -1.442695, %v1278_v22 }
0x14ba   :  { %3759 = vpow2.f32 %v3032_v24 }
0x14be   :  { %v1694_v23 = vpop.f32.mrb[20].mxu1 }
0x14bf   :  { %v3421_v24 = vpop.f32.mrb[21].mxu1 }
0x14c4   :  { %v3760_v25 = vpop.eup %3759 }
0x14c5   :  { %v1282_v28 = vadd.f32 1.0, %v3760_v25  ;;  %v3050_v25 = vld [vmem:[%s4776_s10] ss:$0 sm:$0xff] }
0x14c7   :  { %3761 = vrcp.f32 %v1282_v28 }
0x14d1   :  { %v3762_v29 = vpop.eup %3761 }
0x14d2   :  { %v1285_v30 = vmul.f32 2.0, %v3762_v29 }
0x14d4   :  { %v3033_v31 = vadd.f32 -1.0, %v1285_v30 }
0x14d6   :  { %v1287_v32 = vsel %vm4130_vm4, %v3033_v31, %v3762_v29 }
0x14d7   :  { %1294 = vrot.lane.b32.xlu1 %v1287_v32, %s3896_s6  ;;  %v1292_v4 = vmul.f32 %v1290_v17, %v1287_v32 }
0x1549   :  { %v1295_v33 = vpop.permute.xlu1 %1294 }
0x154a   :  { %v1297_v34 = vmul.f32 %v1295_v33, %v1287_v32 }
0x154c   :  { %1299 = vrot.lane.b32.xlu1 %v1297_v34, %s3897_s28 }
0x15be   :  { %v1300_v36 = vpop.permute.xlu1 %1299 }
0x15bf   :  { %v1302_v37 = vadd.f32 %v1300_v36, %v1292_v4 }
0x15c1   :  { %3763 = vtanh.f32 %v1302_v37 }
0x15cb   :  { %v3764_v27 = vpop.eup %3763 }
0x15cc   :  { %1305 = vrot.lane.b32.xlu0 %v3764_v27, %s3896_s6 }
0x163e   :  { %v1306_v45 = vpop.permute.xlu0 %1305 }
0x163f   :  { %v1308_v47 = vmul.f32 %v1306_v45, %v1287_v32 }
0x1641   :  { %1312 = vrot.lane.b32.xlu1 %v1308_v47, %s3897_s28 }
0x16b3   :  { %v1313_v60 = vpop.permute.xlu1 %1312 }
0x16b4   :  { %v1315_v61 = vsel %vm1310_vm12, %v1313_v60, 0.0 }
0x16b5   :  { %1316 = vst.msk [vmem:[%s4780_s14 + $0x38] sm:$0xff] %vm86_vm0, %v1315_v61  ;;  %1317 = vst.msk [vmem:[#allocation3] sm:$0xff] %vm86_vm0, %v1315_v61 }
0x16bc   :  { %v1339_v1 = vld [vmem:[#allocation3] sm:$0xff]  ;;  %v1338_v22 = vld [vmem:[%s4780_s14 + $0x38] sm:$0xff] }
0x16bd   :  { %3379 = vmatprep.mubr.msk.f32.mxu0 %vm86_vm0, %v1339_v1 }
0x16be   :  { %3380 = vmatmul.mubr.msk.f32.vlgmr.msra.gmra.mrb[12].mxu0 %vm86_vm0, %v1340_v3 }
0x16bf   :  { %3382 = vmatprep.mubr.msk.f32.mxu0 %vm86_vm0, %v1341_v5  ;;  %3614 = vmatpush3.bf16.msra.mxu0 %v3611_v48 }
0x16c0   :  { %3616 = vmatprep.subr.bf16.mxu0 %v3615_v2 }
0x16c2   :  { %3383 = vmatmul.mubr.msk.f32.gmra.mrb[14].mxu0 %vm86_vm0, %v1342_v7 }
0x16c3   :  { %3385 = vmatprep.mubr.msk.f32.mxu0 %vm86_vm0, %v1343_v6  ;;  %3618 = vmatpush3.bf16.msra.mxu0 %v3615_v2 }
0x16c4   :  { %3643 = vmatprep.subr.bf16.mxu0 %v3893_v19 }
0x16c6   :  { %3386 = vmatmul.mubr.msk.f32.gmra.mrb[16].mxu0 %vm86_vm0, %v1344_v8 }
0x16c7   :  { %3388 = vmatprep.mubr.msk.f32.mxu0 %vm86_vm0, %v1345_v9 }
0x16ca   :  { %3389 = vmatmul.mubr.msk.f32.gmra.mrb[18].mxu0 %vm86_vm0, %v1346_v11 }
0x16cb   :  { %3399 = vmatprep.mubr.msk.f32.mxu0 %vm86_vm0, %v1331_v62 }
0x16ce   :  { %3400 = vmatmul.mubr.msk.f32.vlgmr.msra.gmra.mrb[12].mxu0 %vm86_vm0, %v1332_v12 }
0x16cf   :  { %3402 = vmatprep.mubr.msk.f32.mxu0 %vm86_vm0, %v1333_v13  ;;  %3645 = vmatpush3.bf16.msra.mxu0 %v4382_v52 }
0x16d0   :  { %3646 = vmatprep.subr.bf16.mxu0 %v3893_v19 }
0x16d2   :  { %3403 = vmatmul.mubr.msk.f32.gmra.mrb[14].mxu0 %vm86_vm0, %v1334_v14 }
0x16d3   :  { %3405 = vmatprep.mubr.msk.f32.mxu0 %vm86_vm0, %v1335_v16  ;;  %3648 = vmatpush3.bf16.msra.mxu0 %v4392_v57 }
0x16d4   :  { %3655 = vmatprep.subr.bf16.mxu0 %v3893_v19 }
0x16d6   :  { %3406 = vmatmul.mubr.msk.f32.gmra.mrb[16].mxu0 %vm86_vm0, %v1336_v18 }
0x16d7   :  { %3408 = vmatprep.mubr.msk.f32.mxu0 %vm86_vm0, %v1337_v20 }
0x16da   :  { %3409 = vmatmul.mubr.msk.f32.gmra.mrb[18].mxu0 %vm86_vm0, %v1338_v22 }
0x16db   :  { %3463 = vmatprep.mubr.msk.f32.mxu0 %vm3894_vm1, %v3895_v35 }
0x17a1   :  { %v3401_v28 = vpop.f32.mrb[12].mxu0 }
0x17a2   :  { %v1612_v29 = vadd.f32 %v3401_v28, %v3050_v25  ;;  %v1566_v30 = vpop.f32.mrb[13].mxu0 }
0x17a3   :  { %v1611_v31 = vadd.f32 %v3050_v25, %v1566_v30 }
0x17a5   :  { %v1698_v32 = vadd.f32 %v1694_v23, %v1611_v31  ;;  %v3404_v33 = vpop.f32.mrb[14].mxu0 }
0x17a6   :  { %v4472_v34 = vadd.f32 %v3404_v33, %v3050_v25  ;;  %v1576_v17 = vpop.f32.mrb[15].mxu0 }
0x17a7   :  { %v3051_v4 = vmul.f32 -1.442695, %v1698_v32  ;;  %v4474_v36 = vadd.f32 %v3050_v25, %v1576_v17 }
0x17a9   :  { %3765 = vpow2.f32 %v3051_v4  ;;  %v3407_v37 = vpop.f32.mrb[16].mxu0 }
0x17aa   :  { %v4476_v27 = vadd.f32 %v3407_v37, %v3050_v25  ;;  %v1586_v38 = vpop.f32.mrb[17].mxu0 }
0x17ab   :  { %v4478_v39 = vadd.f32 %v3050_v25, %v1586_v38 }
0x17ad   :  { %v3410_v59 = vpop.f32.mrb[18].mxu0 }
0x17ae   :  { %v4480_v40 = vadd.f32 %v3410_v59, %v3050_v25  ;;  %v1596_v41 = vpop.f32.mrb[19].mxu0 }
0x17af   :  { %v4482_v42 = vadd.f32 %v3050_v25, %v1596_v41 }
0x17b3   :  { %v3766_v45 = vpop.eup %3765 }
0x17b4   :  { %v1702_v51 = vadd.f32 1.0, %v3766_v45 }
0x17b6   :  { %3767 = vrcp.f32 %v1702_v51 }
0x17c0   :  { %v3768_v46 = vpop.eup %3767 }
0x17c1   :  { %v1705_v47 = vmul.f32 2.0, %v3768_v46 }
0x17c3   :  { %v3052_v48 = vadd.f32 -1.0, %v1705_v47 }
0x17c5   :  { %v1707_v49 = vsel %vm4130_vm4, %v3052_v48, %v3768_v46 }
0x17c6   :  { %1710 = vrot.lane.b32.xlu0 %v1707_v49, %s3896_s6  ;;  %v1708_v56 = vmul.f32 0.0, %v1707_v49 }
0x1838   :  { %v1711_v50 = vpop.permute.xlu0 %1710 }
0x1839   :  { %v1713_v55 = vmul.f32 %v1711_v50, %v1707_v49 }
0x183b   :  { %1715 = vrot.lane.b32.xlu1 %v1713_v55, %s3897_s28 }
0x18ad   :  { %v1716_v60 = vpop.permute.xlu1 %1715 }
0x18ae   :  { %v1718_v61 = vadd.f32 %v1716_v60, %v1708_v56 }
0x18b0   :  { %3769 = vtanh.f32 %v1718_v61 }
0x18ba   :  { %v3770_v63 = vpop.eup %3769 }
0x18bb   :  { %1721 = vrot.lane.b32.xlu0 %v3770_v63, %s3896_s6 }
0x18bf   :  { %1733 = vrot.lane.b32.xlu0 %v1718_v61, %s3898_s5 }
0x192d   :  { %v1722_v0 = vpop.permute.xlu0 %1721 }
0x192e   :  { %v1724_v1 = vmul.f32 %v1722_v0, %v1707_v49 }
0x1930   :  { %1728 = vrot.lane.b32.xlu1 %v1724_v1, %s3897_s28 }
0x1931   :  { %v1734_v2 = vpop.permute.xlu0 %1733 }
0x1932   :  { %v1736_v3 = vsel %vm471_vm5, %v1734_v2, 0.0 }
0x1933   :  { %1824 = vrot.lane.b32.xlu0 %v1736_v3, %s3897_s28 }
0x19a2   :  { %v1729_v5 = vpop.permute.xlu1 %1728 }
0x19a3   :  { %v1731_v7 = vsel %vm471_vm5, %v1729_v5, 0.0 }
0x19a4   :  { %1737 = vst.msk [vmem:[%s4780_s14] sm:$0xff] %vm86_vm0, %v1731_v7  ;;  %1738 = vst.msk [vmem:[#allocation3 + $0x38] sm:$0xff] %vm86_vm0, %v1731_v7  ;;  %3431 = vmatmul.mubr.msk.f32.vlgmr.msra.gmra.mrb[22].mxu1 %vm86_vm0, %v1731_v7 }
0x19a5   :  { %3633 = vmatpush3.bf16.msra.mxu1 %v4382_v52  ;;  %3441 = vmatprep.mubr.msk.f32.mxu1 %vm3894_vm1, %v3895_v35  ;;  %v1825_v22 = vpop.permute.xlu0 %1824 }
0x19a6   :  { %3634 = vmatprep.subr.bf16.mxu1 %v3893_v19 }
0x19a9   :  { %3636 = vmatpush3.bf16.msra.mxu1 %v4392_v57 }
0x19aa   :  { %3637 = vmatprep.subr.bf16.mxu1 %v3893_v19 }
0x1a77   :  { %v1809_v26 = vpop.f32.mrb[22].mxu1 }
0x1a78   :  { %v1813_v6 = vadd.f32 %v1809_v26, %v1612_v29  ;;  %v3432_v8 = vpop.f32.mrb[23].mxu1 }
0x1a7a   :  { %v3054_v9 = vmul.f32 -1.442695, %v1813_v6 }
0x1a7c   :  { %3771 = vpow2.f32 %v3054_v9 }
0x1a86   :  { %v3772_v11 = vpop.eup %3771 }
0x1a87   :  { %v1817_v62 = vadd.f32 1.0, %v3772_v11 }
0x1a89   :  { %3773 = vrcp.f32 %v1817_v62 }
0x1a93   :  { %v3774_v12 = vpop.eup %3773 }
0x1a94   :  { %v1820_v13 = vmul.f32 2.0, %v3774_v12 }
0x1a96   :  { %v3055_v14 = vadd.f32 -1.0, %v1820_v13 }
0x1a98   :  { %v1822_v16 = vsel %vm4130_vm4, %v3055_v14, %v3774_v12 }
0x1a99   :  { %1829 = vrot.lane.b32.xlu1 %v1822_v16, %s3896_s6  ;;  %v1827_v23 = vmul.f32 %v1825_v22, %v1822_v16 }
0x1b0b   :  { %v1830_v18 = vpop.permute.xlu1 %1829 }
0x1b0c   :  { %v1832_v20 = vmul.f32 %v1830_v18, %v1822_v16 }
0x1b0e   :  { %1834 = vrot.lane.b32.xlu1 %v1832_v20, %s3897_s28 }
0x1b80   :  { %v1835_v24 = vpop.permute.xlu1 %1834 }
0x1b81   :  { %v1837_v25 = vadd.f32 %v1835_v24, %v1827_v23 }
0x1b83   :  { %3775 = vtanh.f32 %v1837_v25 }
0x1b8d   :  { %v3776_v28 = vpop.eup %3775 }
0x1b8e   :  { %1840 = vrot.lane.b32.xlu0 %v3776_v28, %s3896_s6 }
0x1b92   :  { %1852 = vrot.lane.b32.xlu0 %v1837_v25, %s3898_s5 }
0x1c00   :  { %v1841_v29 = vpop.permute.xlu0 %1840 }
0x1c01   :  { %v1843_v30 = vmul.f32 %v1841_v29, %v1822_v16 }
0x1c03   :  { %1847 = vrot.lane.b32.xlu1 %v1843_v30, %s3897_s28 }
0x1c04   :  { %v1853_v31 = vpop.permute.xlu0 %1852 }
0x1c05   :  { %v1855_v32 = vsel %vm590_vm6, %v1853_v31, %v1736_v3 }
0x1c06   :  { %1944 = vrot.lane.b32.xlu0 %v1855_v32, %s3897_s28 }
0x1c75   :  { %v1848_v33 = vpop.permute.xlu1 %1847 }
0x1c76   :  { %v1850_v17 = vsel %vm590_vm6, %v1848_v33, %v1731_v7  ;;  %v1856_v4 = vsel %vm590_vm6, %v1848_v33, 0.0 }
0x1c77   :  { %1857 = vst.msk [vmem:[%s4780_s14 + $0x8] sm:$0xff] %vm86_vm0, %v1856_v4  ;;  %1858 = vst.msk [vmem:[#allocation3 + $0x30] sm:$0xff] %vm86_vm0, %v1856_v4  ;;  %3442 = vmatmul.mubr.msk.f32.vlgmr.msra.gmra.mrb[24].mxu1 %vm86_vm0, %v1850_v17 }
0x1c78   :  { %3639 = vmatpush3.bf16.msra.mxu1 %v4382_v52  ;;  %3452 = vmatprep.mubr.msk.f32.mxu1 %vm3894_vm1, %v3895_v35  ;;  %v1945_v55 = vpop.permute.xlu0 %1944 }
0x1c79   :  { %3640 = vmatprep.subr.bf16.mxu1 %v3893_v19 }
0x1c7c   :  { %3642 = vmatpush3.bf16.msra.mxu1 %v4392_v57 }
0x1c7d   :  { %3649 = vmatprep.subr.bf16.mxu1 %v3893_v19 }
0x1d4a   :  { %v1929_v53 = vpop.f32.mrb[24].mxu1 }
0x1d4b   :  { %v1933_v37 = vadd.f32 %v1929_v53, %v4474_v36  ;;  %v3443_v38 = vpop.f32.mrb[25].mxu1 }
0x1d4d   :  { %v3057_v59 = vmul.f32 -1.442695, %v1933_v37 }
0x1d4f   :  { %3777 = vpow2.f32 %v3057_v59 }
0x1d59   :  { %v3778_v41 = vpop.eup %3777 }
0x1d5a   :  { %v1937_v45 = vadd.f32 1.0, %v3778_v41 }
0x1d5c   :  { %3779 = vrcp.f32 %v1937_v45 }
0x1d66   :  { %v3780_v51 = vpop.eup %3779 }
0x1d67   :  { %v1940_v46 = vmul.f32 2.0, %v3780_v51 }
0x1d69   :  { %v3058_v47 = vadd.f32 -1.0, %v1940_v46 }
0x1d6b   :  { %v1942_v48 = vsel %vm4130_vm4, %v3058_v47, %v3780_v51 }
0x1d6c   :  { %1949 = vrot.lane.b32.xlu1 %v1942_v48, %s3896_s6  ;;  %v1947_v36 = vmul.f32 %v1945_v55, %v1942_v48 }
0x1dde   :  { %v1950_v49 = vpop.permute.xlu1 %1949 }
0x1ddf   :  { %v1952_v50 = vmul.f32 %v1950_v49, %v1942_v48 }
0x1de1   :  { %1954 = vrot.lane.b32.xlu1 %v1952_v50, %s3897_s28 }
0x1e53   :  { %v1955_v56 = vpop.permute.xlu1 %1954 }
0x1e54   :  { %v1957_v60 = vadd.f32 %v1955_v56, %v1947_v36 }
0x1e56   :  { %3781 = vtanh.f32 %v1957_v60 }
0x1e60   :  { %v3782_v61 = vpop.eup %3781 }
0x1e61   :  { %1960 = vrot.lane.b32.xlu0 %v3782_v61, %s3896_s6 }
0x1e65   :  { %1972 = vrot.lane.b32.xlu0 %v1957_v60, %s3898_s5 }
0x1ed3   :  { %v1961_v63 = vpop.permute.xlu0 %1960 }
0x1ed4   :  { %v1963_v0 = vmul.f32 %v1961_v63, %v1942_v48 }
0x1ed6   :  { %1967 = vrot.lane.b32.xlu1 %v1963_v0, %s3897_s28 }
0x1ed7   :  { %v1973_v1 = vpop.permute.xlu0 %1972 }
0x1ed8   :  { %v1975_v2 = vsel %vm710_vm7, %v1973_v1, %v1855_v32 }
0x1ed9   :  { %2064 = vrot.lane.b32.xlu0 %v1975_v2, %s3897_s28 }
0x1f48   :  { %v1968_v3 = vpop.permute.xlu1 %1967 }
0x1f49   :  { %v1970_v5 = vsel %vm710_vm7, %v1968_v3, %v1850_v17  ;;  %v1976_v7 = vsel %vm710_vm7, %v1968_v3, 0.0 }
0x1f4a   :  { %1977 = vst.msk [vmem:[%s4780_s14 + $0x10] sm:$0xff] %vm86_vm0, %v1976_v7  ;;  %1978 = vst.msk [vmem:[#allocation3 + $0x28] sm:$0xff] %vm86_vm0, %v1976_v7  ;;  %3453 = vmatmul.mubr.msk.f32.vlgmr.msra.gmra.mrb[26].mxu1 %vm86_vm0, %v1970_v5 }
0x1f4b   :  { %3651 = vmatpush3.bf16.msra.mxu1 %v4382_v52  ;;  %3474 = vmatprep.mubr.msk.f32.mxu1 %vm3894_vm1, %v3895_v35  ;;  %v2065_v20 = vpop.permute.xlu0 %2064 }
0x1f4c   :  { %3652 = vmatprep.subr.bf16.mxu1 %v3893_v19 }
0x1f4f   :  { %3654 = vmatpush3.bf16.msra.mxu1 %v4392_v57 }
0x1f50   :  { %3661 = vmatprep.subr.bf16.mxu1 %v3893_v19 }
0x201d   :  { %v2049_v21 = vpop.f32.mrb[26].mxu1 }
0x201e   :  { %v2053_v26 = vadd.f32 %v2049_v21, %v4472_v34  ;;  %v3454_v6 = vpop.f32.mrb[27].mxu1 }
0x2020   :  { %v3060_v8 = vmul.f32 -1.442695, %v2053_v26 }
0x2022   :  { %3783 = vpow2.f32 %v3060_v8 }
0x202c   :  { %v3784_v9 = vpop.eup %3783 }
0x202d   :  { %v2057_v11 = vadd.f32 1.0, %v3784_v9 }
0x202f   :  { %3785 = vrcp.f32 %v2057_v11 }
0x2039   :  { %v3786_v62 = vpop.eup %3785 }
0x203a   :  { %v2060_v12 = vmul.f32 2.0, %v3786_v62 }
0x203c   :  { %v3061_v13 = vadd.f32 -1.0, %v2060_v12 }
0x203e   :  { %v2062_v14 = vsel %vm4130_vm4, %v3061_v13, %v3786_v62 }
0x203f   :  { %2069 = vrot.lane.b32.xlu1 %v2062_v14, %s3896_s6  ;;  %v2067_v34 = vmul.f32 %v2065_v20, %v2062_v14 }
0x20b1   :  { %v2070_v16 = vpop.permute.xlu1 %2069 }
0x20b2   :  { %v2072_v18 = vmul.f32 %v2070_v16, %v2062_v14 }
0x20b4   :  { %2074 = vrot.lane.b32.xlu1 %v2072_v18, %s3897_s28 }
0x2126   :  { %v2075_v22 = vpop.permute.xlu1 %2074 }
0x2127   :  { %v2077_v23 = vadd.f32 %v2075_v22, %v2067_v34 }
0x2129   :  { %3787 = vtanh.f32 %v2077_v23 }
0x2133   :  { %v3788_v24 = vpop.eup %3787 }
0x2134   :  { %2080 = vrot.lane.b32.xlu0 %v3788_v24, %s3896_s6 }
0x2138   :  { %2092 = vrot.lane.b32.xlu0 %v2077_v23, %s3898_s5 }
0x21a6   :  { %v2081_v25 = vpop.permute.xlu0 %2080 }
0x21a7   :  { %v2083_v28 = vmul.f32 %v2081_v25, %v2062_v14 }
0x21a9   :  { %2087 = vrot.lane.b32.xlu1 %v2083_v28, %s3897_s28 }
0x21aa   :  { %v2093_v29 = vpop.permute.xlu0 %2092 }
0x21ab   :  { %v2095_v30 = vsel %vm830_vm8, %v2093_v29, %v1975_v2 }
0x21ac   :  { %2184 = vrot.lane.b32.xlu0 %v2095_v30, %s3897_s28 }
0x221b   :  { %v2088_v31 = vpop.permute.xlu1 %2087 }
0x221c   :  { %v2090_v32 = vsel %vm830_vm8, %v2088_v31, %v1970_v5  ;;  %v2096_v33 = vsel %vm830_vm8, %v2088_v31, 0.0 }
0x221d   :  { %2097 = vst.msk [vmem:[%s4780_s14 + $0x18] sm:$0xff] %vm86_vm0, %v2096_v33  ;;  %2098 = vst.msk [vmem:[#allocation3 + $0x20] sm:$0xff] %vm86_vm0, %v2096_v33  ;;  %3464 = vmatmul.mubr.msk.f32.vlgmr.msra.gmra.mrb[20].mxu0 %vm86_vm0, %v2090_v32 }
0x221e   :  { %3657 = vmatpush3.bf16.msra.mxu0 %v4382_v52  ;;  %3485 = vmatprep.mubr.msk.f32.mxu0 %vm3894_vm1, %v3895_v35  ;;  %v2185_v48 = vpop.permute.xlu0 %2184 }
0x221f   :  { %3658 = vmatprep.subr.bf16.mxu0 %v3893_v19 }
0x2222   :  { %3660 = vmatpush3.bf16.msra.mxu0 %v4392_v57 }
0x22f0   :  { %v2169_v44 = vpop.f32.mrb[20].mxu0 }
0x22f1   :  { %v2173_v17 = vadd.f32 %v2169_v44, %v4478_v39  ;;  %v3465_v4 = vpop.f32.mrb[21].mxu0 }
0x22f3   :  { %v3063_v53 = vmul.f32 -1.442695, %v2173_v17 }
0x22f5   :  { %3789 = vpow2.f32 %v3063_v53 }
0x22ff   :  { %v3790_v37 = vpop.eup %3789 }
0x2300   :  { %v2177_v38 = vadd.f32 1.0, %v3790_v37 }
0x2302   :  { %3791 = vrcp.f32 %v2177_v38 }
0x230c   :  { %v3792_v59 = vpop.eup %3791 }
0x230d   :  { %v2180_v41 = vmul.f32 2.0, %v3792_v59 }
0x230f   :  { %v3064_v45 = vadd.f32 -1.0, %v2180_v41 }
0x2311   :  { %v2182_v51 = vsel %vm4130_vm4, %v3064_v45, %v3792_v59 }
0x2312   :  { %2189 = vrot.lane.b32.xlu1 %v2182_v51, %s3896_s6  ;;  %v2187_v39 = vmul.f32 %v2185_v48, %v2182_v51 }
0x2384   :  { %v2190_v46 = vpop.permute.xlu1 %2189 }
0x2385   :  { %v2192_v47 = vmul.f32 %v2190_v46, %v2182_v51 }
0x2387   :  { %2194 = vrot.lane.b32.xlu1 %v2192_v47, %s3897_s28 }
0x23f9   :  { %v2195_v49 = vpop.permute.xlu1 %2194 }
0x23fa   :  { %v2197_v50 = vadd.f32 %v2195_v49, %v2187_v39 }
0x23fc   :  { %3793 = vtanh.f32 %v2197_v50 }
0x2406   :  { %v3794_v55 = vpop.eup %3793 }
0x2407   :  { %2200 = vrot.lane.b32.xlu0 %v3794_v55, %s3896_s6 }
0x240b   :  { %2212 = vrot.lane.b32.xlu0 %v2197_v50, %s3898_s5 }
0x2479   :  { %v2201_v36 = vpop.permute.xlu0 %2200 }
0x247a   :  { %v2203_v56 = vmul.f32 %v2201_v36, %v2182_v51 }
0x247c   :  { %2207 = vrot.lane.b32.xlu1 %v2203_v56, %s3897_s28 }
0x247d   :  { %v2213_v60 = vpop.permute.xlu0 %2212 }
0x247e   :  { %v2215_v61 = vsel %vm950_vm9, %v2213_v60, %v2095_v30 }
0x247f   :  { %2304 = vrot.lane.b32.xlu0 %v2215_v61, %s3897_s28 }
0x24ee   :  { %v2208_v63 = vpop.permute.xlu1 %2207 }
0x24ef   :  { %v2210_v0 = vsel %vm950_vm9, %v2208_v63, %v2090_v32  ;;  %v2216_v1 = vsel %vm950_vm9, %v2208_v63, 0.0 }
0x24f0   :  { %2217 = vst.msk [vmem:[%s4780_s14 + $0x20] sm:$0xff] %vm86_vm0, %v2216_v1  ;;  %2218 = vst.msk [vmem:[#allocation3 + $0x18] sm:$0xff] %vm86_vm0, %v2216_v1  ;;  %3475 = vmatmul.mubr.msk.f32.vlgmr.msra.gmra.mrb[28].mxu1 %vm86_vm0, %v2210_v0 }
0x24f1   :  { %3663 = vmatpush3.bf16.msra.mxu1 %v4382_v52  ;;  %3496 = vmatprep.mubr.msk.f32.mxu1 %vm3894_vm1, %v3895_v35 }
0x24f2   :  { %3664 = vmatprep.subr.bf16.mxu1 %v3893_v19 }
0x24f5   :  { %3666 = vmatpush3.bf16.msra.mxu1 %v4392_v57  ;;  %v2305_v57 = vpop.permute.xlu0 %2304 }
0x25c3   :  { %v2289_v54 = vpop.f32.mrb[28].mxu1 }
0x25c4   :  { %v2293_v2 = vadd.f32 %v2289_v54, %v4476_v27  ;;  %v3476_v3 = vpop.f32.mrb[29].mxu1 }
0x25c6   :  { %v3066_v5 = vmul.f32 -1.442695, %v2293_v2 }
0x25c8   :  { %3795 = vpow2.f32 %v3066_v5  ;;  %v2593_v5 = vld [vmem:[%s4778_s12] sm:$0xff] }
0x25d2   :  { %v3796_v7 = vpop.eup %3795 }
0x25d3   :  { %v2297_v21 = vadd.f32 1.0, %v3796_v7  ;;  %v3667_v7 = vpack.c.bf16 %v2594_v15, %v2593_v5 }
0x25d5   :  { %3797 = vrcp.f32 %v2297_v21  ;;  %v2595_v21 = vld [vmem:[%s4778_s12 + $0x10] sm:$0xff]  ;;  %3668 = vmatprep.subr.bf16.mxu0 %v3667_v7 }
0x25df   :  { %v3798_v26 = vpop.eup %3797 }
0x25e0   :  { %v2300_v6 = vmul.f32 2.0, %v3798_v26 }
0x25e2   :  { %v3067_v8 = vadd.f32 -1.0, %v2300_v6 }
0x25e4   :  { %v2302_v52 = vsel %vm4130_vm4, %v3067_v8, %v3798_v26  ;;  %v2596_v26 = vld [vmem:[%s4778_s12 + $0x18] sm:$0xff] }
0x25e5   :  { %2309 = vrot.lane.b32.xlu1 %v2302_v52, %s3896_s6  ;;  %v2307_v27 = vmul.f32 %v2305_v57, %v2302_v52  ;;  %v3671_v6 = vpack.c.bf16 %v2596_v26, %v2595_v21 }
0x2657   :  { %v2310_v19 = vpop.permute.xlu1 %2309 }
0x2658   :  { %v2312_v35 = vmul.f32 %v2310_v19, %v2302_v52  ;;  %v2582_v19 = vld [vmem:[%s4777_s11 + $0x8] sm:$0xff] }
0x265a   :  { %2314 = vrot.lane.b32.xlu1 %v2312_v35, %s3897_s28 }
0x26cc   :  { %v2315_v9 = vpop.permute.xlu1 %2314 }
0x26cd   :  { %v2317_v11 = vadd.f32 %v2315_v9, %v2307_v27 }
0x26cf   :  { %3799 = vtanh.f32 %v2317_v11 }
0x26d9   :  { %v3800_v62 = vpop.eup %3799 }
0x26da   :  { %2320 = vrot.lane.b32.xlu0 %v3800_v62, %s3896_s6  ;;  %v2584_v62 = vld [vmem:[%s4777_s11 + $0x18] sm:$0xff] }
0x26de   :  { %2332 = vrot.lane.b32.xlu0 %v2317_v11, %s3898_s5  ;;  %v2583_v11 = vld [vmem:[%s4777_s11 + $0x10] sm:$0xff] }
0x274c   :  { %v2321_v12 = vpop.permute.xlu0 %2320 }
0x274d   :  { %v2323_v13 = vmul.f32 %v2321_v12, %v2302_v52  ;;  %v2581_v52 = vld [vmem:[%s4777_s11] sm:$0xff] }
0x274e   :  { %v3675_v57 = vpack.c.bf16 %v2582_v19, %v2581_v52 }
0x274f   :  { %2327 = vrot.lane.b32.xlu1 %v2323_v13, %s3897_s28  ;;  %v3679_v13 = vpack.c.bf16 %v2584_v62, %v2583_v11 }
0x2750   :  { %v2333_v14 = vpop.permute.xlu0 %2332 }
0x2751   :  { %v2335_v16 = vsel %vm1070_vm10, %v2333_v14, %v2215_v61 }
0x2752   :  { %2424 = vrot.lane.b32.xlu0 %v2335_v16, %s3897_s28 }
0x27c1   :  { %v2328_v18 = vpop.permute.xlu1 %2327 }
0x27c2   :  { %v2330_v20 = vsel %vm1070_vm10, %v2328_v18, %v2210_v0  ;;  %v2336_v34 = vsel %vm1070_vm10, %v2328_v18, 0.0  ;;  %v2589_v18 = vld [vmem:[#allocation3 + $0x20] sm:$0xff] }
0x27c3   :  { %2337 = vst.msk [vmem:[%s4780_s14 + $0x28] sm:$0xff] %vm86_vm0, %v2336_v34  ;;  %2338 = vst.msk [vmem:[#allocation3 + $0x10] sm:$0xff] %vm86_vm0, %v2336_v34  ;;  %3486 = vmatmul.mubr.msk.f32.vlgmr.msra.gmra.mrb[22].mxu0 %vm86_vm0, %v2330_v20  ;;  %v2591_v34 = vld [vmem:[#allocation3 + $0x30] sm:$0xff] }
0x27c4   :  { %v2425_v17 = vpop.permute.xlu0 %2424  ;;  %3670 = vmatpush3.bf16.msra.mxu0 %v3667_v7 }
0x27c5   :  { %3672 = vmatprep.subr.bf16.mxu0 %v3671_v6 }
0x27c8   :  { %3674 = vmatpush3.bf16.msra.mxu0 %v3671_v6 }
0x27c9   :  { %3676 = vmatprep.subr.bf16.mxu0 %v3675_v57 }
0x27ca   :  { %v2587_v14 = vld [vmem:[#allocation3 + $0x10] sm:$0xff] }
0x2896   :  { %v2409_v22 = vpop.f32.mrb[22].mxu0 }
0x2897   :  { %v2413_v23 = vadd.f32 %v2409_v22, %v4482_v42  ;;  %v3487_v24 = vpop.f32.mrb[23].mxu0  ;;  %v2592_v22 = vld [vmem:[#allocation3 + $0x38] sm:$0xff] }
0x2898   :  { %v2574_v24 = vld [vmem:[%s4780_s14 + $0x8] sm:$0xff] }
0x2899   :  { %v3069_v25 = vmul.f32 -1.442695, %v2413_v23  ;;  %v2573_v23 = vld [vmem:[%s4780_s14] sm:$0xff] }
0x289b   :  { %3801 = vpow2.f32 %v3069_v25  ;;  %v2575_v25 = vld [vmem:[%s4780_s14 + $0x10] sm:$0xff] }
0x28a5   :  { %v3802_v28 = vpop.eup %3801 }
0x28a6   :  { %v2417_v29 = vadd.f32 1.0, %v3802_v28  ;;  %v2576_v28 = vld [vmem:[%s4780_s14 + $0x18] sm:$0xff] }
0x28a8   :  { %3803 = vrcp.f32 %v2417_v29  ;;  %v2577_v29 = vld [vmem:[%s4780_s14 + $0x20] sm:$0xff] }
0x28b2   :  { %v3804_v43 = vpop.eup %3803 }
0x28b3   :  { %v2420_v30 = vmul.f32 2.0, %v3804_v43 }
0x28b5   :  { %v3070_v31 = vadd.f32 -1.0, %v2420_v30 }
0x28b7   :  { %v2422_v32 = vsel %vm4130_vm4, %v3070_v31, %v3804_v43  ;;  %v2578_v43 = vld [vmem:[%s4780_s14 + $0x28] sm:$0xff] }
0x28b8   :  { %2429 = vrot.lane.b32.xlu1 %v2422_v32, %s3896_s6  ;;  %v2427_v42 = vmul.f32 %v2425_v17, %v2422_v32 }
0x292a   :  { %v2430_v33 = vpop.permute.xlu1 %2429 }
0x292b   :  { %v2432_v44 = vmul.f32 %v2430_v33, %v2422_v32 }
0x292d   :  { %2434 = vrot.lane.b32.xlu1 %v2432_v44, %s3897_s28 }
0x299f   :  { %v2435_v4 = vpop.permute.xlu1 %2434 }
0x29a0   :  { %v2437_v53 = vadd.f32 %v2435_v4, %v2427_v42 }
0x29a2   :  { %3805 = vtanh.f32 %v2437_v53 }
0x29ac   :  { %v3806_v37 = vpop.eup %3805 }
0x29ad   :  { %2440 = vrot.lane.b32.xlu0 %v3806_v37, %s3896_s6 }
0x29b1   :  { %2452 = vrot.lane.b32.xlu0 %v2437_v53, %s3898_s5 }
0x2a1f   :  { %v2441_v38 = vpop.permute.xlu0 %2440 }
0x2a20   :  { %v2443_v59 = vmul.f32 %v2441_v38, %v2422_v32  ;;  %v3090_v32 = vld [vmem:[%s4779_s13] ss:$0 sm:$0xff]  ;;  %s3899_s13 = smov [#allocation4]  }
0x2a22   :  { %2447 = vrot.lane.b32.xlu1 %v2443_v59, %s3897_s28 }
0x2a23   :  { %v2453_v41 = vpop.permute.xlu0 %2452 }
0x2a24   :  { %v2455_v45 = vsel %vm1190_vm11, %v2453_v41, %v2335_v16  ;;  %v2588_v16 = vld [vmem:[#allocation3 + $0x18] sm:$0xff] }
0x2a25   :  { %2544 = vrot.lane.b32.xlu0 %v2455_v45, %s3897_s28 }
0x2a94   :  { %v2448_v51 = vpop.permute.xlu1 %2447 }
0x2a95   :  { %v2450_v46 = vsel %vm1190_vm11, %v2448_v51, %v2330_v20  ;;  %v2456_v47 = vsel %vm1190_vm11, %v2448_v51, 0.0  ;;  %v2590_v20 = vld [vmem:[#allocation3 + $0x28] sm:$0xff] }
0x2a96   :  { %2457 = vst.msk [vmem:[%s4780_s14 + $0x30] sm:$0xff] %vm86_vm0, %v2456_v47  ;;  %2458 = vst.msk [vmem:[#allocation3 + $0x8] sm:$0xff] %vm86_vm0, %v2456_v47  ;;  %3497 = vmatmul.mubr.msk.f32.vlgmr.msra.gmra.mrb[30].mxu1 %vm86_vm0, %v2450_v46 }
0x2a97   :  { %v2545_v1 = vpop.permute.xlu0 %2544 }
0x2a9d   :  { %v2586_v58 = vld [vmem:[#allocation3 + $0x8] sm:$0xff]  ;;  %v2579_v30 = vld [vmem:[%s4780_s14 + $0x30] sm:$0xff] }
0x2b69   :  { %v2529_v48 = vpop.f32.mrb[30].mxu1 }
0x2b6a   :  { %v2533_v39 = vadd.f32 %v2529_v48, %v4480_v40  ;;  %v3498_v49 = vpop.f32.mrb[31].mxu1 }
0x2b6c   :  { %v3072_v50 = vmul.f32 -1.442695, %v2533_v39 }
0x2b6e   :  { %3807 = vpow2.f32 %v3072_v50 }
0x2b78   :  { %v3808_v55 = vpop.eup %3807 }
0x2b79   :  { %v2537_v36 = vadd.f32 1.0, %v3808_v55 }
0x2b7b   :  { %3809 = vrcp.f32 %v2537_v36 }
0x2b85   :  { %v3810_v10 = vpop.eup %3809 }
0x2b86   :  { %v2540_v56 = vmul.f32 2.0, %v3810_v10 }
0x2b88   :  { %v3073_v60 = vadd.f32 -1.0, %v2540_v56 }
0x2b8a   :  { %v2542_v61 = vsel %vm4130_vm4, %v3073_v60, %v3810_v10 }
0x2b8b   :  { %2549 = vrot.lane.b32.xlu1 %v2542_v61, %s3896_s6  ;;  %v2547_v40 = vmul.f32 %v2545_v1, %v2542_v61 }
0x2bfd   :  { %v2550_v63 = vpop.permute.xlu1 %2549 }
0x2bfe   :  { %v2552_v0 = vmul.f32 %v2550_v63, %v2542_v61 }
0x2c00   :  { %2554 = vrot.lane.b32.xlu1 %v2552_v0, %s3897_s28 }
0x2c72   :  { %v2555_v54 = vpop.permute.xlu1 %2554 }
0x2c73   :  { %v2557_v2 = vadd.f32 %v2555_v54, %v2547_v40 }
0x2c75   :  { %3811 = vtanh.f32 %v2557_v2 }
0x2c7f   :  { %v3812_v3 = vpop.eup %3811 }
0x2c80   :  { %2560 = vrot.lane.b32.xlu0 %v3812_v3, %s3896_s6 }
0x2cf2   :  { %v2561_v8 = vpop.permute.xlu0 %2560 }
0x2cf3   :  { %v2563_v35 = vmul.f32 %v2561_v8, %v2542_v61 }
0x2cf5   :  { %2567 = vrot.lane.b32.xlu1 %v2563_v35, %s3897_s28 }
0x2d67   :  { %v2568_v27 = vpop.permute.xlu1 %2567 }
0x2d68   :  { %v2570_v9 = vsel %vm1310_vm12, %v2568_v27, 0.0 }
0x2d69   :  { %2571 = vst.msk [vmem:[%s4780_s14 + $0x38] sm:$0xff] %vm86_vm0, %v2570_v9  ;;  %2572 = vst.msk [vmem:[#allocation3] sm:$0xff] %vm86_vm0, %v2570_v9 }
0x2d70   :  { %v2585_v12 = vld [vmem:[#allocation3] sm:$0xff]  ;;  %v2580_v31 = vld [vmem:[%s4780_s14 + $0x38] sm:$0xff]  ;;  %s2965_s14 = sshll.u32 %s3899_s13, 4  ;;  %s2966_s14 = int_to_ptr.vmem [resolvable:$true] %s2965_s14 }
0x2d71   :  { %3507 = vmatprep.mubr.msk.f32.mxu0 %vm86_vm0, %v2585_v12  ;;  %s3845_s25 = scalar_lea.vmem %s2966_s14, 1024  ;;  %p3850_p1 = scmp.lt.s32.totalorder %s2966_s14, %s2966_s14 }
0x2d72   :  { %3508 = vmatmul.mubr.msk.f32.vlgmr.msra.gmra.mrb[24].mxu0 %vm86_vm0, %v2586_v58  ;;  %p3846_p0 = scmp.ne.s32.totalorder %s2966_s14, %s3845_s25  ;;  %p3851_p2 = scmp.lt.s32.totalorder %s3845_s25, %s3845_s25 }
0x2d73   :  { %3510 = vmatprep.mubr.msk.f32.mxu0 %vm86_vm0, %v2587_v14  ;;  %3678 = vmatpush3.bf16.msra.mxu0 %v3675_v57 }
0x2d74   :  { %3680 = vmatprep.subr.bf16.mxu0 %v3679_v13  ;;  %p3852_p3 = por %p3851_p2, %p3850_p1 }
0x2d76   :  { %3511 = vmatmul.mubr.msk.f32.gmra.mrb[26].mxu0 %vm86_vm0, %v2588_v16  ;;  %p3853_p4 = pnand %p3852_p3, %p3846_p0 }
0x2d77   :  { %3513 = vmatprep.mubr.msk.f32.mxu0 %vm86_vm0, %v2589_v18  ;;  %3682 = vmatpush3.bf16.msra.mxu0 %v3679_v13 }
0x2d7a   :  { %3514 = vmatmul.mubr.msk.f32.gmra.mrb[28].mxu0 %vm86_vm0, %v2590_v20 }
0x2d7b   :  { %3516 = vmatprep.mubr.msk.f32.mxu0 %vm86_vm0, %v2591_v34 }
0x2d7e   :  { %3517 = vmatmul.mubr.msk.f32.gmra.mrb[30].mxu0 %vm86_vm0, %v2592_v22 }
0x2d7f   :  { %3527 = vmatprep.mubr.msk.f32.mxu0 %vm86_vm0, %v2573_v23 }
0x2d82   :  { %3528 = vmatmul.mubr.msk.f32.vlgmr.msra.gmra.mrb[24].mxu0 %vm86_vm0, %v2574_v24 }
0x2d83   :  { %3530 = vmatprep.mubr.msk.f32.mxu0 %vm86_vm0, %v2575_v25 }
0x2d86   :  { %3531 = vmatmul.mubr.msk.f32.gmra.mrb[26].mxu0 %vm86_vm0, %v2576_v28 }
0x2d87   :  { %3533 = vmatprep.mubr.msk.f32.mxu0 %vm86_vm0, %v2577_v29 }
0x2d8a   :  { %3534 = vmatmul.mubr.msk.f32.gmra.mrb[28].mxu0 %vm86_vm0, %v2578_v43 }
0x2d8b   :  { %3536 = vmatprep.mubr.msk.f32.mxu0 %vm86_vm0, %v2579_v30 }
0x2d8e   :  { %3537 = vmatmul.mubr.msk.f32.gmra.mrb[30].mxu0 %vm86_vm0, %v2580_v31 }
0x2e55   :  { %v3529_v33 = vpop.f32.mrb[24].mxu0 }
0x2e56   :  { %v2863_v44 = vadd.f32 %v3529_v33, %v3090_v32  ;;  %v2816_v17 = vpop.f32.mrb[25].mxu0 }
0x2e57   :  { %v2862_v42 = vadd.f32 %v3090_v32, %v2816_v17 }
0x2e58   :  { %2871 = vst [vmem:[#allocation4 + $0x8] sm:$0xff] %v2863_v44  ;;  %2880 = vmax.xlane.f32.xlu1 %v2863_v44 }
0x2e59   :  { %2870 = vst [vmem:[#allocation4] sm:$0xff] %v2862_v42  ;;  %2878 = vmax.xlane.f32.xlu0 %v2862_v42  ;;  %v3532_v4 = vpop.f32.mrb[26].mxu0 }
0x2e5a   :  { %v2865_v53 = vadd.f32 %v3532_v4, %v3090_v32  ;;  %v2826_v37 = vpop.f32.mrb[27].mxu0 }
0x2e5b   :  { %v2864_v38 = vadd.f32 %v3090_v32, %v2826_v37 }
0x2e5c   :  { %2873 = vst [vmem:[#allocation4 + $0x18] sm:$0xff] %v2865_v53 }
0x2e5d   :  { %2872 = vst [vmem:[#allocation4 + $0x10] sm:$0xff] %v2864_v38  ;;  %2884 = vmax.xlane.f32.xlu0 %v2865_v53  ;;  %v3535_v59 = vpop.f32.mrb[28].mxu0 }
0x2e5e   :  { %v2867_v41 = vadd.f32 %v3535_v59, %v3090_v32  ;;  %v2836_v45 = vpop.f32.mrb[29].mxu0 }
0x2e5f   :  { %v2866_v51 = vadd.f32 %v3090_v32, %v2836_v45 }
0x2e60   :  { %2875 = vst [vmem:[#allocation4 + $0x28] sm:$0xff] %v2867_v41 }
0x2e61   :  { %2874 = vst [vmem:[#allocation4 + $0x20] sm:$0xff] %v2866_v51  ;;  %2882 = vmax.xlane.f32.xlu0 %v2864_v38  ;;  %2886 = vmax.xlane.f32.xlu1 %v2866_v51  ;;  %v3538_v46 = vpop.f32.mrb[30].mxu0 }
0x2e62   :  { %v2869_v47 = vadd.f32 %v3538_v46, %v3090_v32  ;;  %v2846_v48 = vpop.f32.mrb[31].mxu0 }
0x2e63   :  { %v2868_v39 = vadd.f32 %v3090_v32, %v2846_v48 }
0x2e64   :  { %2877 = vst [vmem:[#allocation4 + $0x38] sm:$0xff] %v2869_v47 }
0x2e65   :  { %2876 = vst [vmem:[#allocation4 + $0x30] sm:$0xff] %v2868_v39  ;;  %2888 = vmax.xlane.f32.xlu0 %v2867_v41  ;;  %2890 = vmax.xlane.f32.xlu1 %v2868_v39 }
0x2e69   :  { %2892 = vmax.xlane.f32.xlu0 %v2869_v47 }
0x2ee5   :  { %v2881_v49 = vpop.xlane.xlu1 %2880 }
0x2ee6   :  { %v2895_v50 = vsub.f32 %v2863_v44, %v2881_v49  ;;  %v2879_v55 = vpop.xlane.xlu0 %2878 }
0x2ee7   :  { %v2894_v36 = vsub.f32 %v2862_v42, %v2879_v55 }
0x2ee8   :  { %v2904_v10 = vmul.f32 1.442695, %v2895_v50 }
0x2ee9   :  { %v2902_v56 = vmul.f32 1.442695, %v2894_v36 }
0x2eea   :  { %3813 = vpow2.f32 %v2904_v10  ;;  %v2885_v60 = vpop.xlane.xlu0 %2884 }
0x2eeb   :  { %3815 = vpow2.f32 %v2902_v56  ;;  %v2897_v61 = vsub.f32 %v2865_v53, %v2885_v60 }
0x2eed   :  { %v2908_v63 = vmul.f32 1.442695, %v2897_v61 }
0x2eee   :  { %v2883_v0 = vpop.xlane.xlu0 %2882  ;;  %v2887_v1 = vpop.xlane.xlu1 %2886 }
0x2eef   :  { %3817 = vpow2.f32 %v2908_v63  ;;  %v2896_v40 = vsub.f32 %v2864_v38, %v2883_v0  ;;  %v2898_v54 = vsub.f32 %v2866_v51, %v2887_v1 }
0x2ef1   :  { %v2906_v2 = vmul.f32 1.442695, %v2896_v40  ;;  %v2910_v3 = vmul.f32 1.442695, %v2898_v54 }
0x2ef2   :  { %v2889_v5 = vpop.xlane.xlu0 %2888  ;;  %v2891_v15 = vpop.xlane.xlu1 %2890 }
0x2ef3   :  { %3819 = vpow2.f32 %v2906_v2  ;;  %v2899_v7 = vsub.f32 %v2867_v41, %v2889_v5  ;;  %v2900_v21 = vsub.f32 %v2868_v39, %v2891_v15 }
0x2ef4   :  { %v3814_v26 = vpop.eup %3813  ;;  %3821 = vpow2.f32 %v2910_v3 }
0x2ef5   :  { %v3816_v6 = vpop.eup %3815  ;;  %v2912_v8 = vmul.f32 1.442695, %v2899_v7  ;;  %2920 = vadd.xlane.f32.xlu0 %v3814_v26  ;;  %v2914_v52 = vmul.f32 1.442695, %v2900_v21 }
0x2ef6   :  { %v2893_v19 = vpop.xlane.xlu0 %2892  ;;  %2918 = vadd.xlane.f32.xlu1 %v3816_v6 }
0x2ef7   :  { %3823 = vpow2.f32 %v2912_v8  ;;  %v2901_v35 = vsub.f32 %v2869_v47, %v2893_v19 }
0x2ef8   :  { %3825 = vpow2.f32 %v2914_v52 }
0x2ef9   :  { %v3818_v57 = vpop.eup %3817  ;;  %v2916_v27 = vmul.f32 1.442695, %v2901_v35 }
0x2efa   :  { %2924 = vadd.xlane.f32.xlu0 %v3818_v57 }
0x2efb   :  { %3827 = vpow2.f32 %v2916_v27 }
0x2efd   :  { %v3820_v9 = vpop.eup %3819 }
0x2efe   :  { %2922 = vadd.xlane.f32.xlu1 %v3820_v9  ;;  %v3822_v11 = vpop.eup %3821 }
0x2f01   :  { %v3824_v62 = vpop.eup %3823 }
0x2f02   :  { %2928 = vadd.xlane.f32.xlu0 %v3824_v62  ;;  %2926 = vadd.xlane.f32.xlu1 %v3822_v11  ;;  %v3826_v12 = vpop.eup %3825 }
0x2f05   :  { %v3828_v13 = vpop.eup %3827 }
0x2f06   :  { %2932 = vadd.xlane.f32.xlu0 %v3828_v13  ;;  %2930 = vadd.xlane.f32.xlu1 %v3826_v12 }
0x2f07   :  { %3856 = shalt.err (!%p3853_p4)
}
0x2f08   :  { %s3857_s12 = scalar_lea.hbm %s4781_s15, 1024 }
0x2f09   :  { %p3858_p5 = scmp.ne.s32.totalorder %s4781_s15, %s3857_s12  ;;  %p3861_p6 = scmp.lt.u32.totalorder %s3857_s12, %s4781_s15 }
0x2f0b   :  { %p3863_p7 = pnand %p3861_p6, %p3858_p5 }
0x2f0d   :  { %3866 = shalt.err (!%p3863_p7)
}
0x2f0e   :  { %s3900_s17 = smov 128   ;;  %s3901_s11 = smov 8  }
0x2f0f   :  { %2971 = dma.vmem_to_hbm [thread:$0]  %s2966_s14, 1024, %s4781_s15, [#allocation5], %s3900_s17, %s3900_s17, %s3901_s11  }
0x2f10   :  { %s3902_s15 = smov [#allocation6]  }
0x2f11   :  { %s2977_s19 = sshll.u32 %s3902_s15, 4  ;;  %s2978_s19 = int_to_ptr.vmem [resolvable:$true] %s2977_s19 }
0x2f12   :  { %s3867_s8 = scalar_lea.vmem %s2978_s19, 1024  ;;  %p3872_p9 = scmp.lt.s32.totalorder %s2978_s19, %s2978_s19 }
0x2f13   :  { %p3868_p8 = scmp.ne.s32.totalorder %s2978_s19, %s3867_s8  ;;  %p3873_p10 = scmp.lt.s32.totalorder %s3867_s8, %s3867_s8 }
0x2f15   :  { %p3874_p11 = por %p3873_p10, %p3872_p9 }
0x2f17   :  { %p3875_p12 = pnand %p3874_p11, %p3868_p8 }
0x2f82   :  { %v2921_v58 = vpop.xlane.xlu0 %2920 }
0x2f83   :  { %3829 = vrcp.f32 %v2921_v58  ;;  %v2919_v14 = vpop.xlane.xlu1 %2918 }
0x2f84   :  { %3831 = vrcp.f32 %v2919_v14 }
0x2f87   :  { %v2925_v16 = vpop.xlane.xlu0 %2924 }
0x2f88   :  { %3833 = vrcp.f32 %v2925_v16 }
0x2f8b   :  { %v2923_v18 = vpop.xlane.xlu1 %2922 }
0x2f8c   :  { %3835 = vrcp.f32 %v2923_v18 }
0x2f8d   :  { %v3830_v20 = vpop.eup %3829 }
0x2f8e   :  { %v3832_v34 = vpop.eup %3831  ;;  %v2937_v22 = vmul.f32 %v3830_v20, %v3814_v26 }
0x2f8f   :  { %v2935_v23 = vmul.f32 %v3832_v34, %v3816_v6  ;;  %v2929_v24 = vpop.xlane.xlu0 %2928  ;;  %v2927_v25 = vpop.xlane.xlu1 %2926 }
0x2f90   :  { %2951 = vst [vmem:[#allocation6 + $0x8] sm:$0xff] %v2937_v22  ;;  %3837 = vrcp.f32 %v2929_v24 }
0x2f91   :  { %2950 = vst [vmem:[#allocation6] sm:$0xff] %v2935_v23  ;;  %3839 = vrcp.f32 %v2927_v25 }
0x2f92   :  { %v3834_v28 = vpop.eup %3833 }
0x2f93   :  { %v2941_v29 = vmul.f32 %v3834_v28, %v3818_v57  ;;  %v2933_v43 = vpop.xlane.xlu0 %2932  ;;  %v2931_v30 = vpop.xlane.xlu1 %2930 }
0x2f94   :  { %3841 = vrcp.f32 %v2933_v43 }
0x2f95   :  { %2953 = vst [vmem:[#allocation6 + $0x18] sm:$0xff] %v2941_v29  ;;  %3843 = vrcp.f32 %v2931_v30 }
0x2f96   :  { %v3836_v31 = vpop.eup %3835 }
0x2f97   :  { %v2939_v32 = vmul.f32 %v3836_v31, %v3820_v9 }
0x2f99   :  { %2952 = vst [vmem:[#allocation6 + $0x10] sm:$0xff] %v2939_v32 }
0x2f9a   :  { %v3838_v33 = vpop.eup %3837 }
0x2f9b   :  { %v3840_v44 = vpop.eup %3839  ;;  %v2945_v17 = vmul.f32 %v3838_v33, %v3824_v62 }
0x2f9c   :  { %v2943_v42 = vmul.f32 %v3840_v44, %v3822_v11 }
0x2f9d   :  { %2955 = vst [vmem:[#allocation6 + $0x28] sm:$0xff] %v2945_v17 }
0x2f9e   :  { %v3842_v4 = vpop.eup %3841  ;;  %2954 = vst [vmem:[#allocation6 + $0x20] sm:$0xff] %v2943_v42 }
0x2f9f   :  { %v3844_v53 = vpop.eup %3843  ;;  %v2949_v37 = vmul.f32 %v3842_v4, %v3828_v13 }
0x2fa0   :  { %v2947_v38 = vmul.f32 %v3844_v53, %v3826_v12 }
0x2fa1   :  { %2957 = vst [vmem:[#allocation6 + $0x38] sm:$0xff] %v2949_v37 }
0x2fa2   :  { %2956 = vst [vmem:[#allocation6 + $0x30] sm:$0xff] %v2947_v38 }
0x2fa3   :  { %3878 = shalt.err (!%p3875_p12)
}
0x2fa4   :  { %s3879_s22 = scalar_lea.hbm %s4782_s16, 1024 }
0x2fa5   :  { %p3880_p13 = scmp.ne.s32.totalorder %s4782_s16, %s3879_s22  ;;  %p3883_p0 = scmp.lt.u32.totalorder %s3879_s22, %s4782_s16 }
0x2fa7   :  { %p3885_p1 = pnand %p3883_p0, %p3880_p13 }
0x2fa9   :  { %3888 = shalt.err (!%p3885_p1)
}
0x2faa   :  { %2983 = dma.vmem_to_hbm [thread:$0]  %s2978_s19, 1024, %s4782_s16, [#allocation7], %s3900_s17, %s3900_s17, %s3901_s11  }
0x2fab   :  { %3889 = dma.done.wait [#allocation5], 1024  }
0x2fac   :  { %3890 = vsyncadd [#allocation5], 4294966272 }
0x2fad   :  { %3891 = dma.done.wait [#allocation7], 1024  }
0x2fae   :  { %3892 = vsyncadd [#allocation7], 4294966272 }
0x2faf   :  { %2992 = vsyncpa [#allocation5], 1 }
0x2fb0   :  { %2993 = vsyncpa [#allocation7], 1 }

</bundles_post_ra>
